<compile_context>
chip_gen: v6e
topology: v6e:2x2x1
jax: 0.10.0
libtpu: 0.0.40
codegen_flags: <defaults>
</compile_context>

<pallas_src>
import functools
import math

import jax
import jax.numpy as jnp
import numpy as np
from jax.experimental import pallas as pl
from jax.experimental.pallas import tpu as pltpu


def _round_up(x, m):
    return ((x + m - 1) // m) * m


def _lstm_reg_kernel(*refs, num_layers, batch, seq_len, hidden_pad):
    """refs layout:
       [x_ref (S*B, in),
        (w_ih_0 (in,4Hp), w_hh_0 (Hp,4Hp), b_0 (1,4Hp)), ..., per layer,
        w_reg (Hp, O), b_reg (1, O),
        out_ref (S*B, O),                 # pallas output
        xproj_ref (S*B, 4Hp),             # VMEM scratch: hoisted input projection
        seq_ref (S*B, Hp)]                # VMEM scratch: running layer activations
    """
    Hp = hidden_pad
    B = batch
    S = seq_len
    n_in = 1 + 3 * num_layers + 2
    x_ref = refs[0]
    layer_refs = refs[1:1 + 3 * num_layers]
    w_reg_ref = refs[1 + 3 * num_layers]
    b_reg_ref = refs[2 + 3 * num_layers]
    out_ref = refs[n_in]
    xproj_ref = refs[n_in + 1]
    seq_ref = refs[n_in + 2]

    def sigmoid(z):
        # 1/(1+exp(-z)) == 0.5*tanh(z/2)+0.5 ; tanh runs on the EUP and avoids
        # the per-gate f32 divide on the recurrence critical path.
        return 0.5 * jnp.tanh(0.5 * z) + 0.5

    # Static loop over LSTM layers.
    for layer in range(num_layers):
        w_ih_ref = layer_refs[3 * layer]      # (in_feat, 4Hp)
        w_hh_ref = layer_refs[3 * layer + 1]  # (Hp, 4Hp)
        b_ref = layer_refs[3 * layer + 2]     # (1, 4Hp)  (b_ih + b_hh, gate order i,f,g,o)

        # --- Hoisted input projection: one full-sequence matmul, bias folded in.
        x_in = x_ref[...] if layer == 0 else seq_ref[...]
        xproj_ref[...] = (
            jnp.dot(x_in, w_ih_ref[...], preferred_element_type=jnp.float32)
            + b_ref[...])

        # --- Serial recurrence over time, fully unrolled (S is small & static).
        h = jnp.zeros((B, Hp), jnp.float32)
        c = jnp.zeros((B, Hp), jnp.float32)
        for t in range(S):
            row = t * B
            gates = (xproj_ref[pl.ds(row, B), :]
                     + jnp.dot(h, w_hh_ref[...],
                               preferred_element_type=jnp.float32))   # (B, 4Hp)
            # Gate blocks padded to 128 lanes -> slices land on vreg boundaries.
            i_g = sigmoid(gates[:, 0 * Hp:1 * Hp])
            f_g = sigmoid(gates[:, 1 * Hp:2 * Hp])
            g_g = jnp.tanh(gates[:, 2 * Hp:3 * Hp])
            o_g = sigmoid(gates[:, 3 * Hp:4 * Hp])
            c = f_g * c + i_g * g_g
            h = o_g * jnp.tanh(c)
            seq_ref[pl.ds(row, B), :] = h     # this layer's hidden state at time t

    # --- Linear regression head: single (S*B, Hp) x (Hp, O) matmul.
    out_ref[...] = (
        jnp.dot(seq_ref[...], w_reg_ref[...], preferred_element_type=jnp.float32)
        + b_reg_ref[...])


def lstm_reg_forward(x, layer_params, w_reg, b_reg):
    """x: (S, B, input_size) f32. layer_params: list of (w_ih (in,4H), w_hh (H,4H), b (4H,))."""
    S, B, input_size = x.shape
    num_layers = len(layer_params)
    H = layer_params[0][1].shape[0]
    O = w_reg.shape[1]
    Hp = _round_up(H, 128)   # lane-aligned gate blocks

    def pad_gate_cols(w):
        # (in_feat, 4H) -> (in_feat, 4*Hp), each gate block zero-padded to Hp lanes.
        in_feat = w.shape[0]
        w4 = w.reshape(in_feat, 4, H)
        w4 = jnp.pad(w4, ((0, 0), (0, 0), (0, Hp - H)))
        return w4.reshape(in_feat, 4 * Hp)

    flat_inputs = [x.reshape(S * B, input_size).astype(jnp.float32)]
    for layer, (w_ih, w_hh, b) in enumerate(layer_params):
        w_ih = w_ih.astype(jnp.float32)
        w_hh = w_hh.astype(jnp.float32)
        b = b.astype(jnp.float32)
        if layer > 0:
            # inputs to this layer are Hp-padded hidden states -> pad weight rows
            w_ih = jnp.pad(w_ih, ((0, Hp - H), (0, 0)))
        w_ih_p = pad_gate_cols(w_ih)
        w_hh_p = pad_gate_cols(jnp.pad(w_hh, ((0, Hp - H), (0, 0))))
        b_p = jnp.pad(b.reshape(4, H), ((0, 0), (0, Hp - H))).reshape(1, 4 * Hp)
        flat_inputs += [w_ih_p, w_hh_p, b_p]
    w_reg_p = jnp.pad(w_reg.astype(jnp.float32), ((0, Hp - H), (0, 0)))   # (Hp, O)
    flat_inputs += [w_reg_p, b_reg.reshape(1, -1).astype(jnp.float32)]

    kernel = functools.partial(_lstm_reg_kernel, num_layers=num_layers,
                               batch=B, seq_len=S, hidden_pad=Hp)

    out_flat = pl.pallas_call(
        kernel,
        out_shape=jax.ShapeDtypeStruct((S * B, O), jnp.float32),
        in_specs=[pl.BlockSpec(memory_space=pltpu.MemorySpace.VMEM)] * len(flat_inputs),
        out_specs=pl.BlockSpec(memory_space=pltpu.MemorySpace.VMEM),
        scratch_shapes=[pltpu.VMEM((S * B, 4 * Hp), jnp.float32),
                        pltpu.VMEM((S * B, Hp), jnp.float32)],
        compiler_params=pltpu.CompilerParams(vmem_limit_bytes=32 * 1024 * 1024),
    )(*flat_inputs)
    return out_flat.reshape(S, B, O)


def lstm_reg_reference(x, layer_params, w_reg, b_reg):
    """Pure-JAX reference of the PyTorch forward pass (for verification)."""
    S, B, _ = x.shape
    h_seq = x
    for (w_ih, w_hh, b) in layer_params:
        H = w_hh.shape[0]
        h = jnp.zeros((B, H), jnp.float32)
        c = jnp.zeros((B, H), jnp.float32)
        outs = []
        for t in range(S):
            gates = h_seq[t] @ w_ih + h @ w_hh + b
            i_g = jax.nn.sigmoid(gates[:, 0:H])
            f_g = jax.nn.sigmoid(gates[:, H:2 * H])
            g_g = jnp.tanh(gates[:, 2 * H:3 * H])
            o_g = jax.nn.sigmoid(gates[:, 3 * H:4 * H])
            c = f_g * c + i_g * g_g
            h = o_g * jnp.tanh(c)
            outs.append(h)
        h_seq = jnp.stack(outs, axis=0)
    out = jnp.einsum('sbh,ho->sbo', h_seq, w_reg) + b_reg.reshape(1, 1, -1)
    return out


def init_params(key, input_size, hidden_size, num_layers, output_size):
    """Deterministic synthetic init mirroring nn.LSTM / nn.Linear shapes (uniform(-k, k))."""
    k = 1.0 / math.sqrt(hidden_size)
    layer_params = []
    for layer in range(num_layers):
        in_feat = input_size if layer == 0 else hidden_size
        key, k1, k2, k3, k4 = jax.random.split(key, 5)
        # stored pre-transposed: (in_feat, 4H) so the kernel does x @ w_ih; gate order i,f,g,o
        w_ih = jax.random.uniform(k1, (in_feat, 4 * hidden_size), jnp.float32, -k, k)
        w_hh = jax.random.uniform(k2, (hidden_size, 4 * hidden_size), jnp.float32, -k, k)
        b_ih = jax.random.uniform(k3, (4 * hidden_size,), jnp.float32, -k, k)
        b_hh = jax.random.uniform(k4, (4 * hidden_size,), jnp.float32, -k, k)
        layer_params.append((w_ih, w_hh, b_ih + b_hh))
    key, k5, k6 = jax.random.split(key, 3)
    w_reg = jax.random.uniform(k5, (hidden_size, output_size), jnp.float32, -k, k)
    b_reg = jax.random.uniform(k6, (output_size,), jnp.float32, -k, k)
    return layer_params, w_reg, b_reg


if __name__ == "__main__":
    S, B = 8, 2
    input_size, hidden_size, num_layers, output_size = 8, 32, 2, 1

    key = jax.random.PRNGKey(0)
    key, xkey = jax.random.split(key)
    x = jax.random.normal(xkey, (S, B, input_size), jnp.float32)

    layer_params, w_reg, b_reg = init_params(key, input_size, hidden_size,
                                             num_layers, output_size)

    out = lstm_reg_forward(x, layer_params, w_reg, b_reg)
    out = jax.block_until_ready(out)

    ref = jax.block_until_ready(lstm_reg_reference(x, layer_params, w_reg, b_reg))
    assert out.shape == (S, B, output_size)
    np.testing.assert_allclose(np.asarray(out), np.asarray(ref), rtol=1e-4, atol=1e-4)
    print("KERNEL_OK")
</pallas_src>

<mosaic_0001>
module attributes {stable_mosaic.version = 11 : i64} {
  func.func @_lstm_reg_kernel(%arg0: memref<16x8xf32, #tpu.memory_space<vmem>>, %arg1: memref<8x512xf32, #tpu.memory_space<vmem>>, %arg2: memref<128x512xf32, #tpu.memory_space<vmem>>, %arg3: memref<1x512xf32, #tpu.memory_space<vmem>>, %arg4: memref<128x512xf32, #tpu.memory_space<vmem>>, %arg5: memref<128x512xf32, #tpu.memory_space<vmem>>, %arg6: memref<1x512xf32, #tpu.memory_space<vmem>>, %arg7: memref<128x1xf32, #tpu.memory_space<vmem>>, %arg8: memref<1x1xf32, #tpu.memory_space<vmem>>, %arg9: memref<16x1xf32, #tpu.memory_space<vmem>>, %arg10: memref<16x512xf32, #tpu.memory_space<vmem>>, %arg11: memref<16x128xf32, #tpu.memory_space<vmem>>) attributes {dimension_semantics = [], scalar_prefetch = 0 : i64, scratch_operands = 2 : i64, tpu.core_type = #tpu.core_type<tc>} {
    %c0 = arith.constant 0 : index
    %c0_0 = arith.constant 0 : index
    %0 = vector.load %arg0[%c0, %c0_0] : memref<16x8xf32, #tpu.memory_space<vmem>>, vector<16x8xf32>
    %c0_1 = arith.constant 0 : index
    %c0_2 = arith.constant 0 : index
    %1 = vector.load %arg1[%c0_1, %c0_2] : memref<8x512xf32, #tpu.memory_space<vmem>>, vector<8x512xf32>
    %cst = arith.constant dense<0.000000e+00> : vector<16x512xf32>
    %2 = tpu.matmul %0, %1, %cst {dimension_numbers = #tpu.dot_dimension_numbers<[1], [0], [0], [1], [0, 0, 1, 1], [], []>} : vector<16x8xf32>, vector<8x512xf32>, vector<16x512xf32> -> vector<16x512xf32>
    %c0_3 = arith.constant 0 : index
    %c0_4 = arith.constant 0 : index
    %3 = vector.load %arg3[%c0_3, %c0_4] : memref<1x512xf32, #tpu.memory_space<vmem>>, vector<1x512xf32>
    %4 = vector.broadcast %3 : vector<1x512xf32> to vector<16x512xf32>
    %5 = arith.addf %2, %4 : vector<16x512xf32>
    %c0_5 = arith.constant 0 : index
    %c0_6 = arith.constant 0 : index
    %6 = vector.load %arg10[%c0_5, %c0_6] : memref<16x512xf32, #tpu.memory_space<vmem>>, vector<16x512xf32>
    tpu.vector_store %arg10[%c0_5, %c0_6], %5 {strides = array<i32>} : memref<16x512xf32, #tpu.memory_space<vmem>>, vector<16x512xf32>,
    %cst_7 = arith.constant 0.000000e+00 : f32
    %7 = vector.broadcast %cst_7 : f32 to vector<2x128xf32>
    %cst_8 = arith.constant 0.000000e+00 : f32
    %8 = vector.broadcast %cst_8 : f32 to vector<2x128xf32>
    %c0_9 = arith.constant 0 : index
    %c0_10 = arith.constant 0 : index
    %9 = vector.load %arg10[%c0_9, %c0_10] : memref<16x512xf32, #tpu.memory_space<vmem>>, vector<2x512xf32>
    %c0_11 = arith.constant 0 : index
    %c0_12 = arith.constant 0 : index
    %10 = vector.load %arg2[%c0_11, %c0_12] : memref<128x512xf32, #tpu.memory_space<vmem>>, vector<128x512xf32>
    %cst_13 = arith.constant dense<0.000000e+00> : vector<2x512xf32>
    %11 = tpu.matmul %7, %10, %cst_13 {dimension_numbers = #tpu.dot_dimension_numbers<[1], [0], [0], [1], [0, 0, 1, 1], [], []>} : vector<2x128xf32>, vector<128x512xf32>, vector<2x512xf32> -> vector<2x512xf32>
    %12 = arith.addf %9, %11 : vector<2x512xf32>
    %13 = vector.extract_strided_slice %12 {offsets = [0, 0], sizes = [2, 128], strides = [1, 1]} : vector<2x512xf32> to vector<2x128xf32>
    %cst_14 = arith.constant 5.000000e-01 : f32
    %14 = vector.broadcast %cst_14 : f32 to vector<2x128xf32>
    %15 = arith.mulf %14, %13 : vector<2x128xf32>
    %16 = math.tanh %15 : vector<2x128xf32>
    %cst_15 = arith.constant 5.000000e-01 : f32
    %17 = vector.broadcast %cst_15 : f32 to vector<2x128xf32>
    %18 = arith.mulf %17, %16 : vector<2x128xf32>
    %cst_16 = arith.constant 5.000000e-01 : f32
    %19 = vector.broadcast %cst_16 : f32 to vector<2x128xf32>
    %20 = arith.addf %18, %19 : vector<2x128xf32>
    %21 = vector.extract_strided_slice %12 {offsets = [0, 128], sizes = [2, 128], strides = [1, 1]} : vector<2x512xf32> to vector<2x128xf32>
    %cst_17 = arith.constant 5.000000e-01 : f32
    %22 = vector.broadcast %cst_17 : f32 to vector<2x128xf32>
    %23 = arith.mulf %22, %21 : vector<2x128xf32>
    %24 = math.tanh %23 : vector<2x128xf32>
    %cst_18 = arith.constant 5.000000e-01 : f32
    %25 = vector.broadcast %cst_18 : f32 to vector<2x128xf32>
    %26 = arith.mulf %25, %24 : vector<2x128xf32>
    %cst_19 = arith.constant 5.000000e-01 : f32
    %27 = vector.broadcast %cst_19 : f32 to vector<2x128xf32>
    %28 = arith.addf %26, %27 : vector<2x128xf32>
    %29 = vector.extract_strided_slice %12 {offsets = [0, 256], sizes = [2, 128], strides = [1, 1]} : vector<2x512xf32> to vector<2x128xf32>
    %30 = math.tanh %29 : vector<2x128xf32>
    %31 = vector.extract_strided_slice %12 {offsets = [0, 384], sizes = [2, 128], strides = [1, 1]} : vector<2x512xf32> to vector<2x128xf32>
    %cst_20 = arith.constant 5.000000e-01 : f32
    %32 = vector.broadcast %cst_20 : f32 to vector<2x128xf32>
    %33 = arith.mulf %32, %31 : vector<2x128xf32>
    %34 = math.tanh %33 : vector<2x128xf32>
    %cst_21 = arith.constant 5.000000e-01 : f32
    %35 = vector.broadcast %cst_21 : f32 to vector<2x128xf32>
    %36 = arith.mulf %35, %34 : vector<2x128xf32>
    %cst_22 = arith.constant 5.000000e-01 : f32
    %37 = vector.broadcast %cst_22 : f32 to vector<2x128xf32>
    %38 = arith.addf %36, %37 : vector<2x128xf32>
    %39 = arith.mulf %28, %8 : vector<2x128xf32>
    %40 = arith.mulf %20, %30 : vector<2x128xf32>
    %41 = arith.addf %39, %40 : vector<2x128xf32>
    %42 = math.tanh %41 : vector<2x128xf32>
    %43 = arith.mulf %38, %42 : vector<2x128xf32>
    %c0_23 = arith.constant 0 : index
    %c0_24 = arith.constant 0 : index
    %44 = vector.load %arg11[%c0_23, %c0_24] : memref<16x128xf32, #tpu.memory_space<vmem>>, vector<2x128xf32>
    tpu.vector_store %arg11[%c0_23, %c0_24], %43 {strides = array<i32>} : memref<16x128xf32, #tpu.memory_space<vmem>>, vector<2x128xf32>,
    %c2 = arith.constant 2 : index
    %c0_25 = arith.constant 0 : index
    %45 = vector.load %arg10[%c2, %c0_25] : memref<16x512xf32, #tpu.memory_space<vmem>>, vector<2x512xf32>
    %c0_26 = arith.constant 0 : index
    %c0_27 = arith.constant 0 : index
    %46 = vector.load %arg2[%c0_26, %c0_27] : memref<128x512xf32, #tpu.memory_space<vmem>>, vector<128x512xf32>
    %cst_28 = arith.constant dense<0.000000e+00> : vector<2x512xf32>
    %47 = tpu.matmul %43, %46, %cst_28 {dimension_numbers = #tpu.dot_dimension_numbers<[1], [0], [0], [1], [0, 0, 1, 1], [], []>} : vector<2x128xf32>, vector<128x512xf32>, vector<2x512xf32> -> vector<2x512xf32>
    %48 = arith.addf %45, %47 : vector<2x512xf32>
    %49 = vector.extract_strided_slice %48 {offsets = [0, 0], sizes = [2, 128], strides = [1, 1]} : vector<2x512xf32> to vector<2x128xf32>
    %cst_29 = arith.constant 5.000000e-01 : f32
    %50 = vector.broadcast %cst_29 : f32 to vector<2x128xf32>
    %51 = arith.mulf %50, %49 : vector<2x128xf32>
    %52 = math.tanh %51 : vector<2x128xf32>
    %cst_30 = arith.constant 5.000000e-01 : f32
    %53 = vector.broadcast %cst_30 : f32 to vector<2x128xf32>
    %54 = arith.mulf %53, %52 : vector<2x128xf32>
    %cst_31 = arith.constant 5.000000e-01 : f32
    %55 = vector.broadcast %cst_31 : f32 to vector<2x128xf32>
    %56 = arith.addf %54, %55 : vector<2x128xf32>
    %57 = vector.extract_strided_slice %48 {offsets = [0, 128], sizes = [2, 128], strides = [1, 1]} : vector<2x512xf32> to vector<2x128xf32>
    %cst_32 = arith.constant 5.000000e-01 : f32
    %58 = vector.broadcast %cst_32 : f32 to vector<2x128xf32>
    %59 = arith.mulf %58, %57 : vector<2x128xf32>
    %60 = math.tanh %59 : vector<2x128xf32>
    %cst_33 = arith.constant 5.000000e-01 : f32
    %61 = vector.broadcast %cst_33 : f32 to vector<2x128xf32>
    %62 = arith.mulf %61, %60 : vector<2x128xf32>
    %cst_34 = arith.constant 5.000000e-01 : f32
    %63 = vector.broadcast %cst_34 : f32 to vector<2x128xf32>
    %64 = arith.addf %62, %63 : vector<2x128xf32>
    %65 = vector.extract_strided_slice %48 {offsets = [0, 256], sizes = [2, 128], strides = [1, 1]} : vector<2x512xf32> to vector<2x128xf32>
    %66 = math.tanh %65 : vector<2x128xf32>
    %67 = vector.extract_strided_slice %48 {offsets = [0, 384], sizes = [2, 128], strides = [1, 1]} : vector<2x512xf32> to vector<2x128xf32>
    %cst_35 = arith.constant 5.000000e-01 : f32
    %68 = vector.broadcast %cst_35 : f32 to vector<2x128xf32>
    %69 = arith.mulf %68, %67 : vector<2x128xf32>
    %70 = math.tanh %69 : vector<2x128xf32>
    %cst_36 = arith.constant 5.000000e-01 : f32
    %71 = vector.broadcast %cst_36 : f32 to vector<2x128xf32>
    %72 = arith.mulf %71, %70 : vector<2x128xf32>
    %cst_37 = arith.constant 5.000000e-01 : f32
    %73 = vector.broadcast %cst_37 : f32 to vector<2x128xf32>
    %74 = arith.addf %72, %73 : vector<2x128xf32>
    %75 = arith.mulf %64, %41 : vector<2x128xf32>
    %76 = arith.mulf %56, %66 : vector<2x128xf32>
    %77 = arith.addf %75, %76 : vector<2x128xf32>
    %78 = math.tanh %77 : vector<2x128xf32>
    %79 = arith.mulf %74, %78 : vector<2x128xf32>
    %c2_38 = arith.constant 2 : index
    %c0_39 = arith.constant 0 : index
    %80 = vector.load %arg11[%c2_38, %c0_39] : memref<16x128xf32, #tpu.memory_space<vmem>>, vector<2x128xf32>
    tpu.vector_store %arg11[%c2_38, %c0_39], %79 {strides = array<i32>} : memref<16x128xf32, #tpu.memory_space<vmem>>, vector<2x128xf32>,
    %c4 = arith.constant 4 : index
    %c0_40 = arith.constant 0 : index
    %81 = vector.load %arg10[%c4, %c0_40] : memref<16x512xf32, #tpu.memory_space<vmem>>, vector<2x512xf32>
    %c0_41 = arith.constant 0 : index
    %c0_42 = arith.constant 0 : index
    %82 = vector.load %arg2[%c0_41, %c0_42] : memref<128x512xf32, #tpu.memory_space<vmem>>, vector<128x512xf32>
    %cst_43 = arith.constant dense<0.000000e+00> : vector<2x512xf32>
    %83 = tpu.matmul %79, %82, %cst_43 {dimension_numbers = #tpu.dot_dimension_numbers<[1], [0], [0], [1], [0, 0, 1, 1], [], []>} : vector<2x128xf32>, vector<128x512xf32>, vector<2x512xf32> -> vector<2x512xf32>
    %84 = arith.addf %81, %83 : vector<2x512xf32>
    %85 = vector.extract_strided_slice %84 {offsets = [0, 0], sizes = [2, 128], strides = [1, 1]} : vector<2x512xf32> to vector<2x128xf32>
    %cst_44 = arith.constant 5.000000e-01 : f32
    %86 = vector.broadcast %cst_44 : f32 to vector<2x128xf32>
    %87 = arith.mulf %86, %85 : vector<2x128xf32>
    %88 = math.tanh %87 : vector<2x128xf32>
    %cst_45 = arith.constant 5.000000e-01 : f32
    %89 = vector.broadcast %cst_45 : f32 to vector<2x128xf32>
    %90 = arith.mulf %89, %88 : vector<2x128xf32>
    %cst_46 = arith.constant 5.000000e-01 : f32
    %91 = vector.broadcast %cst_46 : f32 to vector<2x128xf32>
    %92 = arith.addf %90, %91 : vector<2x128xf32>
    %93 = vector.extract_strided_slice %84 {offsets = [0, 128], sizes = [2, 128], strides = [1, 1]} : vector<2x512xf32> to vector<2x128xf32>
    %cst_47 = arith.constant 5.000000e-01 : f32
    %94 = vector.broadcast %cst_47 : f32 to vector<2x128xf32>
    %95 = arith.mulf %94, %93 : vector<2x128xf32>
    %96 = math.tanh %95 : vector<2x128xf32>
    %cst_48 = arith.constant 5.000000e-01 : f32
    %97 = vector.broadcast %cst_48 : f32 to vector<2x128xf32>
    %98 = arith.mulf %97, %96 : vector<2x128xf32>
    %cst_49 = arith.constant 5.000000e-01 : f32
    %99 = vector.broadcast %cst_49 : f32 to vector<2x128xf32>
    %100 = arith.addf %98, %99 : vector<2x128xf32>
    %101 = vector.extract_strided_slice %84 {offsets = [0, 256], sizes = [2, 128], strides = [1, 1]} : vector<2x512xf32> to vector<2x128xf32>
    %102 = math.tanh %101 : vector<2x128xf32>
    %103 = vector.extract_strided_slice %84 {offsets = [0, 384], sizes = [2, 128], strides = [1, 1]} : vector<2x512xf32> to vector<2x128xf32>
    %cst_50 = arith.constant 5.000000e-01 : f32
    %104 = vector.broadcast %cst_50 : f32 to vector<2x128xf32>
    %105 = arith.mulf %104, %103 : vector<2x128xf32>
    %106 = math.tanh %105 : vector<2x128xf32>
    %cst_51 = arith.constant 5.000000e-01 : f32
    %107 = vector.broadcast %cst_51 : f32 to vector<2x128xf32>
    %108 = arith.mulf %107, %106 : vector<2x128xf32>
    %cst_52 = arith.constant 5.000000e-01 : f32
    %109 = vector.broadcast %cst_52 : f32 to vector<2x128xf32>
    %110 = arith.addf %108, %109 : vector<2x128xf32>
    %111 = arith.mulf %100, %77 : vector<2x128xf32>
    %112 = arith.mulf %92, %102 : vector<2x128xf32>
    %113 = arith.addf %111, %112 : vector<2x128xf32>
    %114 = math.tanh %113 : vector<2x128xf32>
    %115 = arith.mulf %110, %114 : vector<2x128xf32>
    %c4_53 = arith.constant 4 : index
    %c0_54 = arith.constant 0 : index
    %116 = vector.load %arg11[%c4_53, %c0_54] : memref<16x128xf32, #tpu.memory_space<vmem>>, vector<2x128xf32>
    tpu.vector_store %arg11[%c4_53, %c0_54], %115 {strides = array<i32>} : memref<16x128xf32, #tpu.memory_space<vmem>>, vector<2x128xf32>,
    %c6 = arith.constant 6 : index
    %c0_55 = arith.constant 0 : index
    %117 = vector.load %arg10[%c6, %c0_55] : memref<16x512xf32, #tpu.memory_space<vmem>>, vector<2x512xf32>
    %c0_56 = arith.constant 0 : index
    %c0_57 = arith.constant 0 : index
    %118 = vector.load %arg2[%c0_56, %c0_57] : memref<128x512xf32, #tpu.memory_space<vmem>>, vector<128x512xf32>
    %cst_58 = arith.constant dense<0.000000e+00> : vector<2x512xf32>
    %119 = tpu.matmul %115, %118, %cst_58 {dimension_numbers = #tpu.dot_dimension_numbers<[1], [0], [0], [1], [0, 0, 1, 1], [], []>} : vector<2x128xf32>, vector<128x512xf32>, vector<2x512xf32> -> vector<2x512xf32>
    %120 = arith.addf %117, %119 : vector<2x512xf32>
    %121 = vector.extract_strided_slice %120 {offsets = [0, 0], sizes = [2, 128], strides = [1, 1]} : vector<2x512xf32> to vector<2x128xf32>
    %cst_59 = arith.constant 5.000000e-01 : f32
    %122 = vector.broadcast %cst_59 : f32 to vector<2x128xf32>
    %123 = arith.mulf %122, %121 : vector<2x128xf32>
    %124 = math.tanh %123 : vector<2x128xf32>
    %cst_60 = arith.constant 5.000000e-01 : f32
    %125 = vector.broadcast %cst_60 : f32 to vector<2x128xf32>
    %126 = arith.mulf %125, %124 : vector<2x128xf32>
    %cst_61 = arith.constant 5.000000e-01 : f32
    %127 = vector.broadcast %cst_61 : f32 to vector<2x128xf32>
    %128 = arith.addf %126, %127 : vector<2x128xf32>
    %129 = vector.extract_strided_slice %120 {offsets = [0, 128], sizes = [2, 128], strides = [1, 1]} : vector<2x512xf32> to vector<2x128xf32>
    %cst_62 = arith.constant 5.000000e-01 : f32
    %130 = vector.broadcast %cst_62 : f32 to vector<2x128xf32>
    %131 = arith.mulf %130, %129 : vector<2x128xf32>
    %132 = math.tanh %131 : vector<2x128xf32>
    %cst_63 = arith.constant 5.000000e-01 : f32
    %133 = vector.broadcast %cst_63 : f32 to vector<2x128xf32>
    %134 = arith.mulf %133, %132 : vector<2x128xf32>
    %cst_64 = arith.constant 5.000000e-01 : f32
    %135 = vector.broadcast %cst_64 : f32 to vector<2x128xf32>
    %136 = arith.addf %134, %135 : vector<2x128xf32>
    %137 = vector.extract_strided_slice %120 {offsets = [0, 256], sizes = [2, 128], strides = [1, 1]} : vector<2x512xf32> to vector<2x128xf32>
    %138 = math.tanh %137 : vector<2x128xf32>
    %139 = vector.extract_strided_slice %120 {offsets = [0, 384], sizes = [2, 128], strides = [1, 1]} : vector<2x512xf32> to vector<2x128xf32>
    %cst_65 = arith.constant 5.000000e-01 : f32
    %140 = vector.broadcast %cst_65 : f32 to vector<2x128xf32>
    %141 = arith.mulf %140, %139 : vector<2x128xf32>
    %142 = math.tanh %141 : vector<2x128xf32>
    %cst_66 = arith.constant 5.000000e-01 : f32
    %143 = vector.broadcast %cst_66 : f32 to vector<2x128xf32>
    %144 = arith.mulf %143, %142 : vector<2x128xf32>
    %cst_67 = arith.constant 5.000000e-01 : f32
    %145 = vector.broadcast %cst_67 : f32 to vector<2x128xf32>
    %146 = arith.addf %144, %145 : vector<2x128xf32>
    %147 = arith.mulf %136, %113 : vector<2x128xf32>
    %148 = arith.mulf %128, %138 : vector<2x128xf32>
    %149 = arith.addf %147, %148 : vector<2x128xf32>
    %150 = math.tanh %149 : vector<2x128xf32>
    %151 = arith.mulf %146, %150 : vector<2x128xf32>
    %c6_68 = arith.constant 6 : index
    %c0_69 = arith.constant 0 : index
    %152 = vector.load %arg11[%c6_68, %c0_69] : memref<16x128xf32, #tpu.memory_space<vmem>>, vector<2x128xf32>
    tpu.vector_store %arg11[%c6_68, %c0_69], %151 {strides = array<i32>} : memref<16x128xf32, #tpu.memory_space<vmem>>, vector<2x128xf32>,
    %c8 = arith.constant 8 : index
    %c0_70 = arith.constant 0 : index
    %153 = vector.load %arg10[%c8, %c0_70] : memref<16x512xf32, #tpu.memory_space<vmem>>, vector<2x512xf32>
    %c0_71 = arith.constant 0 : index
    %c0_72 = arith.constant 0 : index
    %154 = vector.load %arg2[%c0_71, %c0_72] : memref<128x512xf32, #tpu.memory_space<vmem>>, vector<128x512xf32>
    %cst_73 = arith.constant dense<0.000000e+00> : vector<2x512xf32>
    %155 = tpu.matmul %151, %154, %cst_73 {dimension_numbers = #tpu.dot_dimension_numbers<[1], [0], [0], [1], [0, 0, 1, 1], [], []>} : vector<2x128xf32>, vector<128x512xf32>, vector<2x512xf32> -> vector<2x512xf32>
    %156 = arith.addf %153, %155 : vector<2x512xf32>
    %157 = vector.extract_strided_slice %156 {offsets = [0, 0], sizes = [2, 128], strides = [1, 1]} : vector<2x512xf32> to vector<2x128xf32>
    %cst_74 = arith.constant 5.000000e-01 : f32
    %158 = vector.broadcast %cst_74 : f32 to vector<2x128xf32>
    %159 = arith.mulf %158, %157 : vector<2x128xf32>
    %160 = math.tanh %159 : vector<2x128xf32>
    %cst_75 = arith.constant 5.000000e-01 : f32
    %161 = vector.broadcast %cst_75 : f32 to vector<2x128xf32>
    %162 = arith.mulf %161, %160 : vector<2x128xf32>
    %cst_76 = arith.constant 5.000000e-01 : f32
    %163 = vector.broadcast %cst_76 : f32 to vector<2x128xf32>
    %164 = arith.addf %162, %163 : vector<2x128xf32>
    %165 = vector.extract_strided_slice %156 {offsets = [0, 128], sizes = [2, 128], strides = [1, 1]} : vector<2x512xf32> to vector<2x128xf32>
    %cst_77 = arith.constant 5.000000e-01 : f32
    %166 = vector.broadcast %cst_77 : f32 to vector<2x128xf32>
    %167 = arith.mulf %166, %165 : vector<2x128xf32>
    %168 = math.tanh %167 : vector<2x128xf32>
    %cst_78 = arith.constant 5.000000e-01 : f32
    %169 = vector.broadcast %cst_78 : f32 to vector<2x128xf32>
    %170 = arith.mulf %169, %168 : vector<2x128xf32>
    %cst_79 = arith.constant 5.000000e-01 : f32
    %171 = vector.broadcast %cst_79 : f32 to vector<2x128xf32>
    %172 = arith.addf %170, %171 : vector<2x128xf32>
    %173 = vector.extract_strided_slice %156 {offsets = [0, 256], sizes = [2, 128], strides = [1, 1]} : vector<2x512xf32> to vector<2x128xf32>
    %174 = math.tanh %173 : vector<2x128xf32>
    %175 = vector.extract_strided_slice %156 {offsets = [0, 384], sizes = [2, 128], strides = [1, 1]} : vector<2x512xf32> to vector<2x128xf32>
    %cst_80 = arith.constant 5.000000e-01 : f32
    %176 = vector.broadcast %cst_80 : f32 to vector<2x128xf32>
    %177 = arith.mulf %176, %175 : vector<2x128xf32>
    %178 = math.tanh %177 : vector<2x128xf32>
    %cst_81 = arith.constant 5.000000e-01 : f32
    %179 = vector.broadcast %cst_81 : f32 to vector<2x128xf32>
    %180 = arith.mulf %179, %178 : vector<2x128xf32>
    %cst_82 = arith.constant 5.000000e-01 : f32
    %181 = vector.broadcast %cst_82 : f32 to vector<2x128xf32>
    %182 = arith.addf %180, %181 : vector<2x128xf32>
    %183 = arith.mulf %172, %149 : vector<2x128xf32>
    %184 = arith.mulf %164, %174 : vector<2x128xf32>
    %185 = arith.addf %183, %184 : vector<2x128xf32>
    %186 = math.tanh %185 : vector<2x128xf32>
    %187 = arith.mulf %182, %186 : vector<2x128xf32>
    %c8_83 = arith.constant 8 : index
    %c0_84 = arith.constant 0 : index
    %188 = vector.load %arg11[%c8_83, %c0_84] : memref<16x128xf32, #tpu.memory_space<vmem>>, vector<2x128xf32>
    tpu.vector_store %arg11[%c8_83, %c0_84], %187 {strides = array<i32>} : memref<16x128xf32, #tpu.memory_space<vmem>>, vector<2x128xf32>,
    %c10 = arith.constant 10 : index
    %c0_85 = arith.constant 0 : index
    %189 = vector.load %arg10[%c10, %c0_85] : memref<16x512xf32, #tpu.memory_space<vmem>>, vector<2x512xf32>
    %c0_86 = arith.constant 0 : index
    %c0_87 = arith.constant 0 : index
    %190 = vector.load %arg2[%c0_86, %c0_87] : memref<128x512xf32, #tpu.memory_space<vmem>>, vector<128x512xf32>
    %cst_88 = arith.constant dense<0.000000e+00> : vector<2x512xf32>
    %191 = tpu.matmul %187, %190, %cst_88 {dimension_numbers = #tpu.dot_dimension_numbers<[1], [0], [0], [1], [0, 0, 1, 1], [], []>} : vector<2x128xf32>, vector<128x512xf32>, vector<2x512xf32> -> vector<2x512xf32>
    %192 = arith.addf %189, %191 : vector<2x512xf32>
    %193 = vector.extract_strided_slice %192 {offsets = [0, 0], sizes = [2, 128], strides = [1, 1]} : vector<2x512xf32> to vector<2x128xf32>
    %cst_89 = arith.constant 5.000000e-01 : f32
    %194 = vector.broadcast %cst_89 : f32 to vector<2x128xf32>
    %195 = arith.mulf %194, %193 : vector<2x128xf32>
    %196 = math.tanh %195 : vector<2x128xf32>
    %cst_90 = arith.constant 5.000000e-01 : f32
    %197 = vector.broadcast %cst_90 : f32 to vector<2x128xf32>
    %198 = arith.mulf %197, %196 : vector<2x128xf32>
    %cst_91 = arith.constant 5.000000e-01 : f32
    %199 = vector.broadcast %cst_91 : f32 to vector<2x128xf32>
    %200 = arith.addf %198, %199 : vector<2x128xf32>
    %201 = vector.extract_strided_slice %192 {offsets = [0, 128], sizes = [2, 128], strides = [1, 1]} : vector<2x512xf32> to vector<2x128xf32>
    %cst_92 = arith.constant 5.000000e-01 : f32
    %202 = vector.broadcast %cst_92 : f32 to vector<2x128xf32>
    %203 = arith.mulf %202, %201 : vector<2x128xf32>
    %204 = math.tanh %203 : vector<2x128xf32>
    %cst_93 = arith.constant 5.000000e-01 : f32
    %205 = vector.broadcast %cst_93 : f32 to vector<2x128xf32>
    %206 = arith.mulf %205, %204 : vector<2x128xf32>
    %cst_94 = arith.constant 5.000000e-01 : f32
    %207 = vector.broadcast %cst_94 : f32 to vector<2x128xf32>
    %208 = arith.addf %206, %207 : vector<2x128xf32>
    %209 = vector.extract_strided_slice %192 {offsets = [0, 256], sizes = [2, 128], strides = [1, 1]} : vector<2x512xf32> to vector<2x128xf32>
    %210 = math.tanh %209 : vector<2x128xf32>
    %211 = vector.extract_strided_slice %192 {offsets = [0, 384], sizes = [2, 128], strides = [1, 1]} : vector<2x512xf32> to vector<2x128xf32>
    %cst_95 = arith.constant 5.000000e-01 : f32
    %212 = vector.broadcast %cst_95 : f32 to vector<2x128xf32>
    %213 = arith.mulf %212, %211 : vector<2x128xf32>
    %214 = math.tanh %213 : vector<2x128xf32>
    %cst_96 = arith.constant 5.000000e-01 : f32
    %215 = vector.broadcast %cst_96 : f32 to vector<2x128xf32>
    %216 = arith.mulf %215, %214 : vector<2x128xf32>
    %cst_97 = arith.constant 5.000000e-01 : f32
    %217 = vector.broadcast %cst_97 : f32 to vector<2x128xf32>
    %218 = arith.addf %216, %217 : vector<2x128xf32>
    %219 = arith.mulf %208, %185 : vector<2x128xf32>
    %220 = arith.mulf %200, %210 : vector<2x128xf32>
    %221 = arith.addf %219, %220 : vector<2x128xf32>
    %222 = math.tanh %221 : vector<2x128xf32>
    %223 = arith.mulf %218, %222 : vector<2x128xf32>
    %c10_98 = arith.constant 10 : index
    %c0_99 = arith.constant 0 : index
    %224 = vector.load %arg11[%c10_98, %c0_99] : memref<16x128xf32, #tpu.memory_space<vmem>>, vector<2x128xf32>
    tpu.vector_store %arg11[%c10_98, %c0_99], %223 {strides = array<i32>} : memref<16x128xf32, #tpu.memory_space<vmem>>, vector<2x128xf32>,
    %c12 = arith.constant 12 : index
    %c0_100 = arith.constant 0 : index
    %225 = vector.load %arg10[%c12, %c0_100] : memref<16x512xf32, #tpu.memory_space<vmem>>, vector<2x512xf32>
    %c0_101 = arith.constant 0 : index
    %c0_102 = arith.constant 0 : index
    %226 = vector.load %arg2[%c0_101, %c0_102] : memref<128x512xf32, #tpu.memory_space<vmem>>, vector<128x512xf32>
    %cst_103 = arith.constant dense<0.000000e+00> : vector<2x512xf32>
    %227 = tpu.matmul %223, %226, %cst_103 {dimension_numbers = #tpu.dot_dimension_numbers<[1], [0], [0], [1], [0, 0, 1, 1], [], []>} : vector<2x128xf32>, vector<128x512xf32>, vector<2x512xf32> -> vector<2x512xf32>
    %228 = arith.addf %225, %227 : vector<2x512xf32>
    %229 = vector.extract_strided_slice %228 {offsets = [0, 0], sizes = [2, 128], strides = [1, 1]} : vector<2x512xf32> to vector<2x128xf32>
    %cst_104 = arith.constant 5.000000e-01 : f32
    %230 = vector.broadcast %cst_104 : f32 to vector<2x128xf32>
    %231 = arith.mulf %230, %229 : vector<2x128xf32>
    %232 = math.tanh %231 : vector<2x128xf32>
    %cst_105 = arith.constant 5.000000e-01 : f32
    %233 = vector.broadcast %cst_105 : f32 to vector<2x128xf32>
    %234 = arith.mulf %233, %232 : vector<2x128xf32>
    %cst_106 = arith.constant 5.000000e-01 : f32
    %235 = vector.broadcast %cst_106 : f32 to vector<2x128xf32>
    %236 = arith.addf %234, %235 : vector<2x128xf32>
    %237 = vector.extract_strided_slice %228 {offsets = [0, 128], sizes = [2, 128], strides = [1, 1]} : vector<2x512xf32> to vector<2x128xf32>
    %cst_107 = arith.constant 5.000000e-01 : f32
    %238 = vector.broadcast %cst_107 : f32 to vector<2x128xf32>
    %239 = arith.mulf %238, %237 : vector<2x128xf32>
    %240 = math.tanh %239 : vector<2x128xf32>
    %cst_108 = arith.constant 5.000000e-01 : f32
    %241 = vector.broadcast %cst_108 : f32 to vector<2x128xf32>
    %242 = arith.mulf %241, %240 : vector<2x128xf32>
    %cst_109 = arith.constant 5.000000e-01 : f32
    %243 = vector.broadcast %cst_109 : f32 to vector<2x128xf32>
    %244 = arith.addf %242, %243 : vector<2x128xf32>
    %245 = vector.extract_strided_slice %228 {offsets = [0, 256], sizes = [2, 128], strides = [1, 1]} : vector<2x512xf32> to vector<2x128xf32>
    %246 = math.tanh %245 : vector<2x128xf32>
    %247 = vector.extract_strided_slice %228 {offsets = [0, 384], sizes = [2, 128], strides = [1, 1]} : vector<2x512xf32> to vector<2x128xf32>
    %cst_110 = arith.constant 5.000000e-01 : f32
    %248 = vector.broadcast %cst_110 : f32 to vector<2x128xf32>
    %249 = arith.mulf %248, %247 : vector<2x128xf32>
    %250 = math.tanh %249 : vector<2x128xf32>
    %cst_111 = arith.constant 5.000000e-01 : f32
    %251 = vector.broadcast %cst_111 : f32 to vector<2x128xf32>
    %252 = arith.mulf %251, %250 : vector<2x128xf32>
    %cst_112 = arith.constant 5.000000e-01 : f32
    %253 = vector.broadcast %cst_112 : f32 to vector<2x128xf32>
    %254 = arith.addf %252, %253 : vector<2x128xf32>
    %255 = arith.mulf %244, %221 : vector<2x128xf32>
    %256 = arith.mulf %236, %246 : vector<2x128xf32>
    %257 = arith.addf %255, %256 : vector<2x128xf32>
    %258 = math.tanh %257 : vector<2x128xf32>
    %259 = arith.mulf %254, %258 : vector<2x128xf32>
    %c12_113 = arith.constant 12 : index
    %c0_114 = arith.constant 0 : index
    %260 = vector.load %arg11[%c12_113, %c0_114] : memref<16x128xf32, #tpu.memory_space<vmem>>, vector<2x128xf32>
    tpu.vector_store %arg11[%c12_113, %c0_114], %259 {strides = array<i32>} : memref<16x128xf32, #tpu.memory_space<vmem>>, vector<2x128xf32>,
    %c14 = arith.constant 14 : index
    %c0_115 = arith.constant 0 : index
    %261 = vector.load %arg10[%c14, %c0_115] : memref<16x512xf32, #tpu.memory_space<vmem>>, vector<2x512xf32>
    %c0_116 = arith.constant 0 : index
    %c0_117 = arith.constant 0 : index
    %262 = vector.load %arg2[%c0_116, %c0_117] : memref<128x512xf32, #tpu.memory_space<vmem>>, vector<128x512xf32>
    %cst_118 = arith.constant dense<0.000000e+00> : vector<2x512xf32>
    %263 = tpu.matmul %259, %262, %cst_118 {dimension_numbers = #tpu.dot_dimension_numbers<[1], [0], [0], [1], [0, 0, 1, 1], [], []>} : vector<2x128xf32>, vector<128x512xf32>, vector<2x512xf32> -> vector<2x512xf32>
    %264 = arith.addf %261, %263 : vector<2x512xf32>
    %265 = vector.extract_strided_slice %264 {offsets = [0, 0], sizes = [2, 128], strides = [1, 1]} : vector<2x512xf32> to vector<2x128xf32>
    %cst_119 = arith.constant 5.000000e-01 : f32
    %266 = vector.broadcast %cst_119 : f32 to vector<2x128xf32>
    %267 = arith.mulf %266, %265 : vector<2x128xf32>
    %268 = math.tanh %267 : vector<2x128xf32>
    %cst_120 = arith.constant 5.000000e-01 : f32
    %269 = vector.broadcast %cst_120 : f32 to vector<2x128xf32>
    %270 = arith.mulf %269, %268 : vector<2x128xf32>
    %cst_121 = arith.constant 5.000000e-01 : f32
    %271 = vector.broadcast %cst_121 : f32 to vector<2x128xf32>
    %272 = arith.addf %270, %271 : vector<2x128xf32>
    %273 = vector.extract_strided_slice %264 {offsets = [0, 128], sizes = [2, 128], strides = [1, 1]} : vector<2x512xf32> to vector<2x128xf32>
    %cst_122 = arith.constant 5.000000e-01 : f32
    %274 = vector.broadcast %cst_122 : f32 to vector<2x128xf32>
    %275 = arith.mulf %274, %273 : vector<2x128xf32>
    %276 = math.tanh %275 : vector<2x128xf32>
    %cst_123 = arith.constant 5.000000e-01 : f32
    %277 = vector.broadcast %cst_123 : f32 to vector<2x128xf32>
    %278 = arith.mulf %277, %276 : vector<2x128xf32>
    %cst_124 = arith.constant 5.000000e-01 : f32
    %279 = vector.broadcast %cst_124 : f32 to vector<2x128xf32>
    %280 = arith.addf %278, %279 : vector<2x128xf32>
    %281 = vector.extract_strided_slice %264 {offsets = [0, 256], sizes = [2, 128], strides = [1, 1]} : vector<2x512xf32> to vector<2x128xf32>
    %282 = math.tanh %281 : vector<2x128xf32>
    %283 = vector.extract_strided_slice %264 {offsets = [0, 384], sizes = [2, 128], strides = [1, 1]} : vector<2x512xf32> to vector<2x128xf32>
    %cst_125 = arith.constant 5.000000e-01 : f32
    %284 = vector.broadcast %cst_125 : f32 to vector<2x128xf32>
    %285 = arith.mulf %284, %283 : vector<2x128xf32>
    %286 = math.tanh %285 : vector<2x128xf32>
    %cst_126 = arith.constant 5.000000e-01 : f32
    %287 = vector.broadcast %cst_126 : f32 to vector<2x128xf32>
    %288 = arith.mulf %287, %286 : vector<2x128xf32>
    %cst_127 = arith.constant 5.000000e-01 : f32
    %289 = vector.broadcast %cst_127 : f32 to vector<2x128xf32>
    %290 = arith.addf %288, %289 : vector<2x128xf32>
    %291 = arith.mulf %280, %257 : vector<2x128xf32>
    %292 = arith.mulf %272, %282 : vector<2x128xf32>
    %293 = arith.addf %291, %292 : vector<2x128xf32>
    %294 = math.tanh %293 : vector<2x128xf32>
    %295 = arith.mulf %290, %294 : vector<2x128xf32>
    %c14_128 = arith.constant 14 : index
    %c0_129 = arith.constant 0 : index
    %296 = vector.load %arg11[%c14_128, %c0_129] : memref<16x128xf32, #tpu.memory_space<vmem>>, vector<2x128xf32>
    tpu.vector_store %arg11[%c14_128, %c0_129], %295 {strides = array<i32>} : memref<16x128xf32, #tpu.memory_space<vmem>>, vector<2x128xf32>,
    %c0_130 = arith.constant 0 : index
    %c0_131 = arith.constant 0 : index
    %297 = vector.load %arg11[%c0_130, %c0_131] : memref<16x128xf32, #tpu.memory_space<vmem>>, vector<16x128xf32>
    %c0_132 = arith.constant 0 : index
    %c0_133 = arith.constant 0 : index
    %298 = vector.load %arg4[%c0_132, %c0_133] : memref<128x512xf32, #tpu.memory_space<vmem>>, vector<128x512xf32>
    %cst_134 = arith.constant dense<0.000000e+00> : vector<16x512xf32>
    %299 = tpu.matmul %297, %298, %cst_134 {dimension_numbers = #tpu.dot_dimension_numbers<[1], [0], [0], [1], [0, 0, 1, 1], [], []>} : vector<16x128xf32>, vector<128x512xf32>, vector<16x512xf32> -> vector<16x512xf32>
    %c0_135 = arith.constant 0 : index
    %c0_136 = arith.constant 0 : index
    %300 = vector.load %arg6[%c0_135, %c0_136] : memref<1x512xf32, #tpu.memory_space<vmem>>, vector<1x512xf32>
    %301 = vector.broadcast %300 : vector<1x512xf32> to vector<16x512xf32>
    %302 = arith.addf %299, %301 : vector<16x512xf32>
    %c0_137 = arith.constant 0 : index
    %c0_138 = arith.constant 0 : index
    %303 = vector.load %arg10[%c0_137, %c0_138] : memref<16x512xf32, #tpu.memory_space<vmem>>, vector<16x512xf32>
    tpu.vector_store %arg10[%c0_137, %c0_138], %302 {strides = array<i32>} : memref<16x512xf32, #tpu.memory_space<vmem>>, vector<16x512xf32>,
    %cst_139 = arith.constant 0.000000e+00 : f32
    %304 = vector.broadcast %cst_139 : f32 to vector<2x128xf32>
    %cst_140 = arith.constant 0.000000e+00 : f32
    %305 = vector.broadcast %cst_140 : f32 to vector<2x128xf32>
    %c0_141 = arith.constant 0 : index
    %c0_142 = arith.constant 0 : index
    %306 = vector.load %arg10[%c0_141, %c0_142] : memref<16x512xf32, #tpu.memory_space<vmem>>, vector<2x512xf32>
    %c0_143 = arith.constant 0 : index
    %c0_144 = arith.constant 0 : index
    %307 = vector.load %arg5[%c0_143, %c0_144] : memref<128x512xf32, #tpu.memory_space<vmem>>, vector<128x512xf32>
    %cst_145 = arith.constant dense<0.000000e+00> : vector<2x512xf32>
    %308 = tpu.matmul %304, %307, %cst_145 {dimension_numbers = #tpu.dot_dimension_numbers<[1], [0], [0], [1], [0, 0, 1, 1], [], []>} : vector<2x128xf32>, vector<128x512xf32>, vector<2x512xf32> -> vector<2x512xf32>
    %309 = arith.addf %306, %308 : vector<2x512xf32>
    %310 = vector.extract_strided_slice %309 {offsets = [0, 0], sizes = [2, 128], strides = [1, 1]} : vector<2x512xf32> to vector<2x128xf32>
    %cst_146 = arith.constant 5.000000e-01 : f32
    %311 = vector.broadcast %cst_146 : f32 to vector<2x128xf32>
    %312 = arith.mulf %311, %310 : vector<2x128xf32>
    %313 = math.tanh %312 : vector<2x128xf32>
    %cst_147 = arith.constant 5.000000e-01 : f32
    %314 = vector.broadcast %cst_147 : f32 to vector<2x128xf32>
    %315 = arith.mulf %314, %313 : vector<2x128xf32>
    %cst_148 = arith.constant 5.000000e-01 : f32
    %316 = vector.broadcast %cst_148 : f32 to vector<2x128xf32>
    %317 = arith.addf %315, %316 : vector<2x128xf32>
    %318 = vector.extract_strided_slice %309 {offsets = [0, 128], sizes = [2, 128], strides = [1, 1]} : vector<2x512xf32> to vector<2x128xf32>
    %cst_149 = arith.constant 5.000000e-01 : f32
    %319 = vector.broadcast %cst_149 : f32 to vector<2x128xf32>
    %320 = arith.mulf %319, %318 : vector<2x128xf32>
    %321 = math.tanh %320 : vector<2x128xf32>
    %cst_150 = arith.constant 5.000000e-01 : f32
    %322 = vector.broadcast %cst_150 : f32 to vector<2x128xf32>
    %323 = arith.mulf %322, %321 : vector<2x128xf32>
    %cst_151 = arith.constant 5.000000e-01 : f32
    %324 = vector.broadcast %cst_151 : f32 to vector<2x128xf32>
    %325 = arith.addf %323, %324 : vector<2x128xf32>
    %326 = vector.extract_strided_slice %309 {offsets = [0, 256], sizes = [2, 128], strides = [1, 1]} : vector<2x512xf32> to vector<2x128xf32>
    %327 = math.tanh %326 : vector<2x128xf32>
    %328 = vector.extract_strided_slice %309 {offsets = [0, 384], sizes = [2, 128], strides = [1, 1]} : vector<2x512xf32> to vector<2x128xf32>
    %cst_152 = arith.constant 5.000000e-01 : f32
    %329 = vector.broadcast %cst_152 : f32 to vector<2x128xf32>
    %330 = arith.mulf %329, %328 : vector<2x128xf32>
    %331 = math.tanh %330 : vector<2x128xf32>
    %cst_153 = arith.constant 5.000000e-01 : f32
    %332 = vector.broadcast %cst_153 : f32 to vector<2x128xf32>
    %333 = arith.mulf %332, %331 : vector<2x128xf32>
    %cst_154 = arith.constant 5.000000e-01 : f32
    %334 = vector.broadcast %cst_154 : f32 to vector<2x128xf32>
    %335 = arith.addf %333, %334 : vector<2x128xf32>
    %336 = arith.mulf %325, %305 : vector<2x128xf32>
    %337 = arith.mulf %317, %327 : vector<2x128xf32>
    %338 = arith.addf %336, %337 : vector<2x128xf32>
    %339 = math.tanh %338 : vector<2x128xf32>
    %340 = arith.mulf %335, %339 : vector<2x128xf32>
    %c0_155 = arith.constant 0 : index
    %c0_156 = arith.constant 0 : index
    %341 = vector.load %arg11[%c0_155, %c0_156] : memref<16x128xf32, #tpu.memory_space<vmem>>, vector<2x128xf32>
    tpu.vector_store %arg11[%c0_155, %c0_156], %340 {strides = array<i32>} : memref<16x128xf32, #tpu.memory_space<vmem>>, vector<2x128xf32>,
    %c2_157 = arith.constant 2 : index
    %c0_158 = arith.constant 0 : index
    %342 = vector.load %arg10[%c2_157, %c0_158] : memref<16x512xf32, #tpu.memory_space<vmem>>, vector<2x512xf32>
    %c0_159 = arith.constant 0 : index
    %c0_160 = arith.constant 0 : index
    %343 = vector.load %arg5[%c0_159, %c0_160] : memref<128x512xf32, #tpu.memory_space<vmem>>, vector<128x512xf32>
    %cst_161 = arith.constant dense<0.000000e+00> : vector<2x512xf32>
    %344 = tpu.matmul %340, %343, %cst_161 {dimension_numbers = #tpu.dot_dimension_numbers<[1], [0], [0], [1], [0, 0, 1, 1], [], []>} : vector<2x128xf32>, vector<128x512xf32>, vector<2x512xf32> -> vector<2x512xf32>
    %345 = arith.addf %342, %344 : vector<2x512xf32>
    %346 = vector.extract_strided_slice %345 {offsets = [0, 0], sizes = [2, 128], strides = [1, 1]} : vector<2x512xf32> to vector<2x128xf32>
    %cst_162 = arith.constant 5.000000e-01 : f32
    %347 = vector.broadcast %cst_162 : f32 to vector<2x128xf32>
    %348 = arith.mulf %347, %346 : vector<2x128xf32>
    %349 = math.tanh %348 : vector<2x128xf32>
    %cst_163 = arith.constant 5.000000e-01 : f32
    %350 = vector.broadcast %cst_163 : f32 to vector<2x128xf32>
    %351 = arith.mulf %350, %349 : vector<2x128xf32>
    %cst_164 = arith.constant 5.000000e-01 : f32
    %352 = vector.broadcast %cst_164 : f32 to vector<2x128xf32>
    %353 = arith.addf %351, %352 : vector<2x128xf32>
    %354 = vector.extract_strided_slice %345 {offsets = [0, 128], sizes = [2, 128], strides = [1, 1]} : vector<2x512xf32> to vector<2x128xf32>
    %cst_165 = arith.constant 5.000000e-01 : f32
    %355 = vector.broadcast %cst_165 : f32 to vector<2x128xf32>
    %356 = arith.mulf %355, %354 : vector<2x128xf32>
    %357 = math.tanh %356 : vector<2x128xf32>
    %cst_166 = arith.constant 5.000000e-01 : f32
    %358 = vector.broadcast %cst_166 : f32 to vector<2x128xf32>
    %359 = arith.mulf %358, %357 : vector<2x128xf32>
    %cst_167 = arith.constant 5.000000e-01 : f32
    %360 = vector.broadcast %cst_167 : f32 to vector<2x128xf32>
    %361 = arith.addf %359, %360 : vector<2x128xf32>
    %362 = vector.extract_strided_slice %345 {offsets = [0, 256], sizes = [2, 128], strides = [1, 1]} : vector<2x512xf32> to vector<2x128xf32>
    %363 = math.tanh %362 : vector<2x128xf32>
    %364 = vector.extract_strided_slice %345 {offsets = [0, 384], sizes = [2, 128], strides = [1, 1]} : vector<2x512xf32> to vector<2x128xf32>
    %cst_168 = arith.constant 5.000000e-01 : f32
    %365 = vector.broadcast %cst_168 : f32 to vector<2x128xf32>
    %366 = arith.mulf %365, %364 : vector<2x128xf32>
    %367 = math.tanh %366 : vector<2x128xf32>
    %cst_169 = arith.constant 5.000000e-01 : f32
    %368 = vector.broadcast %cst_169 : f32 to vector<2x128xf32>
    %369 = arith.mulf %368, %367 : vector<2x128xf32>
    %cst_170 = arith.constant 5.000000e-01 : f32
    %370 = vector.broadcast %cst_170 : f32 to vector<2x128xf32>
    %371 = arith.addf %369, %370 : vector<2x128xf32>
    %372 = arith.mulf %361, %338 : vector<2x128xf32>
    %373 = arith.mulf %353, %363 : vector<2x128xf32>
    %374 = arith.addf %372, %373 : vector<2x128xf32>
    %375 = math.tanh %374 : vector<2x128xf32>
    %376 = arith.mulf %371, %375 : vector<2x128xf32>
    %c2_171 = arith.constant 2 : index
    %c0_172 = arith.constant 0 : index
    %377 = vector.load %arg11[%c2_171, %c0_172] : memref<16x128xf32, #tpu.memory_space<vmem>>, vector<2x128xf32>
    tpu.vector_store %arg11[%c2_171, %c0_172], %376 {strides = array<i32>} : memref<16x128xf32, #tpu.memory_space<vmem>>, vector<2x128xf32>,
    %c4_173 = arith.constant 4 : index
    %c0_174 = arith.constant 0 : index
    %378 = vector.load %arg10[%c4_173, %c0_174] : memref<16x512xf32, #tpu.memory_space<vmem>>, vector<2x512xf32>
    %c0_175 = arith.constant 0 : index
    %c0_176 = arith.constant 0 : index
    %379 = vector.load %arg5[%c0_175, %c0_176] : memref<128x512xf32, #tpu.memory_space<vmem>>, vector<128x512xf32>
    %cst_177 = arith.constant dense<0.000000e+00> : vector<2x512xf32>
    %380 = tpu.matmul %376, %379, %cst_177 {dimension_numbers = #tpu.dot_dimension_numbers<[1], [0], [0], [1], [0, 0, 1, 1], [], []>} : vector<2x128xf32>, vector<128x512xf32>, vector<2x512xf32> -> vector<2x512xf32>
    %381 = arith.addf %378, %380 : vector<2x512xf32>
    %382 = vector.extract_strided_slice %381 {offsets = [0, 0], sizes = [2, 128], strides = [1, 1]} : vector<2x512xf32> to vector<2x128xf32>
    %cst_178 = arith.constant 5.000000e-01 : f32
    %383 = vector.broadcast %cst_178 : f32 to vector<2x128xf32>
    %384 = arith.mulf %383, %382 : vector<2x128xf32>
    %385 = math.tanh %384 : vector<2x128xf32>
    %cst_179 = arith.constant 5.000000e-01 : f32
    %386 = vector.broadcast %cst_179 : f32 to vector<2x128xf32>
    %387 = arith.mulf %386, %385 : vector<2x128xf32>
    %cst_180 = arith.constant 5.000000e-01 : f32
    %388 = vector.broadcast %cst_180 : f32 to vector<2x128xf32>
    %389 = arith.addf %387, %388 : vector<2x128xf32>
    %390 = vector.extract_strided_slice %381 {offsets = [0, 128], sizes = [2, 128], strides = [1, 1]} : vector<2x512xf32> to vector<2x128xf32>
    %cst_181 = arith.constant 5.000000e-01 : f32
    %391 = vector.broadcast %cst_181 : f32 to vector<2x128xf32>
    %392 = arith.mulf %391, %390 : vector<2x128xf32>
    %393 = math.tanh %392 : vector<2x128xf32>
    %cst_182 = arith.constant 5.000000e-01 : f32
    %394 = vector.broadcast %cst_182 : f32 to vector<2x128xf32>
    %395 = arith.mulf %394, %393 : vector<2x128xf32>
    %cst_183 = arith.constant 5.000000e-01 : f32
    %396 = vector.broadcast %cst_183 : f32 to vector<2x128xf32>
    %397 = arith.addf %395, %396 : vector<2x128xf32>
    %398 = vector.extract_strided_slice %381 {offsets = [0, 256], sizes = [2, 128], strides = [1, 1]} : vector<2x512xf32> to vector<2x128xf32>
    %399 = math.tanh %398 : vector<2x128xf32>
    %400 = vector.extract_strided_slice %381 {offsets = [0, 384], sizes = [2, 128], strides = [1, 1]} : vector<2x512xf32> to vector<2x128xf32>
    %cst_184 = arith.constant 5.000000e-01 : f32
    %401 = vector.broadcast %cst_184 : f32 to vector<2x128xf32>
    %402 = arith.mulf %401, %400 : vector<2x128xf32>
    %403 = math.tanh %402 : vector<2x128xf32>
    %cst_185 = arith.constant 5.000000e-01 : f32
    %404 = vector.broadcast %cst_185 : f32 to vector<2x128xf32>
    %405 = arith.mulf %404, %403 : vector<2x128xf32>
    %cst_186 = arith.constant 5.000000e-01 : f32
    %406 = vector.broadcast %cst_186 : f32 to vector<2x128xf32>
    %407 = arith.addf %405, %406 : vector<2x128xf32>
    %408 = arith.mulf %397, %374 : vector<2x128xf32>
    %409 = arith.mulf %389, %399 : vector<2x128xf32>
    %410 = arith.addf %408, %409 : vector<2x128xf32>
    %411 = math.tanh %410 : vector<2x128xf32>
    %412 = arith.mulf %407, %411 : vector<2x128xf32>
    %c4_187 = arith.constant 4 : index
    %c0_188 = arith.constant 0 : index
    %413 = vector.load %arg11[%c4_187, %c0_188] : memref<16x128xf32, #tpu.memory_space<vmem>>, vector<2x128xf32>
    tpu.vector_store %arg11[%c4_187, %c0_188], %412 {strides = array<i32>} : memref<16x128xf32, #tpu.memory_space<vmem>>, vector<2x128xf32>,
    %c6_189 = arith.constant 6 : index
    %c0_190 = arith.constant 0 : index
    %414 = vector.load %arg10[%c6_189, %c0_190] : memref<16x512xf32, #tpu.memory_space<vmem>>, vector<2x512xf32>
    %c0_191 = arith.constant 0 : index
    %c0_192 = arith.constant 0 : index
    %415 = vector.load %arg5[%c0_191, %c0_192] : memref<128x512xf32, #tpu.memory_space<vmem>>, vector<128x512xf32>
    %cst_193 = arith.constant dense<0.000000e+00> : vector<2x512xf32>
    %416 = tpu.matmul %412, %415, %cst_193 {dimension_numbers = #tpu.dot_dimension_numbers<[1], [0], [0], [1], [0, 0, 1, 1], [], []>} : vector<2x128xf32>, vector<128x512xf32>, vector<2x512xf32> -> vector<2x512xf32>
    %417 = arith.addf %414, %416 : vector<2x512xf32>
    %418 = vector.extract_strided_slice %417 {offsets = [0, 0], sizes = [2, 128], strides = [1, 1]} : vector<2x512xf32> to vector<2x128xf32>
    %cst_194 = arith.constant 5.000000e-01 : f32
    %419 = vector.broadcast %cst_194 : f32 to vector<2x128xf32>
    %420 = arith.mulf %419, %418 : vector<2x128xf32>
    %421 = math.tanh %420 : vector<2x128xf32>
    %cst_195 = arith.constant 5.000000e-01 : f32
    %422 = vector.broadcast %cst_195 : f32 to vector<2x128xf32>
    %423 = arith.mulf %422, %421 : vector<2x128xf32>
    %cst_196 = arith.constant 5.000000e-01 : f32
    %424 = vector.broadcast %cst_196 : f32 to vector<2x128xf32>
    %425 = arith.addf %423, %424 : vector<2x128xf32>
    %426 = vector.extract_strided_slice %417 {offsets = [0, 128], sizes = [2, 128], strides = [1, 1]} : vector<2x512xf32> to vector<2x128xf32>
    %cst_197 = arith.constant 5.000000e-01 : f32
    %427 = vector.broadcast %cst_197 : f32 to vector<2x128xf32>
    %428 = arith.mulf %427, %426 : vector<2x128xf32>
    %429 = math.tanh %428 : vector<2x128xf32>
    %cst_198 = arith.constant 5.000000e-01 : f32
    %430 = vector.broadcast %cst_198 : f32 to vector<2x128xf32>
    %431 = arith.mulf %430, %429 : vector<2x128xf32>
    %cst_199 = arith.constant 5.000000e-01 : f32
    %432 = vector.broadcast %cst_199 : f32 to vector<2x128xf32>
    %433 = arith.addf %431, %432 : vector<2x128xf32>
    %434 = vector.extract_strided_slice %417 {offsets = [0, 256], sizes = [2, 128], strides = [1, 1]} : vector<2x512xf32> to vector<2x128xf32>
    %435 = math.tanh %434 : vector<2x128xf32>
    %436 = vector.extract_strided_slice %417 {offsets = [0, 384], sizes = [2, 128], strides = [1, 1]} : vector<2x512xf32> to vector<2x128xf32>
    %cst_200 = arith.constant 5.000000e-01 : f32
    %437 = vector.broadcast %cst_200 : f32 to vector<2x128xf32>
    %438 = arith.mulf %437, %436 : vector<2x128xf32>
    %439 = math.tanh %438 : vector<2x128xf32>
    %cst_201 = arith.constant 5.000000e-01 : f32
    %440 = vector.broadcast %cst_201 : f32 to vector<2x128xf32>
    %441 = arith.mulf %440, %439 : vector<2x128xf32>
    %cst_202 = arith.constant 5.000000e-01 : f32
    %442 = vector.broadcast %cst_202 : f32 to vector<2x128xf32>
    %443 = arith.addf %441, %442 : vector<2x128xf32>
    %444 = arith.mulf %433, %410 : vector<2x128xf32>
    %445 = arith.mulf %425, %435 : vector<2x128xf32>
    %446 = arith.addf %444, %445 : vector<2x128xf32>
    %447 = math.tanh %446 : vector<2x128xf32>
    %448 = arith.mulf %443, %447 : vector<2x128xf32>
    %c6_203 = arith.constant 6 : index
    %c0_204 = arith.constant 0 : index
    %449 = vector.load %arg11[%c6_203, %c0_204] : memref<16x128xf32, #tpu.memory_space<vmem>>, vector<2x128xf32>
    tpu.vector_store %arg11[%c6_203, %c0_204], %448 {strides = array<i32>} : memref<16x128xf32, #tpu.memory_space<vmem>>, vector<2x128xf32>,
    %c8_205 = arith.constant 8 : index
    %c0_206 = arith.constant 0 : index
    %450 = vector.load %arg10[%c8_205, %c0_206] : memref<16x512xf32, #tpu.memory_space<vmem>>, vector<2x512xf32>
    %c0_207 = arith.constant 0 : index
    %c0_208 = arith.constant 0 : index
    %451 = vector.load %arg5[%c0_207, %c0_208] : memref<128x512xf32, #tpu.memory_space<vmem>>, vector<128x512xf32>
    %cst_209 = arith.constant dense<0.000000e+00> : vector<2x512xf32>
    %452 = tpu.matmul %448, %451, %cst_209 {dimension_numbers = #tpu.dot_dimension_numbers<[1], [0], [0], [1], [0, 0, 1, 1], [], []>} : vector<2x128xf32>, vector<128x512xf32>, vector<2x512xf32> -> vector<2x512xf32>
    %453 = arith.addf %450, %452 : vector<2x512xf32>
    %454 = vector.extract_strided_slice %453 {offsets = [0, 0], sizes = [2, 128], strides = [1, 1]} : vector<2x512xf32> to vector<2x128xf32>
    %cst_210 = arith.constant 5.000000e-01 : f32
    %455 = vector.broadcast %cst_210 : f32 to vector<2x128xf32>
    %456 = arith.mulf %455, %454 : vector<2x128xf32>
    %457 = math.tanh %456 : vector<2x128xf32>
    %cst_211 = arith.constant 5.000000e-01 : f32
    %458 = vector.broadcast %cst_211 : f32 to vector<2x128xf32>
    %459 = arith.mulf %458, %457 : vector<2x128xf32>
    %cst_212 = arith.constant 5.000000e-01 : f32
    %460 = vector.broadcast %cst_212 : f32 to vector<2x128xf32>
    %461 = arith.addf %459, %460 : vector<2x128xf32>
    %462 = vector.extract_strided_slice %453 {offsets = [0, 128], sizes = [2, 128], strides = [1, 1]} : vector<2x512xf32> to vector<2x128xf32>
    %cst_213 = arith.constant 5.000000e-01 : f32
    %463 = vector.broadcast %cst_213 : f32 to vector<2x128xf32>
    %464 = arith.mulf %463, %462 : vector<2x128xf32>
    %465 = math.tanh %464 : vector<2x128xf32>
    %cst_214 = arith.constant 5.000000e-01 : f32
    %466 = vector.broadcast %cst_214 : f32 to vector<2x128xf32>
    %467 = arith.mulf %466, %465 : vector<2x128xf32>
    %cst_215 = arith.constant 5.000000e-01 : f32
    %468 = vector.broadcast %cst_215 : f32 to vector<2x128xf32>
    %469 = arith.addf %467, %468 : vector<2x128xf32>
    %470 = vector.extract_strided_slice %453 {offsets = [0, 256], sizes = [2, 128], strides = [1, 1]} : vector<2x512xf32> to vector<2x128xf32>
    %471 = math.tanh %470 : vector<2x128xf32>
    %472 = vector.extract_strided_slice %453 {offsets = [0, 384], sizes = [2, 128], strides = [1, 1]} : vector<2x512xf32> to vector<2x128xf32>
    %cst_216 = arith.constant 5.000000e-01 : f32
    %473 = vector.broadcast %cst_216 : f32 to vector<2x128xf32>
    %474 = arith.mulf %473, %472 : vector<2x128xf32>
    %475 = math.tanh %474 : vector<2x128xf32>
    %cst_217 = arith.constant 5.000000e-01 : f32
    %476 = vector.broadcast %cst_217 : f32 to vector<2x128xf32>
    %477 = arith.mulf %476, %475 : vector<2x128xf32>
    %cst_218 = arith.constant 5.000000e-01 : f32
    %478 = vector.broadcast %cst_218 : f32 to vector<2x128xf32>
    %479 = arith.addf %477, %478 : vector<2x128xf32>
    %480 = arith.mulf %469, %446 : vector<2x128xf32>
    %481 = arith.mulf %461, %471 : vector<2x128xf32>
    %482 = arith.addf %480, %481 : vector<2x128xf32>
    %483 = math.tanh %482 : vector<2x128xf32>
    %484 = arith.mulf %479, %483 : vector<2x128xf32>
    %c8_219 = arith.constant 8 : index
    %c0_220 = arith.constant 0 : index
    %485 = vector.load %arg11[%c8_219, %c0_220] : memref<16x128xf32, #tpu.memory_space<vmem>>, vector<2x128xf32>
    tpu.vector_store %arg11[%c8_219, %c0_220], %484 {strides = array<i32>} : memref<16x128xf32, #tpu.memory_space<vmem>>, vector<2x128xf32>,
    %c10_221 = arith.constant 10 : index
    %c0_222 = arith.constant 0 : index
    %486 = vector.load %arg10[%c10_221, %c0_222] : memref<16x512xf32, #tpu.memory_space<vmem>>, vector<2x512xf32>
    %c0_223 = arith.constant 0 : index
    %c0_224 = arith.constant 0 : index
    %487 = vector.load %arg5[%c0_223, %c0_224] : memref<128x512xf32, #tpu.memory_space<vmem>>, vector<128x512xf32>
    %cst_225 = arith.constant dense<0.000000e+00> : vector<2x512xf32>
    %488 = tpu.matmul %484, %487, %cst_225 {dimension_numbers = #tpu.dot_dimension_numbers<[1], [0], [0], [1], [0, 0, 1, 1], [], []>} : vector<2x128xf32>, vector<128x512xf32>, vector<2x512xf32> -> vector<2x512xf32>
    %489 = arith.addf %486, %488 : vector<2x512xf32>
    %490 = vector.extract_strided_slice %489 {offsets = [0, 0], sizes = [2, 128], strides = [1, 1]} : vector<2x512xf32> to vector<2x128xf32>
    %cst_226 = arith.constant 5.000000e-01 : f32
    %491 = vector.broadcast %cst_226 : f32 to vector<2x128xf32>
    %492 = arith.mulf %491, %490 : vector<2x128xf32>
    %493 = math.tanh %492 : vector<2x128xf32>
    %cst_227 = arith.constant 5.000000e-01 : f32
    %494 = vector.broadcast %cst_227 : f32 to vector<2x128xf32>
    %495 = arith.mulf %494, %493 : vector<2x128xf32>
    %cst_228 = arith.constant 5.000000e-01 : f32
    %496 = vector.broadcast %cst_228 : f32 to vector<2x128xf32>
    %497 = arith.addf %495, %496 : vector<2x128xf32>
    %498 = vector.extract_strided_slice %489 {offsets = [0, 128], sizes = [2, 128], strides = [1, 1]} : vector<2x512xf32> to vector<2x128xf32>
    %cst_229 = arith.constant 5.000000e-01 : f32
    %499 = vector.broadcast %cst_229 : f32 to vector<2x128xf32>
    %500 = arith.mulf %499, %498 : vector<2x128xf32>
    %501 = math.tanh %500 : vector<2x128xf32>
    %cst_230 = arith.constant 5.000000e-01 : f32
    %502 = vector.broadcast %cst_230 : f32 to vector<2x128xf32>
    %503 = arith.mulf %502, %501 : vector<2x128xf32>
    %cst_231 = arith.constant 5.000000e-01 : f32
    %504 = vector.broadcast %cst_231 : f32 to vector<2x128xf32>
    %505 = arith.addf %503, %504 : vector<2x128xf32>
    %506 = vector.extract_strided_slice %489 {offsets = [0, 256], sizes = [2, 128], strides = [1, 1]} : vector<2x512xf32> to vector<2x128xf32>
    %507 = math.tanh %506 : vector<2x128xf32>
    %508 = vector.extract_strided_slice %489 {offsets = [0, 384], sizes = [2, 128], strides = [1, 1]} : vector<2x512xf32> to vector<2x128xf32>
    %cst_232 = arith.constant 5.000000e-01 : f32
    %509 = vector.broadcast %cst_232 : f32 to vector<2x128xf32>
    %510 = arith.mulf %509, %508 : vector<2x128xf32>
    %511 = math.tanh %510 : vector<2x128xf32>
    %cst_233 = arith.constant 5.000000e-01 : f32
    %512 = vector.broadcast %cst_233 : f32 to vector<2x128xf32>
    %513 = arith.mulf %512, %511 : vector<2x128xf32>
    %cst_234 = arith.constant 5.000000e-01 : f32
    %514 = vector.broadcast %cst_234 : f32 to vector<2x128xf32>
    %515 = arith.addf %513, %514 : vector<2x128xf32>
    %516 = arith.mulf %505, %482 : vector<2x128xf32>
    %517 = arith.mulf %497, %507 : vector<2x128xf32>
    %518 = arith.addf %516, %517 : vector<2x128xf32>
    %519 = math.tanh %518 : vector<2x128xf32>
    %520 = arith.mulf %515, %519 : vector<2x128xf32>
    %c10_235 = arith.constant 10 : index
    %c0_236 = arith.constant 0 : index
    %521 = vector.load %arg11[%c10_235, %c0_236] : memref<16x128xf32, #tpu.memory_space<vmem>>, vector<2x128xf32>
    tpu.vector_store %arg11[%c10_235, %c0_236], %520 {strides = array<i32>} : memref<16x128xf32, #tpu.memory_space<vmem>>, vector<2x128xf32>,
    %c12_237 = arith.constant 12 : index
    %c0_238 = arith.constant 0 : index
    %522 = vector.load %arg10[%c12_237, %c0_238] : memref<16x512xf32, #tpu.memory_space<vmem>>, vector<2x512xf32>
    %c0_239 = arith.constant 0 : index
    %c0_240 = arith.constant 0 : index
    %523 = vector.load %arg5[%c0_239, %c0_240] : memref<128x512xf32, #tpu.memory_space<vmem>>, vector<128x512xf32>
    %cst_241 = arith.constant dense<0.000000e+00> : vector<2x512xf32>
    %524 = tpu.matmul %520, %523, %cst_241 {dimension_numbers = #tpu.dot_dimension_numbers<[1], [0], [0], [1], [0, 0, 1, 1], [], []>} : vector<2x128xf32>, vector<128x512xf32>, vector<2x512xf32> -> vector<2x512xf32>
    %525 = arith.addf %522, %524 : vector<2x512xf32>
    %526 = vector.extract_strided_slice %525 {offsets = [0, 0], sizes = [2, 128], strides = [1, 1]} : vector<2x512xf32> to vector<2x128xf32>
    %cst_242 = arith.constant 5.000000e-01 : f32
    %527 = vector.broadcast %cst_242 : f32 to vector<2x128xf32>
    %528 = arith.mulf %527, %526 : vector<2x128xf32>
    %529 = math.tanh %528 : vector<2x128xf32>
    %cst_243 = arith.constant 5.000000e-01 : f32
    %530 = vector.broadcast %cst_243 : f32 to vector<2x128xf32>
    %531 = arith.mulf %530, %529 : vector<2x128xf32>
    %cst_244 = arith.constant 5.000000e-01 : f32
    %532 = vector.broadcast %cst_244 : f32 to vector<2x128xf32>
    %533 = arith.addf %531, %532 : vector<2x128xf32>
    %534 = vector.extract_strided_slice %525 {offsets = [0, 128], sizes = [2, 128], strides = [1, 1]} : vector<2x512xf32> to vector<2x128xf32>
    %cst_245 = arith.constant 5.000000e-01 : f32
    %535 = vector.broadcast %cst_245 : f32 to vector<2x128xf32>
    %536 = arith.mulf %535, %534 : vector<2x128xf32>
    %537 = math.tanh %536 : vector<2x128xf32>
    %cst_246 = arith.constant 5.000000e-01 : f32
    %538 = vector.broadcast %cst_246 : f32 to vector<2x128xf32>
    %539 = arith.mulf %538, %537 : vector<2x128xf32>
    %cst_247 = arith.constant 5.000000e-01 : f32
    %540 = vector.broadcast %cst_247 : f32 to vector<2x128xf32>
    %541 = arith.addf %539, %540 : vector<2x128xf32>
    %542 = vector.extract_strided_slice %525 {offsets = [0, 256], sizes = [2, 128], strides = [1, 1]} : vector<2x512xf32> to vector<2x128xf32>
    %543 = math.tanh %542 : vector<2x128xf32>
    %544 = vector.extract_strided_slice %525 {offsets = [0, 384], sizes = [2, 128], strides = [1, 1]} : vector<2x512xf32> to vector<2x128xf32>
    %cst_248 = arith.constant 5.000000e-01 : f32
    %545 = vector.broadcast %cst_248 : f32 to vector<2x128xf32>
    %546 = arith.mulf %545, %544 : vector<2x128xf32>
    %547 = math.tanh %546 : vector<2x128xf32>
    %cst_249 = arith.constant 5.000000e-01 : f32
    %548 = vector.broadcast %cst_249 : f32 to vector<2x128xf32>
    %549 = arith.mulf %548, %547 : vector<2x128xf32>
    %cst_250 = arith.constant 5.000000e-01 : f32
    %550 = vector.broadcast %cst_250 : f32 to vector<2x128xf32>
    %551 = arith.addf %549, %550 : vector<2x128xf32>
    %552 = arith.mulf %541, %518 : vector<2x128xf32>
    %553 = arith.mulf %533, %543 : vector<2x128xf32>
    %554 = arith.addf %552, %553 : vector<2x128xf32>
    %555 = math.tanh %554 : vector<2x128xf32>
    %556 = arith.mulf %551, %555 : vector<2x128xf32>
    %c12_251 = arith.constant 12 : index
    %c0_252 = arith.constant 0 : index
    %557 = vector.load %arg11[%c12_251, %c0_252] : memref<16x128xf32, #tpu.memory_space<vmem>>, vector<2x128xf32>
    tpu.vector_store %arg11[%c12_251, %c0_252], %556 {strides = array<i32>} : memref<16x128xf32, #tpu.memory_space<vmem>>, vector<2x128xf32>,
    %c14_253 = arith.constant 14 : index
    %c0_254 = arith.constant 0 : index
    %558 = vector.load %arg10[%c14_253, %c0_254] : memref<16x512xf32, #tpu.memory_space<vmem>>, vector<2x512xf32>
    %c0_255 = arith.constant 0 : index
    %c0_256 = arith.constant 0 : index
    %559 = vector.load %arg5[%c0_255, %c0_256] : memref<128x512xf32, #tpu.memory_space<vmem>>, vector<128x512xf32>
    %cst_257 = arith.constant dense<0.000000e+00> : vector<2x512xf32>
    %560 = tpu.matmul %556, %559, %cst_257 {dimension_numbers = #tpu.dot_dimension_numbers<[1], [0], [0], [1], [0, 0, 1, 1], [], []>} : vector<2x128xf32>, vector<128x512xf32>, vector<2x512xf32> -> vector<2x512xf32>
    %561 = arith.addf %558, %560 : vector<2x512xf32>
    %562 = vector.extract_strided_slice %561 {offsets = [0, 0], sizes = [2, 128], strides = [1, 1]} : vector<2x512xf32> to vector<2x128xf32>
    %cst_258 = arith.constant 5.000000e-01 : f32
    %563 = vector.broadcast %cst_258 : f32 to vector<2x128xf32>
    %564 = arith.mulf %563, %562 : vector<2x128xf32>
    %565 = math.tanh %564 : vector<2x128xf32>
    %cst_259 = arith.constant 5.000000e-01 : f32
    %566 = vector.broadcast %cst_259 : f32 to vector<2x128xf32>
    %567 = arith.mulf %566, %565 : vector<2x128xf32>
    %cst_260 = arith.constant 5.000000e-01 : f32
    %568 = vector.broadcast %cst_260 : f32 to vector<2x128xf32>
    %569 = arith.addf %567, %568 : vector<2x128xf32>
    %570 = vector.extract_strided_slice %561 {offsets = [0, 128], sizes = [2, 128], strides = [1, 1]} : vector<2x512xf32> to vector<2x128xf32>
    %cst_261 = arith.constant 5.000000e-01 : f32
    %571 = vector.broadcast %cst_261 : f32 to vector<2x128xf32>
    %572 = arith.mulf %571, %570 : vector<2x128xf32>
    %573 = math.tanh %572 : vector<2x128xf32>
    %cst_262 = arith.constant 5.000000e-01 : f32
    %574 = vector.broadcast %cst_262 : f32 to vector<2x128xf32>
    %575 = arith.mulf %574, %573 : vector<2x128xf32>
    %cst_263 = arith.constant 5.000000e-01 : f32
    %576 = vector.broadcast %cst_263 : f32 to vector<2x128xf32>
    %577 = arith.addf %575, %576 : vector<2x128xf32>
    %578 = vector.extract_strided_slice %561 {offsets = [0, 256], sizes = [2, 128], strides = [1, 1]} : vector<2x512xf32> to vector<2x128xf32>
    %579 = math.tanh %578 : vector<2x128xf32>
    %580 = vector.extract_strided_slice %561 {offsets = [0, 384], sizes = [2, 128], strides = [1, 1]} : vector<2x512xf32> to vector<2x128xf32>
    %cst_264 = arith.constant 5.000000e-01 : f32
    %581 = vector.broadcast %cst_264 : f32 to vector<2x128xf32>
    %582 = arith.mulf %581, %580 : vector<2x128xf32>
    %583 = math.tanh %582 : vector<2x128xf32>
    %cst_265 = arith.constant 5.000000e-01 : f32
    %584 = vector.broadcast %cst_265 : f32 to vector<2x128xf32>
    %585 = arith.mulf %584, %583 : vector<2x128xf32>
    %cst_266 = arith.constant 5.000000e-01 : f32
    %586 = vector.broadcast %cst_266 : f32 to vector<2x128xf32>
    %587 = arith.addf %585, %586 : vector<2x128xf32>
    %588 = arith.mulf %577, %554 : vector<2x128xf32>
    %589 = arith.mulf %569, %579 : vector<2x128xf32>
    %590 = arith.addf %588, %589 : vector<2x128xf32>
    %591 = math.tanh %590 : vector<2x128xf32>
    %592 = arith.mulf %587, %591 : vector<2x128xf32>
    %c14_267 = arith.constant 14 : index
    %c0_268 = arith.constant 0 : index
    %593 = vector.load %arg11[%c14_267, %c0_268] : memref<16x128xf32, #tpu.memory_space<vmem>>, vector<2x128xf32>
    tpu.vector_store %arg11[%c14_267, %c0_268], %592 {strides = array<i32>} : memref<16x128xf32, #tpu.memory_space<vmem>>, vector<2x128xf32>,
    %c0_269 = arith.constant 0 : index
    %c0_270 = arith.constant 0 : index
    %594 = vector.load %arg11[%c0_269, %c0_270] : memref<16x128xf32, #tpu.memory_space<vmem>>, vector<16x128xf32>
    %c0_271 = arith.constant 0 : index
    %c0_272 = arith.constant 0 : index
    %595 = vector.load %arg7[%c0_271, %c0_272] : memref<128x1xf32, #tpu.memory_space<vmem>>, vector<128x1xf32>
    %cst_273 = arith.constant dense<0.000000e+00> : vector<16x1xf32>
    %596 = tpu.matmul %594, %595, %cst_273 {dimension_numbers = #tpu.dot_dimension_numbers<[1], [0], [0], [1], [0, 0, 1, 1], [], []>} : vector<16x128xf32>, vector<128x1xf32>, vector<16x1xf32> -> vector<16x1xf32>
    %c0_274 = arith.constant 0 : index
    %c0_275 = arith.constant 0 : index
    %597 = vector.load %arg8[%c0_274, %c0_275] : memref<1x1xf32, #tpu.memory_space<vmem>>, vector<1x1xf32>
    %598 = vector.broadcast %597 : vector<1x1xf32> to vector<16x1xf32>
    %599 = arith.addf %596, %598 : vector<16x1xf32>
    %c0_276 = arith.constant 0 : index
    %c0_277 = arith.constant 0 : index
    %600 = vector.load %arg9[%c0_276, %c0_277] : memref<16x1xf32, #tpu.memory_space<vmem>>, vector<16x1xf32>
    tpu.vector_store %arg9[%c0_276, %c0_277], %599 {strides = array<i32>} : memref<16x1xf32, #tpu.memory_space<vmem>>, vector<16x1xf32>,
    return
  }
}

</mosaic_0001>

<bundles_post_ra>
// kernel: tpu_custom_call.1
= control target key start
LH: loop header
LB: loop body
LE: loop exit
PB: predicated region body
PF: predicated region fallthrough
CT: control target
= control target key end

     0   :  { %s6571_s0 = inlined_call_operand.vmem [shape: f32[16,8], index: 0, kind: input, shape index: {}]   ;;  %s6572_s1 = inlined_call_operand.vmem [shape: f32[8,512], index: 1, kind: input, shape index: {}]   ;;  %s6573_s2 = inlined_call_operand.hbm [shape: f32[128,512], index: 2, kind: input, shape index: {}]   ;;  %s6574_s3 = inlined_call_operand.vmem [shape: f32[1,512], index: 3, kind: input, shape index: {}]   ;;  %s6575_s4 = inlined_call_operand.hbm [shape: f32[128,512], index: 4, kind: input, shape index: {}]   ;;  %s6576_s5 = inlined_call_operand.hbm [shape: f32[128,512], index: 5, kind: input, shape index: {}]   ;;  %s6577_s6 = inlined_call_operand.vmem [shape: f32[1,512], index: 6, kind: input, shape index: {}]   ;;  %s6578_s7 = inlined_call_operand.vmem [shape: f32[128,1], index: 7, kind: input, shape index: {}]   ;;  %s6579_s8 = inlined_call_operand.<no memory space> [shape: f32[1,1], index: 8, kind: input, shape index: {}]   ;;  %s6580_s9 = inlined_call_operand.vmem [shape: f32[16,1], index: 9, kind: output, shape index: {}]  }
   0x1   :  { %v14_v0 = vstv %s6579_s8 }
   0x2   :  { %15 = vst [vmem:[#allocation4] sm:$0x1] %v14_v0 }
   0x3   :  { %16 = vsyncpa [#allocation6], 0 }
   0x4   :  { %17 = vsyncpa [#allocation8], 0  ;;  %s4863_s11 = smov [#allocation7]   ;;  %s4864_s13 = smov [#allocation5]  }
   0x5   :  { %s41_s12 = sshll.u32 %s4863_s11, 4  ;;  %s27_s14 = sshll.u32 %s4864_s13, 4  ;;  %s42_s12 = int_to_ptr.vmem [resolvable:$true] %s41_s12  ;;  %s28_s14 = int_to_ptr.vmem [resolvable:$true] %s27_s14 }
   0x6   :  { %s4807_s15 = scalar_lea.vmem %s42_s12, 8192  ;;  %p4812_p1 = scmp.lt.s32.totalorder %s42_s12, %s42_s12 }
   0x7   :  { %p4808_p0 = scmp.ne.s32.totalorder %s42_s12, %s4807_s15  ;;  %p4813_p2 = scmp.lt.s32.totalorder %s4807_s15, %s4807_s15 }
   0x9   :  { %p4814_p3 = por %p4813_p2, %p4812_p1 }
   0xb   :  { %p4815_p4 = pnand %p4814_p3, %p4808_p0 }
   0xd   :  { %4818 = shalt.err (!%p4815_p4)
}
   0xe   :  { %s4865_s16 = smov 512   ;;  %s4866_s17 = smov 32  }
   0xf   :  { %47 = dma.hbm_to_vmem [thread:$0]  %s6575_s4, 8192, %s42_s12, [#allocation8], %s4865_s16, %s4865_s16, %s4866_s17  }
  0x10   :  { %s4827_s19 = scalar_lea.vmem %s28_s14, 8192  ;;  %p4832_p6 = scmp.lt.s32.totalorder %s28_s14, %s28_s14 }
  0x11   :  { %p4828_p5 = scmp.ne.s32.totalorder %s28_s14, %s4827_s19  ;;  %p4833_p7 = scmp.lt.s32.totalorder %s4827_s19, %s4827_s19 }
  0x13   :  { %p4834_p8 = por %p4833_p7, %p4832_p6 }
  0x15   :  { %p4835_p9 = pnand %p4834_p8, %p4828_p5 }
  0x17   :  { %4838 = shalt.err (!%p4835_p9)
}
  0x18   :  { %33 = dma.hbm_to_vmem [thread:$0]  %s6573_s2, 8192, %s28_s14, [#allocation6], %s4865_s16, %s4865_s16, %s4866_s17  }
  0x19   :  { %s4867_s22 = smov [#allocation9]  }
  0x1a   :  { %s53_s23 = sshll.u32 %s4867_s22, 4  ;;  %s54_s23 = int_to_ptr.vmem [resolvable:$true] %s53_s23 }
  0x1b   :  { %s4847_s24 = scalar_lea.vmem %s54_s23, 8192  ;;  %p4852_p11 = scmp.lt.s32.totalorder %s54_s23, %s54_s23 }
  0x1c   :  { %p4848_p10 = scmp.ne.s32.totalorder %s54_s23, %s4847_s24  ;;  %p4853_p12 = scmp.lt.s32.totalorder %s4847_s24, %s4847_s24 }
  0x1e   :  { %p4854_p13 = por %p4853_p12, %p4852_p11 }
  0x20   :  { %p4855_p0 = pnand %p4854_p13, %p4848_p10 }
  0x22   :  { %4858 = shalt.err (!%p4855_p0)
}
  0x23   :  { %59 = dma.hbm_to_vmem [thread:$0]  %s6576_s5, 8192, %s54_s23, [#allocation8], %s4865_s16, %s4865_s16, %s4866_s17  }
  0x24   :  { %4859 = dma.done.wait [#allocation6], 8192  }
  0x25   :  { %4860 = vsyncadd [#allocation6], 4294959104 }
  0x26   :  { %4861 = dma.done.wait [#allocation8], 16384  }
  0x27   :  { %4862 = vsyncadd [#allocation8], 4294950912  ;;  %v6585_v1 = vmov 0.0   ;;  %v78_v2 = vld [vmem:[%s6572_s1 + $0x8] sm:$0xff]  ;;  %v4936_v3 = vld [vmem:[#allocation5 + $0x1e8] sm:$0xff]  ;;  %vm103_vm0 = vcmask 64512  }
  0x28   :  { %174 = vmatprep.mubr.f32.mxu1 %v6585_v1  ;;  %404 = vmatprep.mubr.f32.mxu0 %v6585_v1  ;;  %v77_v4 = vld [vmem:[%s6572_s1] sm:$0xff]  ;;  %v4942_v5 = vld [vmem:[#allocation5 + $0x1e0] sm:$0xff]  ;;  %v4967_v13 = vld [vmem:[%s6571_s0 + $0x8] sm:$0xff]  ;;  %vm4566_vm1 = vcmask 7168  }
  0x29   :  { %140 = vmatprep.subr.mxu1 %v78_v2  ;;  %340 = vmatprep.subr.mxu0 %v4936_v3  ;;  %v75_v6 = vld [vmem:[%s6571_s0] sm:$0xff]  ;;  %v80_v7 = vld [vmem:[%s6572_s1 + $0x18] sm:$0xff]  ;;  %v79_v9 = vld [vmem:[%s6572_s1 + $0x10] sm:$0xff] }
  0x2a   :  { %141 = vmatpush1.msra.mxu1 %v77_v4  ;;  %341 = vmatpush1.msra.mxu0 %v4942_v5  ;;  %v4951_v8 = vld [vmem:[#allocation5 + $0x1c8] sm:$0xff]  ;;  %v4956_v10 = vld [vmem:[#allocation5 + $0x1c0] sm:$0xff]  ;;  %v4973_v15 = vld [vmem:[#allocation5 + $0x1f8] sm:$0xff] }
  0x2b   :  { %4575 = vmatmul.mubr.msk.f32.vlgmr.msra.gmra.mxu1 %vm103_vm0, %v75_v6  ;;  %217 = vmatprep.subr.mxu1 %v80_v7  ;;  %v4959_v11 = vld [vmem:[#allocation5 + $0x1a8] sm:$0xff]  ;;  %v4962_v12 = vld [vmem:[#allocation5 + $0x1a0] sm:$0xff]  ;;  %v4991_v20 = vld [vmem:[#allocation5 + $0x1f0] sm:$0xff] }
  0x2c   :  { %342 = vmatprep.subr.mxu0 %v4951_v8  ;;  %218 = vmatpush1.msra.mxu1 %v79_v9  ;;  %v4971_v14 = vld [vmem:[#allocation5 + $0x188] sm:$0xff]  ;;  %v4976_v16 = vld [vmem:[#allocation5 + $0x180] sm:$0xff]  ;;  %v4996_v22 = vld [vmem:[#allocation5 + $0x1d8] sm:$0xff] }
  0x2d   :  { %343 = vmatpush1.msra.mxu0 %v4956_v10  ;;  %180 = vmatprep.mubr.f32.mxu1 %v6585_v1  ;;  %v4982_v17 = vld [vmem:[#allocation5 + $0x168] sm:$0xff]  ;;  %v4986_v18 = vld [vmem:[#allocation5 + $0x160] sm:$0xff]  ;;  %v5002_v24 = vld [vmem:[#allocation5 + $0x1d0] sm:$0xff] }
  0x2e   :  { %344 = vmatprep.subr.mxu0 %v4959_v11  ;;  %411 = vmatprep.subr.mxu1 %v4973_v15  ;;  %v4989_v19 = vld [vmem:[#allocation5 + $0x148] sm:$0xff]  ;;  %v4994_v21 = vld [vmem:[#allocation5 + $0x140] sm:$0xff]  ;;  %v5008_v26 = vld [vmem:[#allocation5 + $0x1b8] sm:$0xff] }
  0x2f   :  { %345 = vmatpush1.msra.mxu0 %v4962_v12  ;;  %4576 = vmatmul.mubr.msk.f32.gmra.mxu1 %vm103_vm0, %v4967_v13  ;;  %v5000_v23 = vld [vmem:[#allocation5 + $0x128] sm:$0xff]  ;;  %v5006_v25 = vld [vmem:[#allocation5 + $0x120] sm:$0xff]  ;;  %v5014_v28 = vld [vmem:[#allocation5 + $0x1b0] sm:$0xff] }
  0x30   :  { %346 = vmatprep.subr.mxu0 %v4971_v14  ;;  %251 = vmatprep.mubr.f32.mxu1 %v6585_v1  ;;  %v5012_v27 = vld [vmem:[#allocation5 + $0x108] sm:$0xff]  ;;  %v5018_v29 = vld [vmem:[#allocation5 + $0x100] sm:$0xff]  ;;  %v5020_v30 = vld [vmem:[#allocation5 + $0x198] sm:$0xff] }
  0x31   :  { %347 = vmatpush1.msra.mxu0 %v4976_v16  ;;  %v5024_v31 = vld [vmem:[#allocation5 + $0xe8] sm:$0xff]  ;;  %v5026_v32 = vld [vmem:[#allocation5 + $0x190] sm:$0xff]  ;;  %v5030_v33 = vld [vmem:[#allocation5 + $0xe0] sm:$0xff] }
  0x32   :  { %348 = vmatprep.subr.mxu0 %v4982_v17  ;;  %v5032_v34 = vld [vmem:[#allocation5 + $0x178] sm:$0xff]  ;;  %v5036_v35 = vld [vmem:[#allocation5 + $0xc8] sm:$0xff]  ;;  %v5038_v36 = vld [vmem:[#allocation5 + $0x170] sm:$0xff] }
  0x33   :  { %349 = vmatpush1.msra.mxu0 %v4986_v18  ;;  %4577 = vmatmul.mubr.msk.f32.vlgmr.msra.gmra.mxu1 %vm103_vm0, %v75_v6  ;;  %v5042_v37 = vld [vmem:[#allocation5 + $0xc0] sm:$0xff]  ;;  %v5044_v38 = vld [vmem:[#allocation5 + $0x158] sm:$0xff]  ;;  %v5048_v39 = vld [vmem:[#allocation5 + $0xa8] sm:$0xff] }
  0x34   :  { %350 = vmatprep.subr.mxu0 %v4989_v19  ;;  %412 = vmatpush1.msra.mxu1 %v4991_v20  ;;  %v5050_v40 = vld [vmem:[#allocation5 + $0x150] sm:$0xff]  ;;  %v5054_v41 = vld [vmem:[#allocation5 + $0xa0] sm:$0xff]  ;;  %v5056_v42 = vld [vmem:[#allocation5 + $0x138] sm:$0xff] }
  0x35   :  { %351 = vmatpush1.msra.mxu0 %v4994_v21  ;;  %413 = vmatprep.subr.mxu1 %v4996_v22  ;;  %v5060_v43 = vld [vmem:[#allocation5 + $0x88] sm:$0xff]  ;;  %v5062_v44 = vld [vmem:[#allocation5 + $0x130] sm:$0xff]  ;;  %v5066_v45 = vld [vmem:[#allocation5 + $0x80] sm:$0xff] }
  0x36   :  { %352 = vmatprep.subr.mxu0 %v5000_v23  ;;  %414 = vmatpush1.msra.mxu1 %v5002_v24  ;;  %6750 = vst [vmem:[#allocation12_spill] sm:$0xff] %v5066_v45  ;;  %v5068_v46 = vld [vmem:[#allocation5 + $0x118] sm:$0xff]  ;;  %v5072_v47 = vld [vmem:[#allocation5 + $0x68] sm:$0xff]  ;;  %v5074_v48 = vld [vmem:[#allocation5 + $0x110] sm:$0xff] }
  0x37   :  { %353 = vmatpush1.msra.mxu0 %v5006_v25  ;;  %415 = vmatprep.subr.mxu1 %v5008_v26  ;;  %6751 = vst [vmem:[#allocation13_spill] sm:$0xff] %v5072_v47  ;;  %v5078_v49 = vld [vmem:[#allocation5 + $0x60] sm:$0xff]  ;;  %v5080_v50 = vld [vmem:[#allocation5 + $0xf8] sm:$0xff]  ;;  %v5084_v51 = vld [vmem:[#allocation5 + $0x48] sm:$0xff] }
  0x38   :  { %354 = vmatprep.subr.mxu0 %v5012_v27  ;;  %416 = vmatpush1.msra.mxu1 %v5014_v28  ;;  %6752 = vst [vmem:[#allocation14_spill] sm:$0xff] %v5078_v49  ;;  %6753 = vst [vmem:[#allocation15_spill] sm:$0xff] %v5084_v51  ;;  %v5086_v52 = vld [vmem:[#allocation5 + $0xf0] sm:$0xff]  ;;  %v5090_v53 = vld [vmem:[#allocation5 + $0x40] sm:$0xff] }
  0x39   :  { %355 = vmatpush1.msra.mxu0 %v5018_v29  ;;  %417 = vmatprep.subr.mxu1 %v5020_v30  ;;  %6754 = vst [vmem:[#allocation16_spill] sm:$0xff] %v5090_v53  ;;  %v5092_v54 = vld [vmem:[#allocation5 + $0xd8] sm:$0xff]  ;;  %v5096_v55 = vld [vmem:[#allocation5 + $0x28] sm:$0xff]  ;;  %v5098_v56 = vld [vmem:[#allocation5 + $0xd0] sm:$0xff] }
  0x3a   :  { %356 = vmatprep.subr.mxu0 %v5024_v31  ;;  %418 = vmatpush1.msra.mxu1 %v5026_v32  ;;  %6755 = vst [vmem:[#allocation17_spill] sm:$0xff] %v5096_v55  ;;  %v5102_v57 = vld [vmem:[#allocation5 + $0x20] sm:$0xff]  ;;  %v5104_v58 = vld [vmem:[#allocation5 + $0xb8] sm:$0xff]  ;;  %v5108_v59 = vld [vmem:[#allocation5 + $0x8] sm:$0xff] }
  0x3b   :  { %357 = vmatpush1.msra.mxu0 %v5030_v33  ;;  %419 = vmatprep.subr.mxu1 %v5032_v34  ;;  %6756 = vst [vmem:[#allocation18_spill] sm:$0xff] %v5102_v57  ;;  %6757 = vst [vmem:[#allocation19_spill] sm:$0xff] %v5108_v59  ;;  %v5110_v60 = vld [vmem:[#allocation5 + $0xb0] sm:$0xff]  ;;  %v5114_v61 = vld [vmem:[#allocation5] sm:$0xff] }
  0x3c   :  { %358 = vmatprep.subr.mxu0 %v5036_v35  ;;  %420 = vmatpush1.msra.mxu1 %v5038_v36  ;;  %6758 = vst [vmem:[#allocation20_spill] sm:$0xff] %v5114_v61  ;;  %v5116_v62 = vld [vmem:[#allocation5 + $0x98] sm:$0xff]  ;;  %v5120_v63 = vld [vmem:[#allocation5 + $0x90] sm:$0xff] }
  0x3d   :  { %359 = vmatpush1.msra.mxu0 %v5042_v37  ;;  %421 = vmatprep.subr.mxu1 %v5044_v38  ;;  %6759 = vst [vmem:[#allocation21_spill] sm:$0xff] %v5116_v62  ;;  %6760 = vst [vmem:[#allocation22_spill] sm:$0xff] %v5120_v63  ;;  %v5124_v0 = vld [vmem:[#allocation5 + $0x78] sm:$0xff]  ;;  %v5128_v2 = vld [vmem:[#allocation5 + $0x70] sm:$0xff] }
  0x3e   :  { %360 = vmatprep.subr.mxu0 %v5048_v39  ;;  %422 = vmatpush1.msra.mxu1 %v5050_v40  ;;  %6761 = vst [vmem:[#allocation23_spill] sm:$0xff] %v5124_v0  ;;  %6762 = vst [vmem:[#allocation24_spill] sm:$0xff] %v5128_v2  ;;  %v5132_v4 = vld [vmem:[#allocation5 + $0x58] sm:$0xff]  ;;  %v5136_v6 = vld [vmem:[#allocation5 + $0x50] sm:$0xff] }
  0x3f   :  { %361 = vmatpush1.msra.mxu0 %v5054_v41  ;;  %423 = vmatprep.subr.mxu1 %v5056_v42  ;;  %6763 = vst [vmem:[#allocation25_spill] sm:$0xff] %v5132_v4  ;;  %6764 = vst [vmem:[#allocation26_spill] sm:$0xff] %v5136_v6  ;;  %v5139_v7 = vld [vmem:[#allocation5 + $0x38] sm:$0xff]  ;;  %v5145_v9 = vld [vmem:[#allocation5 + $0x30] sm:$0xff] }
  0x40   :  { %362 = vmatprep.subr.mxu0 %v5060_v43  ;;  %424 = vmatpush1.msra.mxu1 %v5062_v44  ;;  %6765 = vst [vmem:[#allocation27_spill] sm:$0xff] %v5139_v7  ;;  %6766 = vst [vmem:[#allocation28_spill] sm:$0xff] %v5145_v9 }
  0x41   :  { %363 = vmatpush1.msra.mxu0 %v5066_v45  ;;  %425 = vmatprep.subr.mxu1 %v5068_v46 }
  0x42   :  { %364 = vmatprep.subr.mxu0 %v5072_v47  ;;  %426 = vmatpush1.msra.mxu1 %v5074_v48 }
  0x43   :  { %365 = vmatpush1.msra.mxu0 %v5078_v49  ;;  %427 = vmatprep.subr.mxu1 %v5080_v50 }
  0x44   :  { %366 = vmatprep.subr.mxu0 %v5084_v51  ;;  %428 = vmatpush1.msra.mxu1 %v5086_v52 }
  0x45   :  { %367 = vmatpush1.msra.mxu0 %v5090_v53  ;;  %429 = vmatprep.subr.mxu1 %v5092_v54 }
  0x46   :  { %368 = vmatprep.subr.mxu0 %v5096_v55  ;;  %430 = vmatpush1.msra.mxu1 %v5098_v56 }
  0x47   :  { %369 = vmatpush1.msra.mxu0 %v5102_v57  ;;  %431 = vmatprep.subr.mxu1 %v5104_v58 }
  0x48   :  { %370 = vmatprep.subr.mxu0 %v5108_v59  ;;  %432 = vmatpush1.msra.mxu1 %v5110_v60  ;;  %v5152_v59 = vld [vmem:[#allocation5 + $0x10] sm:$0xff] }
  0x49   :  { %371 = vmatpush1.msra.mxu0 %v5114_v61  ;;  %433 = vmatprep.subr.mxu1 %v5116_v62  ;;  %v5148_v61 = vld [vmem:[#allocation5 + $0x18] sm:$0xff]  ;;  %6768 = vst [vmem:[#allocation30_spill] sm:$0xff] %v5152_v59 }
  0x4a   :  { %405 = vmatmul.mubr.f32.vlgmr.msra.gmra.mxu0 %v6585_v1  ;;  %434 = vmatpush1.msra.mxu1 %v5120_v63  ;;  %6767 = vst [vmem:[#allocation29_spill] sm:$0xff] %v5148_v61 }
  0x4b   :  { %435 = vmatprep.subr.mxu1 %v5124_v0  ;;  %257 = vmatprep.mubr.f32.mxu1 %v6585_v1 }
  0x4c   :  { %436 = vmatpush1.msra.mxu1 %v5128_v2  ;;  %573 = vmatprep.subr.mxu0 %v4936_v3 }
  0x4d   :  { %437 = vmatprep.subr.mxu1 %v5132_v4  ;;  %4578 = vmatmul.mubr.msk.f32.gmra.mxu1 %vm103_vm0, %v4967_v13  ;;  %v6769_v13 = vld [vmem:[#allocation19_spill] sm:$0xff] }
  0x4e   :  { %438 = vmatpush1.msra.mxu1 %v5136_v6  ;;  %475 = vmatprep.mubr.f32.mxu1 %v6585_v1 }
  0x4f   :  { %439 = vmatprep.subr.mxu1 %v5139_v7  ;;  %574 = vmatpush1.msra.mxu0 %v4942_v5 }
  0x50   :  { %440 = vmatpush1.msra.mxu1 %v5145_v9  ;;  %575 = vmatprep.subr.mxu0 %v4951_v8 }
  0x51   :  { %441 = vmatprep.subr.mxu1 %v5148_v61  ;;  %576 = vmatpush1.msra.mxu0 %v4956_v10 }
  0x52   :  { %442 = vmatpush1.msra.mxu1 %v5152_v59  ;;  %577 = vmatprep.subr.mxu0 %v4959_v11 }
  0x53   :  { %476 = vmatmul.mubr.f32.vlgmr.msra.gmra.mxu1 %v6585_v1  ;;  %644 = vmatprep.subr.mxu1 %v4973_v15  ;;  %v6770_v1 = vld [vmem:[#allocation20_spill] sm:$0xff] }
  0x54   :  { %645 = vmatpush1.msra.mxu1 %v4991_v20  ;;  %578 = vmatpush1.msra.mxu0 %v4962_v12 }
  0x55   :  { %646 = vmatprep.subr.mxu1 %v4996_v22  ;;  %579 = vmatprep.subr.mxu0 %v4971_v14 }
  0x56   :  { %647 = vmatpush1.msra.mxu1 %v5002_v24  ;;  %580 = vmatpush1.msra.mxu0 %v4976_v16 }
  0x57   :  { %648 = vmatprep.subr.mxu1 %v5008_v26  ;;  %581 = vmatprep.subr.mxu0 %v4982_v17 }
  0x58   :  { %649 = vmatpush1.msra.mxu1 %v5014_v28  ;;  %582 = vmatpush1.msra.mxu0 %v4986_v18 }
  0x59   :  { %650 = vmatprep.subr.mxu1 %v5020_v30  ;;  %583 = vmatprep.subr.mxu0 %v4989_v19 }
  0x5a   :  { %651 = vmatpush1.msra.mxu1 %v5026_v32  ;;  %584 = vmatpush1.msra.mxu0 %v4994_v21 }
  0x5b   :  { %652 = vmatprep.subr.mxu1 %v5032_v34  ;;  %585 = vmatprep.subr.mxu0 %v5000_v23 }
  0x5c   :  { %653 = vmatpush1.msra.mxu1 %v5038_v36  ;;  %586 = vmatpush1.msra.mxu0 %v5006_v25 }
  0x5d   :  { %654 = vmatprep.subr.mxu1 %v5044_v38  ;;  %587 = vmatprep.subr.mxu0 %v5012_v27 }
  0x5e   :  { %655 = vmatpush1.msra.mxu1 %v5050_v40  ;;  %588 = vmatpush1.msra.mxu0 %v5018_v29 }
  0x5f   :  { %656 = vmatprep.subr.mxu1 %v5056_v42  ;;  %589 = vmatprep.subr.mxu0 %v5024_v31 }
  0x60   :  { %657 = vmatpush1.msra.mxu1 %v5062_v44  ;;  %590 = vmatpush1.msra.mxu0 %v5030_v33 }
  0x61   :  { %658 = vmatprep.subr.mxu1 %v5068_v46  ;;  %591 = vmatprep.subr.mxu0 %v5036_v35 }
  0x62   :  { %659 = vmatpush1.msra.mxu1 %v5074_v48  ;;  %592 = vmatpush1.msra.mxu0 %v5042_v37 }
  0x63   :  { %660 = vmatprep.subr.mxu1 %v5080_v50  ;;  %593 = vmatprep.subr.mxu0 %v5048_v39 }
  0x64   :  { %661 = vmatpush1.msra.mxu1 %v5086_v52  ;;  %594 = vmatpush1.msra.mxu0 %v5054_v41 }
  0x65   :  { %662 = vmatprep.subr.mxu1 %v5092_v54  ;;  %595 = vmatprep.subr.mxu0 %v5060_v43 }
  0x66   :  { %663 = vmatpush1.msra.mxu1 %v5098_v56  ;;  %596 = vmatpush1.msra.mxu0 %v5066_v45 }
  0x67   :  { %664 = vmatprep.subr.mxu1 %v5104_v58  ;;  %597 = vmatprep.subr.mxu0 %v5072_v47 }
  0x68   :  { %665 = vmatpush1.msra.mxu1 %v5110_v60  ;;  %598 = vmatpush1.msra.mxu0 %v5078_v49 }
  0x69   :  { %666 = vmatprep.subr.mxu1 %v5116_v62  ;;  %599 = vmatprep.subr.mxu0 %v5084_v51  ;;  %v6771_v51 = vmov 0.0  }
  0x6a   :  { %667 = vmatpush1.msra.mxu1 %v5120_v63  ;;  %600 = vmatpush1.msra.mxu0 %v5090_v53 }
  0x6b   :  { %668 = vmatprep.subr.mxu1 %v5124_v0  ;;  %601 = vmatprep.subr.mxu0 %v5096_v55 }
  0x6c   :  { %669 = vmatpush1.msra.mxu1 %v5128_v2  ;;  %602 = vmatpush1.msra.mxu0 %v5102_v57 }
  0x6d   :  { %670 = vmatprep.subr.mxu1 %v5132_v4  ;;  %603 = vmatprep.subr.mxu0 %v6769_v13  ;;  %v83_v13 = vlaneseq }
  0x6e   :  { %671 = vmatpush1.msra.mxu1 %v5136_v6  ;;  %604 = vmatpush1.msra.mxu0 %v6770_v1 }
  0x6f   :  { %672 = vmatprep.subr.mxu1 %v5139_v7  ;;  %637 = vmatprep.mubr.f32.mxu0 %v6771_v51  ;;  %v5225_v57 = vshrl.u32 %v83_v13, 7  ;;  %v81_v7 = vld [vmem:[%s6574_s3] sm:$0xf] }
  0x70   :  { %673 = vmatpush1.msra.mxu1 %v5145_v9  ;;  %708 = vmatprep.mubr.f32.mxu1 %v6771_v51 }
  0x71   :  { %674 = vmatprep.subr.mxu1 %v5148_v61  ;;  %824 = vmatprep.subr.mxu0 %v4936_v3  ;;  %6772 = vst [vmem:[#allocation31_spill] sm:$0xff] %v5225_v57  ;;  %v6600_v1 = vsub.s32 0, %v5225_v57  ;;  %v6601_v9 = vsub.s32 1, %v5225_v57  ;;  %v6608_v6 = vsub.s32 3, %v5225_v57 }
  0x72   :  { %675 = vmatpush1.msra.mxu1 %v5152_v59 }
  0x73   :  { %895 = vmatprep.subr.mxu1 %v4973_v15  ;;  %v86_v51 = vrot.slane %v81_v7, %v6600_v1  ;;  %v90_v3 = vrot.slane %v81_v7, %v6601_v9  ;;  %v6606_v15 = vsub.s32 2, %v5225_v57  ;;  %v98_v9 = vrot.slane %v81_v7, %v6608_v6  ;;  %v5493_v57 = vld [vmem:[#allocation5 + $0x18] sm:$0xff] }
  0x74   :  { %6812 = vst [vmem:[#allocation32_spill] sm:$0xff] %v5493_v57 }
  0x75   :  { %v94_v2 = vrot.slane %v81_v7, %v6606_v15 }
  0xeb   :  { %v176_v59 = vpop.f32.mrf.mxu1 }
  0xec   :  { %v177_v61 = vadd.f32 %v176_v59, %v86_v51 }
  0xed   :  { %v178_v13 = vpop.f32.mrf.mxu1 }
  0xee   :  { %264 = vst [vmem:[#allocation2 + $0x30] sm:$0xff] %v177_v61  ;;  %v179_v55 = vadd.f32 %v178_v13, %v90_v3 }
  0xef   :  { %v182_v53 = vpop.f32.mrf.mxu1 }
  0xf0   :  { %265 = vst [vmem:[#allocation2] sm:$0xff] %v179_v55  ;;  %v183_v4 = vadd.f32 %v182_v53, %v86_v51 }
  0xf1   :  { %v184_v49 = vpop.f32.mrf.mxu1 }
  0xf2   :  { %268 = vst [vmem:[#allocation2 + $0x8] sm:$0xff] %v183_v4  ;;  %v185_v1 = vadd.f32 %v184_v49, %v90_v3 }
  0xf3   :  { %v253_v59 = vpop.f32.mrf.mxu1 }
  0xf4   :  { %269 = vst [vmem:[#allocation2 + $0x20] sm:$0xff] %v185_v1  ;;  %v254_v0 = vadd.f32 %v253_v59, %v94_v2 }
  0xf5   :  { %v255_v47 = vpop.f32.mrf.mxu1  ;;  %v272_v13 = vld [vmem:[#allocation2 + $0x30] sm:$0x3] }
  0xf6   :  { %266 = vst [vmem:[#allocation2 + $0x18] sm:$0xff] %v254_v0  ;;  %v256_v61 = vadd.f32 %v255_v47, %v98_v9 }
  0xf7   :  { %v273_v51 = vld [vmem:[#allocation2] sm:$0x3] }
  0xf8   :  { %267 = vst [vmem:[#allocation2 + $0x10] sm:$0xff] %v256_v61 }
  0xfd   :  { %v274_v1 = vld [vmem:[#allocation2 + $0x18] sm:$0x3] }
  0xff   :  { %v275_v61 = vld [vmem:[#allocation2 + $0x10] sm:$0x3] }
 0x10a   :  { %v406_v63 = vpop.f32.mrf.mxu0 }
 0x10b   :  { %v482_v55 = vadd.f32 %v406_v63, %v272_v13 }
 0x10c   :  { %v408_v53 = vpop.f32.mrf.mxu0 }
 0x10d   :  { %v486_v45 = vmul.f32 0.5, %v482_v55  ;;  %v483_v15 = vadd.f32 %v408_v53, %v273_v51  ;;  %v259_v62 = vpop.f32.mrf.mxu1 }
 0x10e   :  { %v260_v4 = vadd.f32 %v259_v62, %v94_v2 }
 0x10f   :  { %4639 = vtanh.f32 %v486_v45  ;;  %v490_v49 = vmul.f32 0.5, %v483_v15  ;;  %v261_v3 = vpop.f32.mrf.mxu1 }
 0x110   :  { %270 = vst [vmem:[#allocation2 + $0x28] sm:$0xff] %v260_v4  ;;  %v262_v7 = vadd.f32 %v261_v3, %v98_v9 }
 0x111   :  { %4641 = vtanh.f32 %v490_v49 }
 0x112   :  { %271 = vst [vmem:[#allocation2 + $0x38] sm:$0xff] %v262_v7 }
 0x113   :  { %v477_v0 = vpop.f32.mrf.mxu1 }
 0x114   :  { %v484_v47 = vadd.f32 %v477_v0, %v274_v1 }
 0x115   :  { %v479_v59 = vpop.f32.mrf.mxu1 }
 0x116   :  { %4643 = vtanh.f32 %v484_v47  ;;  %v485_v63 = vadd.f32 %v479_v59, %v275_v61 }
 0x118   :  { %v495_v6 = vmul.f32 0.5, %v485_v63 }
 0x11a   :  { %4645 = vtanh.f32 %v495_v6 }
 0x11c   :  { %v4640_v13 = vpop.eup %4639 }
 0x11d   :  { %v488_v51 = vmul.f32 0.5, %v4640_v13 }
 0x11e   :  { %v4642_v55 = vpop.eup %4641 }
 0x11f   :  { %v492_v53 = vmul.f32 0.5, %v4642_v55  ;;  %v489_v62 = vadd.f32 0.5, %v488_v51 }
 0x121   :  { %v493_v45 = vadd.f32 0.5, %v492_v53 }
 0x123   :  { %v4644_v2 = vpop.eup %4643  ;;  %v499_v15 = vmul.f32 0.0, %v493_v45 }
 0x124   :  { %v500_v9 = vmul.f32 %v4644_v2, %v489_v62 }
 0x126   :  { %v5242_v4 = vadd.f32 %v500_v9, %v499_v15  ;;  %v5315_v9 = vld [vmem:[#allocation5 + $0x1e8] sm:$0xff] }
 0x127   :  { %v4646_v49 = vpop.eup %4645 }
 0x128   :  { %4647 = vtanh.f32 %v5242_v4  ;;  %v497_v3 = vmul.f32 0.5, %v4646_v49  ;;  %v745_v59 = vrot.slane %v5242_v4, 6  ;;  %v5317_v4 = vld [vmem:[#allocation5 + $0x1f8] sm:$0xff]  ;;  %v5321_v49 = vld [vmem:[#allocation5 + $0x1e0] sm:$0xff] }
 0x12a   :  { %v498_v7 = vadd.f32 0.5, %v497_v3  ;;  %v5323_v3 = vld [vmem:[#allocation5 + $0x1f0] sm:$0xff] }
 0x135   :  { %v4648_v1 = vpop.eup %4647 }
 0x136   :  { %v503_v0 = vmul.f32 %v4648_v1, %v498_v7  ;;  %v5327_v7 = vld [vmem:[#allocation5 + $0x1c8] sm:$0xff]  ;;  %v5329_v1 = vld [vmem:[#allocation5 + $0x1d8] sm:$0xff] }
 0x138   :  { %504 = vst [vmem:[#allocation3] sm:$0x3] %v503_v0  ;;  %638 = vmatmul.mubr.f32.vlgmr.msra.gmra.mxu0 %v503_v0  ;;  %709 = vmatmul.mubr.f32.vlgmr.msra.gmra.mxu1 %v503_v0  ;;  %v5333_v0 = vld [vmem:[#allocation5 + $0x1c0] sm:$0xff] }
 0x139   :  { %825 = vmatpush1.msra.mxu0 %v4942_v5  ;;  %896 = vmatpush1.msra.mxu1 %v4991_v20  ;;  %v6773_v5 = vld [vmem:[#allocation21_spill] sm:$0xff]  ;;  %v6783_v20 = vld [vmem:[#allocation26_spill] sm:$0xff] }
 0x13a   :  { %826 = vmatprep.subr.mxu0 %v4951_v8  ;;  %897 = vmatprep.subr.mxu1 %v4996_v22  ;;  %v6774_v8 = vld [vmem:[#allocation12_spill] sm:$0xff]  ;;  %v6785_v22 = vld [vmem:[#allocation27_spill] sm:$0xff]  ;;  %6793 = vst [vmem:[#allocation21_spill] sm:$0xff] %v5315_v9 }
 0x13b   :  { %827 = vmatpush1.msra.mxu0 %v4956_v10  ;;  %898 = vmatpush1.msra.mxu1 %v5002_v24  ;;  %v6775_v10 = vld [vmem:[#allocation22_spill] sm:$0xff]  ;;  %v6787_v24 = vld [vmem:[#allocation28_spill] sm:$0xff]  ;;  %6794 = vst [vmem:[#allocation12_spill] sm:$0xff] %v5317_v4 }
 0x13c   :  { %828 = vmatprep.subr.mxu0 %v4959_v11  ;;  %899 = vmatprep.subr.mxu1 %v5008_v26  ;;  %v6776_v11 = vld [vmem:[#allocation13_spill] sm:$0xff] }
 0x13d   :  { %829 = vmatpush1.msra.mxu0 %v4962_v12  ;;  %900 = vmatpush1.msra.mxu1 %v5014_v28  ;;  %v6777_v12 = vld [vmem:[#allocation23_spill] sm:$0xff]  ;;  %v6789_v26 = vld [vmem:[#allocation29_spill] sm:$0xff]  ;;  %v6791_v28 = vmov 0.0  }
 0x13e   :  { %830 = vmatprep.subr.mxu0 %v4971_v14  ;;  %901 = vmatprep.subr.mxu1 %v5020_v30  ;;  %v6778_v14 = vld [vmem:[#allocation14_spill] sm:$0xff] }
 0x13f   :  { %831 = vmatpush1.msra.mxu0 %v4976_v16  ;;  %902 = vmatpush1.msra.mxu1 %v5026_v32  ;;  %v6779_v16 = vld [vmem:[#allocation24_spill] sm:$0xff] }
 0x140   :  { %832 = vmatprep.subr.mxu0 %v4982_v17  ;;  %903 = vmatprep.subr.mxu1 %v5032_v34  ;;  %v6780_v17 = vld [vmem:[#allocation15_spill] sm:$0xff]  ;;  %v505_v32 = vld [vmem:[#allocation2 + $0x30] sm:$0xc] }
 0x141   :  { %833 = vmatpush1.msra.mxu0 %v4986_v18  ;;  %904 = vmatpush1.msra.mxu1 %v5038_v36  ;;  %v6781_v18 = vld [vmem:[#allocation25_spill] sm:$0xff] }
 0x142   :  { %834 = vmatprep.subr.mxu0 %v4989_v19  ;;  %905 = vmatprep.subr.mxu1 %v5044_v38  ;;  %v6782_v19 = vld [vmem:[#allocation16_spill] sm:$0xff] }
 0x143   :  { %835 = vmatpush1.msra.mxu0 %v4994_v21  ;;  %906 = vmatpush1.msra.mxu1 %v5050_v40  ;;  %v6784_v21 = vld [vmem:[#allocation17_spill] sm:$0xff] }
 0x144   :  { %836 = vmatprep.subr.mxu0 %v5000_v23  ;;  %907 = vmatprep.subr.mxu1 %v5056_v42  ;;  %v6786_v23 = vld [vmem:[#allocation18_spill] sm:$0xff]  ;;  %v507_v42 = vld [vmem:[#allocation2 + $0x18] sm:$0xc] }
 0x145   :  { %837 = vmatpush1.msra.mxu0 %v5006_v25  ;;  %908 = vmatpush1.msra.mxu1 %v5062_v44  ;;  %v6788_v25 = vld [vmem:[#allocation19_spill] sm:$0xff] }
 0x146   :  { %838 = vmatprep.subr.mxu0 %v5012_v27  ;;  %909 = vmatprep.subr.mxu1 %v5068_v46  ;;  %v6790_v27 = vld [vmem:[#allocation20_spill] sm:$0xff] }
 0x147   :  { %839 = vmatpush1.msra.mxu0 %v5018_v29  ;;  %910 = vmatpush1.msra.mxu1 %v5074_v48  ;;  %v6792_v29 = vld [vmem:[#allocation30_spill] sm:$0xff]  ;;  %v508_v48 = vld [vmem:[#allocation2 + $0x10] sm:$0xc] }
 0x148   :  { %840 = vmatprep.subr.mxu0 %v5024_v31  ;;  %911 = vmatprep.subr.mxu1 %v5080_v50 }
 0x149   :  { %841 = vmatpush1.msra.mxu0 %v5030_v33  ;;  %912 = vmatpush1.msra.mxu1 %v5086_v52 }
 0x14a   :  { %842 = vmatprep.subr.mxu0 %v5036_v35  ;;  %913 = vmatprep.subr.mxu1 %v5092_v54 }
 0x14b   :  { %843 = vmatpush1.msra.mxu0 %v5042_v37  ;;  %914 = vmatpush1.msra.mxu1 %v5098_v56  ;;  %v506_v37 = vld [vmem:[#allocation2] sm:$0xc] }
 0x14c   :  { %844 = vmatprep.subr.mxu0 %v5048_v39  ;;  %915 = vmatprep.subr.mxu1 %v5104_v58 }
 0x14d   :  { %845 = vmatpush1.msra.mxu0 %v5054_v41  ;;  %916 = vmatpush1.msra.mxu1 %v5110_v60 }
 0x14e   :  { %846 = vmatprep.subr.mxu0 %v5060_v43  ;;  %917 = vmatprep.subr.mxu1 %v6773_v5  ;;  %v5335_v5 = vld [vmem:[#allocation5 + $0x1d0] sm:$0xff] }
 0x14f   :  { %847 = vmatpush1.msra.mxu0 %v6774_v8  ;;  %918 = vmatpush1.msra.mxu1 %v6775_v10  ;;  %v5339_v8 = vld [vmem:[#allocation5 + $0x1a8] sm:$0xff]  ;;  %v5341_v10 = vld [vmem:[#allocation5 + $0x1b8] sm:$0xff] }
 0x150   :  { %848 = vmatprep.subr.mxu0 %v6776_v11  ;;  %919 = vmatprep.subr.mxu1 %v6777_v12  ;;  %v5345_v11 = vld [vmem:[#allocation5 + $0x1a0] sm:$0xff]  ;;  %v5347_v12 = vld [vmem:[#allocation5 + $0x1b0] sm:$0xff] }
 0x151   :  { %849 = vmatpush1.msra.mxu0 %v6778_v14  ;;  %920 = vmatpush1.msra.mxu1 %v6779_v16  ;;  %v5351_v14 = vld [vmem:[#allocation5 + $0x188] sm:$0xff]  ;;  %v5353_v16 = vld [vmem:[#allocation5 + $0x198] sm:$0xff] }
 0x152   :  { %850 = vmatprep.subr.mxu0 %v6780_v17  ;;  %921 = vmatprep.subr.mxu1 %v6781_v18  ;;  %v5357_v17 = vld [vmem:[#allocation5 + $0x180] sm:$0xff]  ;;  %v5359_v18 = vld [vmem:[#allocation5 + $0x190] sm:$0xff] }
 0x153   :  { %851 = vmatpush1.msra.mxu0 %v6782_v19  ;;  %922 = vmatpush1.msra.mxu1 %v6783_v20  ;;  %v5363_v19 = vld [vmem:[#allocation5 + $0x168] sm:$0xff]  ;;  %v5365_v20 = vld [vmem:[#allocation5 + $0x178] sm:$0xff] }
 0x154   :  { %852 = vmatprep.subr.mxu0 %v6784_v21  ;;  %923 = vmatprep.subr.mxu1 %v6785_v22  ;;  %v5369_v21 = vld [vmem:[#allocation5 + $0x160] sm:$0xff]  ;;  %v5371_v22 = vld [vmem:[#allocation5 + $0x170] sm:$0xff] }
 0x155   :  { %853 = vmatpush1.msra.mxu0 %v6786_v23  ;;  %924 = vmatpush1.msra.mxu1 %v6787_v24  ;;  %v5375_v23 = vld [vmem:[#allocation5 + $0x148] sm:$0xff]  ;;  %v5377_v24 = vld [vmem:[#allocation5 + $0x158] sm:$0xff] }
 0x156   :  { %854 = vmatprep.subr.mxu0 %v6788_v25  ;;  %925 = vmatprep.subr.mxu1 %v6789_v26  ;;  %v5381_v25 = vld [vmem:[#allocation5 + $0x140] sm:$0xff]  ;;  %v5383_v26 = vld [vmem:[#allocation5 + $0x150] sm:$0xff] }
 0x157   :  { %855 = vmatpush1.msra.mxu0 %v6790_v27  ;;  %888 = vmatprep.mubr.f32.mxu0 %v6791_v28  ;;  %v5387_v27 = vld [vmem:[#allocation5 + $0x128] sm:$0xff] }
 0x158   :  { %926 = vmatpush1.msra.mxu1 %v6792_v29  ;;  %959 = vmatprep.mubr.f32.mxu1 %v6791_v28  ;;  %v5389_v29 = vld [vmem:[#allocation5 + $0x138] sm:$0xff] }
 0x159   :  { %1075 = vmatprep.subr.mxu0 %v5315_v9  ;;  %1146 = vmatprep.subr.mxu1 %v5317_v4 }
 0x1f8   :  { %v639_v30 = vpop.f32.mrf.mxu0  ;;  %v710_v33 = vpop.f32.mrf.mxu1 }
 0x1f9   :  { %v719_v31 = vrot.slane %v639_v30, 6  ;;  %v721_v39 = vrot.slane %v710_v33, 6  ;;  %v5393_v30 = vld [vmem:[#allocation5 + $0x120] sm:$0xff]  ;;  %v5401_v33 = vld [vmem:[#allocation5 + $0x118] sm:$0xff] }
 0x1fa   :  { %v641_v34 = vpop.f32.mrf.mxu0  ;;  %v712_v43 = vpop.f32.mrf.mxu1 }
 0x1fb   :  { %v727_v35 = vadd.f32 %v719_v31, %v505_v32  ;;  %v720_v36 = vrot.slane %v641_v34, 6  ;;  %v729_v44 = vadd.f32 %v721_v39, %v507_v42  ;;  %v722_v46 = vrot.slane %v712_v43, 6  ;;  %v5395_v31 = vld [vmem:[#allocation5 + $0x130] sm:$0xff]  ;;  %v5399_v32 = vld [vmem:[#allocation5 + $0x108] sm:$0xff]  ;;  %v5403_v34 = vld [vmem:[#allocation5 + $0x100] sm:$0xff] }
 0x1fc   :  { %v5417_v39 = vld [vmem:[#allocation5 + $0xf0] sm:$0xff]  ;;  %v5425_v42 = vld [vmem:[#allocation5 + $0xc0] sm:$0xff] }
 0x1fd   :  { %v731_v38 = vmul.f32 0.5, %v727_v35  ;;  %v728_v40 = vadd.f32 %v720_v36, %v506_v37  ;;  %v730_v50 = vadd.f32 %v722_v46, %v508_v48  ;;  %v5407_v35 = vld [vmem:[#allocation5 + $0x110] sm:$0xff]  ;;  %v5409_v36 = vld [vmem:[#allocation5 + $0xe8] sm:$0xff]  ;;  %v5411_v37 = vld [vmem:[#allocation5 + $0xf8] sm:$0xff] }
 0x1fe   :  { %v5427_v43 = vld [vmem:[#allocation5 + $0xd0] sm:$0xff]  ;;  %v5433_v46 = vld [vmem:[#allocation5 + $0xb8] sm:$0xff]  ;;  %v5437_v48 = vld [vmem:[#allocation5 + $0xa0] sm:$0xff] }
 0x1ff   :  { %4649 = vtanh.f32 %v731_v38  ;;  %v735_v41 = vmul.f32 0.5, %v728_v40  ;;  %v740_v52 = vmul.f32 0.5, %v730_v50  ;;  %v5415_v38 = vld [vmem:[#allocation5 + $0xe0] sm:$0xff]  ;;  %v5419_v40 = vld [vmem:[#allocation5 + $0xc8] sm:$0xff]  ;;  %v5439_v50 = vld [vmem:[#allocation5 + $0xb0] sm:$0xff] }
 0x201   :  { %4651 = vtanh.f32 %v735_v41  ;;  %v5423_v41 = vld [vmem:[#allocation5 + $0xd8] sm:$0xff] }
 0x202   :  { %4653 = vtanh.f32 %v729_v44  ;;  %v5431_v44 = vld [vmem:[#allocation5 + $0xa8] sm:$0xff] }
 0x203   :  { %4655 = vtanh.f32 %v740_v52  ;;  %v5443_v52 = vld [vmem:[#allocation5 + $0x88] sm:$0xff] }
 0x204   :  { %6795 = vst [vmem:[#allocation22_spill] sm:$0xff] %v5443_v52 }
 0x20c   :  { %v4650_v54 = vpop.eup %4649 }
 0x20d   :  { %v733_v56 = vmul.f32 0.5, %v4650_v54  ;;  %v5445_v54 = vld [vmem:[#allocation5 + $0x98] sm:$0xff] }
 0x20e   :  { %v4652_v58 = vpop.eup %4651  ;;  %6796 = vst [vmem:[#allocation13_spill] sm:$0xff] %v5445_v54 }
 0x20f   :  { %v734_v60 = vadd.f32 0.5, %v733_v56  ;;  %v737_v6 = vmul.f32 0.5, %v4652_v58  ;;  %v4654_v61 = vpop.eup %4653  ;;  %v5449_v56 = vld [vmem:[#allocation5 + $0x80] sm:$0xff]  ;;  %v5451_v58 = vld [vmem:[#allocation5 + $0x90] sm:$0xff] }
 0x210   :  { %v4656_v51 = vpop.eup %4655  ;;  %6797 = vst [vmem:[#allocation23_spill] sm:$0xff] %v5449_v56  ;;  %6798 = vst [vmem:[#allocation14_spill] sm:$0xff] %v5451_v58 }
 0x211   :  { %v738_v47 = vadd.f32 0.5, %v737_v6  ;;  %v748_v13 = vmul.f32 %v4654_v61, %v734_v60  ;;  %v742_v53 = vmul.f32 0.5, %v4656_v51  ;;  %v5455_v60 = vld [vmem:[#allocation5 + $0x68] sm:$0xff]  ;;  %v5457_v6 = vld [vmem:[#allocation5 + $0x78] sm:$0xff]  ;;  %v5475_v51 = vld [vmem:[#allocation5 + $0x50] sm:$0xff] }
 0x212   :  { %6799 = vst [vmem:[#allocation24_spill] sm:$0xff] %v5455_v60  ;;  %6800 = vst [vmem:[#allocation15_spill] sm:$0xff] %v5457_v6  ;;  %v5467_v61 = vld [vmem:[#allocation5 + $0x48] sm:$0xff] }
 0x213   :  { %v747_v63 = vmul.f32 %v745_v59, %v738_v47  ;;  %v743_v45 = vadd.f32 0.5, %v742_v53  ;;  %v5461_v47 = vld [vmem:[#allocation5 + $0x60] sm:$0xff]  ;;  %v5463_v59 = vld [vmem:[#allocation5 + $0x70] sm:$0xff]  ;;  %6803 = vst [vmem:[#allocation26_spill] sm:$0xff] %v5467_v61  ;;  %6806 = vst [vmem:[#allocation18_spill] sm:$0xff] %v5475_v51 }
 0x214   :  { %6801 = vst [vmem:[#allocation25_spill] sm:$0xff] %v5461_v47  ;;  %6802 = vst [vmem:[#allocation16_spill] sm:$0xff] %v5463_v59  ;;  %v5479_v53 = vld [vmem:[#allocation5 + $0x28] sm:$0xff] }
 0x215   :  { %v5310_v55 = vadd.f32 %v748_v13, %v747_v63  ;;  %v5469_v63 = vld [vmem:[#allocation5 + $0x58] sm:$0xff]  ;;  %v5473_v13 = vld [vmem:[#allocation5 + $0x40] sm:$0xff]  ;;  %6807 = vst [vmem:[#allocation28_spill] sm:$0xff] %v5479_v53 }
 0x216   :  { %6804 = vst [vmem:[#allocation17_spill] sm:$0xff] %v5469_v63  ;;  %6805 = vst [vmem:[#allocation27_spill] sm:$0xff] %v5473_v13 }
 0x217   :  { %4657 = vtanh.f32 %v5310_v55 }
 0x224   :  { %v4658_v62 = vpop.eup %4657 }
 0x225   :  { %v751_v2 = vmul.f32 %v4658_v62, %v743_v45  ;;  %v5481_v45 = vld [vmem:[#allocation5 + $0x38] sm:$0xff]  ;;  %v5485_v62 = vld [vmem:[#allocation5 + $0x20] sm:$0xff] }
 0x226   :  { %6808 = vst [vmem:[#allocation19_spill] sm:$0xff] %v5481_v45  ;;  %6809 = vst [vmem:[#allocation29_spill] sm:$0xff] %v5485_v62 }
 0x227   :  { %752 = vst [vmem:[#allocation3] sm:$0xc] %v751_v2  ;;  %v822_v15 = vrot.slane %v751_v2, 2  ;;  %v5487_v2 = vld [vmem:[#allocation5 + $0x30] sm:$0xff] }
 0x228   :  { %6810 = vst [vmem:[#allocation20_spill] sm:$0xff] %v5487_v2 }
 0x229   :  { %889 = vmatmul.mubr.f32.vlgmr.msra.gmra.mxu0 %v822_v15  ;;  %960 = vmatmul.mubr.f32.vlgmr.msra.gmra.mxu1 %v822_v15  ;;  %v5491_v15 = vld [vmem:[#allocation5 + $0x8] sm:$0xff] }
 0x22a   :  { %1139 = vmatprep.mubr.f32.mxu0 %v6791_v28  ;;  %1210 = vmatprep.mubr.f32.mxu1 %v6791_v28  ;;  %6811 = vst [vmem:[#allocation30_spill] sm:$0xff] %v5491_v15  ;;  %v5497_v28 = vld [vmem:[#allocation5] sm:$0xff] }
 0x22b   :  { %1076 = vmatpush1.msra.mxu0 %v5321_v49  ;;  %1147 = vmatpush1.msra.mxu1 %v5323_v3  ;;  %6813 = vst [vmem:[#allocation33_spill] sm:$0xff] %v5497_v28 }
 0x22c   :  { %1077 = vmatprep.subr.mxu0 %v5327_v7  ;;  %1148 = vmatprep.subr.mxu1 %v5329_v1 }
 0x22d   :  { %1078 = vmatpush1.msra.mxu0 %v5333_v0  ;;  %1149 = vmatpush1.msra.mxu1 %v5335_v5 }
 0x22e   :  { %1079 = vmatprep.subr.mxu0 %v5339_v8  ;;  %1150 = vmatprep.subr.mxu1 %v5341_v10 }
 0x22f   :  { %1080 = vmatpush1.msra.mxu0 %v5345_v11  ;;  %1151 = vmatpush1.msra.mxu1 %v5347_v12 }
 0x230   :  { %1081 = vmatprep.subr.mxu0 %v5351_v14  ;;  %1152 = vmatprep.subr.mxu1 %v5353_v16 }
 0x231   :  { %1082 = vmatpush1.msra.mxu0 %v5357_v17  ;;  %1153 = vmatpush1.msra.mxu1 %v5359_v18 }
 0x232   :  { %1083 = vmatprep.subr.mxu0 %v5363_v19  ;;  %1154 = vmatprep.subr.mxu1 %v5365_v20 }
 0x233   :  { %1084 = vmatpush1.msra.mxu0 %v5369_v21  ;;  %1155 = vmatpush1.msra.mxu1 %v5371_v22 }
 0x234   :  { %1085 = vmatprep.subr.mxu0 %v5375_v23  ;;  %1156 = vmatprep.subr.mxu1 %v5377_v24 }
 0x235   :  { %1086 = vmatpush1.msra.mxu0 %v5381_v25  ;;  %1157 = vmatpush1.msra.mxu1 %v5383_v26 }
 0x236   :  { %1087 = vmatprep.subr.mxu0 %v5387_v27  ;;  %1158 = vmatprep.subr.mxu1 %v5389_v29 }
 0x237   :  { %1088 = vmatpush1.msra.mxu0 %v5393_v30  ;;  %1159 = vmatpush1.msra.mxu1 %v5395_v31 }
 0x238   :  { %1089 = vmatprep.subr.mxu0 %v5399_v32  ;;  %1160 = vmatprep.subr.mxu1 %v5401_v33 }
 0x239   :  { %1090 = vmatpush1.msra.mxu0 %v5403_v34  ;;  %1161 = vmatpush1.msra.mxu1 %v5407_v35 }
 0x23a   :  { %1091 = vmatprep.subr.mxu0 %v5409_v36  ;;  %1162 = vmatprep.subr.mxu1 %v5411_v37 }
 0x23b   :  { %1092 = vmatpush1.msra.mxu0 %v5415_v38  ;;  %1163 = vmatpush1.msra.mxu1 %v5417_v39 }
 0x23c   :  { %1093 = vmatprep.subr.mxu0 %v5419_v40  ;;  %1164 = vmatprep.subr.mxu1 %v5423_v41 }
 0x23d   :  { %1094 = vmatpush1.msra.mxu0 %v5425_v42  ;;  %1165 = vmatpush1.msra.mxu1 %v5427_v43 }
 0x23e   :  { %1095 = vmatprep.subr.mxu0 %v5431_v44  ;;  %1166 = vmatprep.subr.mxu1 %v5433_v46 }
 0x23f   :  { %1096 = vmatpush1.msra.mxu0 %v5437_v48  ;;  %1167 = vmatpush1.msra.mxu1 %v5439_v50 }
 0x240   :  { %1097 = vmatprep.subr.mxu0 %v5443_v52  ;;  %1168 = vmatprep.subr.mxu1 %v5445_v54 }
 0x241   :  { %1098 = vmatpush1.msra.mxu0 %v5449_v56  ;;  %1169 = vmatpush1.msra.mxu1 %v5451_v58 }
 0x242   :  { %1099 = vmatprep.subr.mxu0 %v5455_v60  ;;  %1170 = vmatprep.subr.mxu1 %v5457_v6 }
 0x243   :  { %1100 = vmatpush1.msra.mxu0 %v5461_v47  ;;  %1171 = vmatpush1.msra.mxu1 %v5463_v59 }
 0x244   :  { %1101 = vmatprep.subr.mxu0 %v5467_v61  ;;  %1172 = vmatprep.subr.mxu1 %v5469_v63  ;;  %v5499_v61 = vld [vmem:[#allocation5 + $0x10] sm:$0xff] }
 0x245   :  { %1102 = vmatpush1.msra.mxu0 %v5473_v13  ;;  %1173 = vmatpush1.msra.mxu1 %v5475_v51  ;;  %6814 = vst [vmem:[#allocation34_spill] sm:$0xff] %v5499_v61  ;;  %v753_v51 = vld [vmem:[#allocation2 + $0x30] sm:$0x30] }
 0x246   :  { %1103 = vmatprep.subr.mxu0 %v5479_v53  ;;  %1174 = vmatprep.subr.mxu1 %v5481_v45 }
 0x247   :  { %1104 = vmatpush1.msra.mxu0 %v5485_v62  ;;  %1175 = vmatpush1.msra.mxu1 %v5487_v2  ;;  %v754_v2 = vld [vmem:[#allocation2] sm:$0x30] }
 0x248   :  { %1105 = vmatprep.subr.mxu0 %v5491_v15  ;;  %1176 = vmatprep.subr.mxu1 %v5493_v57 }
 0x249   :  { %1106 = vmatpush1.msra.mxu0 %v5497_v28  ;;  %1177 = vmatpush1.msra.mxu1 %v5499_v61  ;;  %v755_v28 = vld [vmem:[#allocation2 + $0x18] sm:$0x30] }
 0x24a   :  { %1326 = vmatprep.subr.mxu0 %v5315_v9  ;;  %1397 = vmatprep.subr.mxu1 %v5317_v4  ;;  %v756_v4 = vld [vmem:[#allocation2 + $0x10] sm:$0x30] }
 0x2e9   :  { %v890_v45 = vpop.f32.mrf.mxu0  ;;  %v961_v13 = vpop.f32.mrf.mxu1 }
 0x2ea   :  { %v970_v53 = vrot.slane %v890_v45, 4  ;;  %v972_v15 = vrot.slane %v961_v13, 4 }
 0x2eb   :  { %v892_v63 = vpop.f32.mrf.mxu0  ;;  %v963_v60 = vpop.f32.mrf.mxu1 }
 0x2ec   :  { %v978_v62 = vadd.f32 %v970_v53, %v753_v51  ;;  %v971_v59 = vrot.slane %v892_v63, 4  ;;  %v980_v61 = vadd.f32 %v972_v15, %v755_v28  ;;  %v973_v9 = vrot.slane %v963_v60, 4  ;;  %v6818_v60 = vld [vmem:[#allocation14_spill] sm:$0xff]  ;;  %v6821_v15 = vld [vmem:[#allocation25_spill] sm:$0xff] }
 0x2ee   :  { %v982_v47 = vmul.f32 0.5, %v978_v62  ;;  %v979_v6 = vadd.f32 %v971_v59, %v754_v2  ;;  %v981_v58 = vadd.f32 %v973_v9, %v756_v4  ;;  %v996_v59 = vrot.slane %v5310_v55, 6  ;;  %v6815_v55 = vld [vmem:[#allocation22_spill] sm:$0xff]  ;;  %v6820_v2 = vld [vmem:[#allocation15_spill] sm:$0xff] }
 0x2f0   :  { %4659 = vtanh.f32 %v982_v47  ;;  %v986_v57 = vmul.f32 0.5, %v979_v6  ;;  %v991_v45 = vmul.f32 0.5, %v981_v58 }
 0x2f2   :  { %4661 = vtanh.f32 %v986_v57 }
 0x2f3   :  { %4663 = vtanh.f32 %v980_v61  ;;  %v6819_v61 = vld [vmem:[#allocation24_spill] sm:$0xff] }
 0x2f4   :  { %4665 = vtanh.f32 %v991_v45  ;;  %v6822_v45 = vld [vmem:[#allocation16_spill] sm:$0xff] }
 0x2fd   :  { %v4660_v56 = vpop.eup %4659 }
 0x2fe   :  { %v984_v54 = vmul.f32 0.5, %v4660_v56 }
 0x2ff   :  { %v4662_v52 = vpop.eup %4661 }
 0x300   :  { %v985_v51 = vadd.f32 0.5, %v984_v54  ;;  %v988_v63 = vmul.f32 0.5, %v4662_v52  ;;  %v4664_v47 = vpop.eup %4663  ;;  %v6816_v52 = vld [vmem:[#allocation13_spill] sm:$0xff]  ;;  %v6817_v54 = vld [vmem:[#allocation23_spill] sm:$0xff] }
 0x301   :  { %v4666_v57 = vpop.eup %4665 }
 0x302   :  { %v989_v53 = vadd.f32 0.5, %v988_v63  ;;  %v999_v13 = vmul.f32 %v4664_v47, %v985_v51  ;;  %v993_v28 = vmul.f32 0.5, %v4666_v57  ;;  %v6823_v51 = vld [vmem:[#allocation26_spill] sm:$0xff]  ;;  %v6824_v63 = vld [vmem:[#allocation17_spill] sm:$0xff]  ;;  %v6827_v47 = vld [vmem:[#allocation28_spill] sm:$0xff] }
 0x303   :  { %v6830_v57 = vld [vmem:[#allocation20_spill] sm:$0xff] }
 0x304   :  { %v998_v6 = vmul.f32 %v996_v59, %v989_v53  ;;  %v994_v9 = vadd.f32 0.5, %v993_v28  ;;  %v6825_v53 = vld [vmem:[#allocation27_spill] sm:$0xff]  ;;  %v6826_v59 = vld [vmem:[#allocation18_spill] sm:$0xff] }
 0x305   :  { %v6831_v28 = vld [vmem:[#allocation30_spill] sm:$0xff] }
 0x306   :  { %v5510_v62 = vadd.f32 %v999_v13, %v998_v6  ;;  %v6828_v6 = vld [vmem:[#allocation19_spill] sm:$0xff]  ;;  %v6829_v13 = vld [vmem:[#allocation29_spill] sm:$0xff] }
 0x308   :  { %4667 = vtanh.f32 %v5510_v62 }
 0x315   :  { %v4668_v4 = vpop.eup %4667 }
 0x316   :  { %v1002_v58 = vmul.f32 %v4668_v4, %v994_v9  ;;  %v6832_v9 = vld [vmem:[#allocation32_spill] sm:$0xff]  ;;  %v6833_v4 = vld [vmem:[#allocation33_spill] sm:$0xff] }
 0x318   :  { %1003 = vst [vmem:[#allocation3] sm:$0x30] %v1002_v58  ;;  %v1073_v56 = vrot.slane %v1002_v58, 4  ;;  %v6834_v58 = vmov 0.0  }
 0x31a   :  { %1140 = vmatmul.mubr.f32.vlgmr.msra.gmra.mxu0 %v1073_v56  ;;  %1211 = vmatmul.mubr.f32.vlgmr.msra.gmra.mxu1 %v1073_v56  ;;  %v6835_v56 = vld [vmem:[#allocation34_spill] sm:$0xff] }
 0x31b   :  { %1327 = vmatpush1.msra.mxu0 %v5321_v49  ;;  %1398 = vmatpush1.msra.mxu1 %v5323_v3 }
 0x31c   :  { %1328 = vmatprep.subr.mxu0 %v5327_v7  ;;  %1399 = vmatprep.subr.mxu1 %v5329_v1 }
 0x31d   :  { %1329 = vmatpush1.msra.mxu0 %v5333_v0  ;;  %1400 = vmatpush1.msra.mxu1 %v5335_v5 }
 0x31e   :  { %1330 = vmatprep.subr.mxu0 %v5339_v8  ;;  %1401 = vmatprep.subr.mxu1 %v5341_v10 }
 0x31f   :  { %1331 = vmatpush1.msra.mxu0 %v5345_v11  ;;  %1402 = vmatpush1.msra.mxu1 %v5347_v12 }
 0x320   :  { %1332 = vmatprep.subr.mxu0 %v5351_v14  ;;  %1403 = vmatprep.subr.mxu1 %v5353_v16 }
 0x321   :  { %1333 = vmatpush1.msra.mxu0 %v5357_v17  ;;  %1404 = vmatpush1.msra.mxu1 %v5359_v18 }
 0x322   :  { %1334 = vmatprep.subr.mxu0 %v5363_v19  ;;  %1405 = vmatprep.subr.mxu1 %v5365_v20 }
 0x323   :  { %1335 = vmatpush1.msra.mxu0 %v5369_v21  ;;  %1406 = vmatpush1.msra.mxu1 %v5371_v22 }
 0x324   :  { %1336 = vmatprep.subr.mxu0 %v5375_v23  ;;  %1407 = vmatprep.subr.mxu1 %v5377_v24 }
 0x325   :  { %1337 = vmatpush1.msra.mxu0 %v5381_v25  ;;  %1408 = vmatpush1.msra.mxu1 %v5383_v26 }
 0x326   :  { %1338 = vmatprep.subr.mxu0 %v5387_v27  ;;  %1409 = vmatprep.subr.mxu1 %v5389_v29 }
 0x327   :  { %1339 = vmatpush1.msra.mxu0 %v5393_v30  ;;  %1410 = vmatpush1.msra.mxu1 %v5395_v31 }
 0x328   :  { %1340 = vmatprep.subr.mxu0 %v5399_v32  ;;  %1411 = vmatprep.subr.mxu1 %v5401_v33 }
 0x329   :  { %1341 = vmatpush1.msra.mxu0 %v5403_v34  ;;  %1412 = vmatpush1.msra.mxu1 %v5407_v35 }
 0x32a   :  { %1342 = vmatprep.subr.mxu0 %v5409_v36  ;;  %1413 = vmatprep.subr.mxu1 %v5411_v37 }
 0x32b   :  { %1343 = vmatpush1.msra.mxu0 %v5415_v38  ;;  %1414 = vmatpush1.msra.mxu1 %v5417_v39 }
 0x32c   :  { %1344 = vmatprep.subr.mxu0 %v5419_v40  ;;  %1415 = vmatprep.subr.mxu1 %v5423_v41 }
 0x32d   :  { %1345 = vmatpush1.msra.mxu0 %v5425_v42  ;;  %1416 = vmatpush1.msra.mxu1 %v5427_v43 }
 0x32e   :  { %1346 = vmatprep.subr.mxu0 %v5431_v44  ;;  %1417 = vmatprep.subr.mxu1 %v5433_v46 }
 0x32f   :  { %1347 = vmatpush1.msra.mxu0 %v5437_v48  ;;  %1418 = vmatpush1.msra.mxu1 %v5439_v50 }
 0x330   :  { %1348 = vmatprep.subr.mxu0 %v6815_v55  ;;  %1419 = vmatprep.subr.mxu1 %v6816_v52 }
 0x331   :  { %1349 = vmatpush1.msra.mxu0 %v6817_v54  ;;  %1420 = vmatpush1.msra.mxu1 %v6818_v60 }
 0x332   :  { %1350 = vmatprep.subr.mxu0 %v6819_v61  ;;  %1421 = vmatprep.subr.mxu1 %v6820_v2 }
 0x333   :  { %1351 = vmatpush1.msra.mxu0 %v6821_v15  ;;  %1422 = vmatpush1.msra.mxu1 %v6822_v45 }
 0x334   :  { %1352 = vmatprep.subr.mxu0 %v6823_v51  ;;  %1423 = vmatprep.subr.mxu1 %v6824_v63 }
 0x335   :  { %1353 = vmatpush1.msra.mxu0 %v6825_v53  ;;  %1424 = vmatpush1.msra.mxu1 %v6826_v59  ;;  %v6836_v59 = vld [vmem:[#allocation21_spill] sm:$0xff]  ;;  %v1004_v53 = vld [vmem:[#allocation2 + $0x30] sm:$0xc0] }
 0x336   :  { %1354 = vmatprep.subr.mxu0 %v6827_v47  ;;  %1425 = vmatprep.subr.mxu1 %v6828_v6  ;;  %v6837_v47 = vld [vmem:[#allocation12_spill] sm:$0xff] }
 0x337   :  { %1355 = vmatpush1.msra.mxu0 %v6829_v13  ;;  %1426 = vmatpush1.msra.mxu1 %v6830_v57 }
 0x338   :  { %1356 = vmatprep.subr.mxu0 %v6831_v28  ;;  %1427 = vmatprep.subr.mxu1 %v6832_v9  ;;  %v1005_v9 = vld [vmem:[#allocation2] sm:$0xc0] }
 0x339   :  { %1357 = vmatpush1.msra.mxu0 %v6833_v4  ;;  %1390 = vmatprep.mubr.f32.mxu0 %v6834_v58 }
 0x33a   :  { %1428 = vmatpush1.msra.mxu1 %v6835_v56  ;;  %1461 = vmatprep.mubr.f32.mxu1 %v6834_v58  ;;  %v1006_v56 = vld [vmem:[#allocation2 + $0x18] sm:$0xc0] }
 0x33b   :  { %1562 = vmatprep.subr.mxu0 %v6836_v59  ;;  %1633 = vmatprep.subr.mxu1 %v6837_v47  ;;  %v1007_v47 = vld [vmem:[#allocation2 + $0x10] sm:$0xc0] }
 0x3da   :  { %v1141_v6 = vpop.f32.mrf.mxu0  ;;  %v1212_v57 = vpop.f32.mrf.mxu1 }
 0x3db   :  { %v1221_v13 = vrot.slane %v1141_v6, 2  ;;  %v1223_v4 = vrot.slane %v1212_v57, 2 }
 0x3dc   :  { %v1143_v63 = vpop.f32.mrf.mxu0  ;;  %v1214_v61 = vpop.f32.mrf.mxu1 }
 0x3dd   :  { %v1229_v28 = vadd.f32 %v1221_v13, %v1004_v53  ;;  %v1222_v51 = vrot.slane %v1143_v63, 2  ;;  %v1231_v58 = vadd.f32 %v1223_v4, %v1006_v56  ;;  %v1224_v59 = vrot.slane %v1214_v61, 2  ;;  %v6842_v4 = vld [vmem:[#allocation24_spill] sm:$0xff]  ;;  %v6844_v56 = vld [vmem:[#allocation25_spill] sm:$0xff] }
 0x3df   :  { %v1233_v45 = vmul.f32 0.5, %v1229_v28  ;;  %v1230_v15 = vadd.f32 %v1222_v51, %v1005_v9  ;;  %v1232_v60 = vadd.f32 %v1224_v59, %v1007_v47  ;;  %v1247_v51 = vrot.slane %v5510_v62, 6  ;;  %v6838_v62 = vld [vmem:[#allocation22_spill] sm:$0xff] }
 0x3e0   :  { %v6841_v9 = vld [vmem:[#allocation14_spill] sm:$0xff] }
 0x3e1   :  { %4669 = vtanh.f32 %v1233_v45  ;;  %v1237_v2 = vmul.f32 0.5, %v1230_v15  ;;  %v1242_v6 = vmul.f32 0.5, %v1232_v60 }
 0x3e3   :  { %4671 = vtanh.f32 %v1237_v2 }
 0x3e4   :  { %4673 = vtanh.f32 %v1231_v58  ;;  %v6843_v58 = vld [vmem:[#allocation15_spill] sm:$0xff] }
 0x3e5   :  { %4675 = vtanh.f32 %v1242_v6  ;;  %v6845_v6 = vld [vmem:[#allocation16_spill] sm:$0xff] }
 0x3ee   :  { %v4670_v54 = vpop.eup %4669 }
 0x3ef   :  { %v1235_v52 = vmul.f32 0.5, %v4670_v54 }
 0x3f0   :  { %v4672_v55 = vpop.eup %4671 }
 0x3f1   :  { %v1236_v53 = vadd.f32 0.5, %v1235_v52  ;;  %v1239_v63 = vmul.f32 0.5, %v4672_v55  ;;  %v4674_v45 = vpop.eup %4673  ;;  %v6839_v55 = vld [vmem:[#allocation13_spill] sm:$0xff]  ;;  %v6840_v52 = vld [vmem:[#allocation23_spill] sm:$0xff] }
 0x3f2   :  { %v4676_v61 = vpop.eup %4675 }
 0x3f3   :  { %v1240_v13 = vadd.f32 0.5, %v1239_v63  ;;  %v1250_v57 = vmul.f32 %v4674_v45, %v1236_v53  ;;  %v1244_v2 = vmul.f32 0.5, %v4676_v61  ;;  %v6846_v53 = vld [vmem:[#allocation26_spill] sm:$0xff]  ;;  %v6847_v63 = vld [vmem:[#allocation17_spill] sm:$0xff]  ;;  %v6850_v45 = vld [vmem:[#allocation28_spill] sm:$0xff] }
 0x3f4   :  { %v6853_v61 = vld [vmem:[#allocation20_spill] sm:$0xff] }
 0x3f5   :  { %v1249_v15 = vmul.f32 %v1247_v51, %v1240_v13  ;;  %v1245_v59 = vadd.f32 0.5, %v1244_v2  ;;  %v6848_v13 = vld [vmem:[#allocation27_spill] sm:$0xff]  ;;  %v6849_v51 = vld [vmem:[#allocation18_spill] sm:$0xff] }
 0x3f6   :  { %v6854_v2 = vld [vmem:[#allocation30_spill] sm:$0xff] }
 0x3f7   :  { %v5580_v28 = vadd.f32 %v1250_v57, %v1249_v15  ;;  %v6851_v15 = vld [vmem:[#allocation19_spill] sm:$0xff]  ;;  %v6852_v57 = vld [vmem:[#allocation29_spill] sm:$0xff] }
 0x3f9   :  { %4677 = vtanh.f32 %v5580_v28 }
 0x406   :  { %v4678_v60 = vpop.eup %4677 }
 0x407   :  { %v1253_v47 = vmul.f32 %v4678_v60, %v1245_v59  ;;  %v6855_v59 = vld [vmem:[#allocation32_spill] sm:$0xff]  ;;  %v6856_v60 = vld [vmem:[#allocation33_spill] sm:$0xff] }
 0x409   :  { %1254 = vst [vmem:[#allocation3] sm:$0xc0] %v1253_v47  ;;  %v1324_v54 = vrot.slane %v1253_v47, 6  ;;  %v6857_v47 = vmov 0.0  }
 0x40b   :  { %1391 = vmatmul.mubr.f32.vlgmr.msra.gmra.mxu0 %v1324_v54  ;;  %1462 = vmatmul.mubr.f32.vlgmr.msra.gmra.mxu1 %v1324_v54  ;;  %v6858_v54 = vld [vmem:[#allocation34_spill] sm:$0xff] }
 0x40c   :  { %1563 = vmatpush1.msra.mxu0 %v5321_v49  ;;  %1634 = vmatpush1.msra.mxu1 %v5323_v3 }
 0x40d   :  { %1564 = vmatprep.subr.mxu0 %v5327_v7  ;;  %1635 = vmatprep.subr.mxu1 %v5329_v1 }
 0x40e   :  { %1565 = vmatpush1.msra.mxu0 %v5333_v0  ;;  %1636 = vmatpush1.msra.mxu1 %v5335_v5 }
 0x40f   :  { %1566 = vmatprep.subr.mxu0 %v5339_v8  ;;  %1637 = vmatprep.subr.mxu1 %v5341_v10 }
 0x410   :  { %1567 = vmatpush1.msra.mxu0 %v5345_v11  ;;  %1638 = vmatpush1.msra.mxu1 %v5347_v12 }
 0x411   :  { %1568 = vmatprep.subr.mxu0 %v5351_v14  ;;  %1639 = vmatprep.subr.mxu1 %v5353_v16 }
 0x412   :  { %1569 = vmatpush1.msra.mxu0 %v5357_v17  ;;  %1640 = vmatpush1.msra.mxu1 %v5359_v18 }
 0x413   :  { %1570 = vmatprep.subr.mxu0 %v5363_v19  ;;  %1641 = vmatprep.subr.mxu1 %v5365_v20 }
 0x414   :  { %1571 = vmatpush1.msra.mxu0 %v5369_v21  ;;  %1642 = vmatpush1.msra.mxu1 %v5371_v22 }
 0x415   :  { %1572 = vmatprep.subr.mxu0 %v5375_v23  ;;  %1643 = vmatprep.subr.mxu1 %v5377_v24 }
 0x416   :  { %1573 = vmatpush1.msra.mxu0 %v5381_v25  ;;  %1644 = vmatpush1.msra.mxu1 %v5383_v26 }
 0x417   :  { %1574 = vmatprep.subr.mxu0 %v5387_v27  ;;  %1645 = vmatprep.subr.mxu1 %v5389_v29 }
 0x418   :  { %1575 = vmatpush1.msra.mxu0 %v5393_v30  ;;  %1646 = vmatpush1.msra.mxu1 %v5395_v31 }
 0x419   :  { %1576 = vmatprep.subr.mxu0 %v5399_v32  ;;  %1647 = vmatprep.subr.mxu1 %v5401_v33 }
 0x41a   :  { %1577 = vmatpush1.msra.mxu0 %v5403_v34  ;;  %1648 = vmatpush1.msra.mxu1 %v5407_v35 }
 0x41b   :  { %1578 = vmatprep.subr.mxu0 %v5409_v36  ;;  %1649 = vmatprep.subr.mxu1 %v5411_v37 }
 0x41c   :  { %1579 = vmatpush1.msra.mxu0 %v5415_v38  ;;  %1650 = vmatpush1.msra.mxu1 %v5417_v39 }
 0x41d   :  { %1580 = vmatprep.subr.mxu0 %v5419_v40  ;;  %1651 = vmatprep.subr.mxu1 %v5423_v41 }
 0x41e   :  { %1581 = vmatpush1.msra.mxu0 %v5425_v42  ;;  %1652 = vmatpush1.msra.mxu1 %v5427_v43 }
 0x41f   :  { %1582 = vmatprep.subr.mxu0 %v5431_v44  ;;  %1653 = vmatprep.subr.mxu1 %v5433_v46 }
 0x420   :  { %1583 = vmatpush1.msra.mxu0 %v5437_v48  ;;  %1654 = vmatpush1.msra.mxu1 %v5439_v50 }
 0x421   :  { %1584 = vmatprep.subr.mxu0 %v6838_v62  ;;  %1655 = vmatprep.subr.mxu1 %v6839_v55 }
 0x422   :  { %1585 = vmatpush1.msra.mxu0 %v6840_v52  ;;  %1656 = vmatpush1.msra.mxu1 %v6841_v9 }
 0x423   :  { %1586 = vmatprep.subr.mxu0 %v6842_v4  ;;  %1657 = vmatprep.subr.mxu1 %v6843_v58 }
 0x424   :  { %1587 = vmatpush1.msra.mxu0 %v6844_v56  ;;  %1658 = vmatpush1.msra.mxu1 %v6845_v6  ;;  %v1257_v6 = vld [vmem:[#allocation2 + $0x28] sm:$0x3] }
 0x425   :  { %1588 = vmatprep.subr.mxu0 %v6846_v53  ;;  %1659 = vmatprep.subr.mxu1 %v6847_v63 }
 0x426   :  { %1589 = vmatpush1.msra.mxu0 %v6848_v13  ;;  %1660 = vmatpush1.msra.mxu1 %v6849_v51  ;;  %v6859_v51 = vld [vmem:[#allocation21_spill] sm:$0xff] }
 0x427   :  { %1590 = vmatprep.subr.mxu0 %v6850_v45  ;;  %1661 = vmatprep.subr.mxu1 %v6851_v15  ;;  %v6860_v45 = vld [vmem:[#allocation12_spill] sm:$0xff]  ;;  %v1255_v15 = vld [vmem:[#allocation2 + $0x8] sm:$0x3] }
 0x428   :  { %1591 = vmatpush1.msra.mxu0 %v6852_v57  ;;  %1662 = vmatpush1.msra.mxu1 %v6853_v61  ;;  %v1256_v61 = vld [vmem:[#allocation2 + $0x20] sm:$0x3] }
 0x429   :  { %1592 = vmatprep.subr.mxu0 %v6854_v2  ;;  %1663 = vmatprep.subr.mxu1 %v6855_v59 }
 0x42a   :  { %1593 = vmatpush1.msra.mxu0 %v6856_v60  ;;  %1626 = vmatprep.mubr.f32.mxu0 %v6857_v47 }
 0x42b   :  { %1664 = vmatpush1.msra.mxu1 %v6858_v54  ;;  %1697 = vmatprep.mubr.f32.mxu1 %v6857_v47  ;;  %v1258_v47 = vld [vmem:[#allocation2 + $0x38] sm:$0x3] }
 0x42c   :  { %1813 = vmatprep.subr.mxu0 %v6859_v51  ;;  %1884 = vmatprep.subr.mxu1 %v6860_v45 }
 0x4cb   :  { %v1392_v57 = vpop.f32.mrf.mxu0  ;;  %v1463_v59 = vpop.f32.mrf.mxu1 }
 0x4cc   :  { %v1468_v13 = vadd.f32 %v1392_v57, %v1255_v15  ;;  %v1470_v56 = vadd.f32 %v1463_v59, %v1257_v6 }
 0x4cd   :  { %v1394_v63 = vpop.f32.mrf.mxu0  ;;  %v1465_v54 = vpop.f32.mrf.mxu1 }
 0x4ce   :  { %v1472_v2 = vmul.f32 0.5, %v1468_v13  ;;  %v1469_v53 = vadd.f32 %v1394_v63, %v1256_v61  ;;  %v1471_v58 = vadd.f32 %v1465_v54, %v1258_v47  ;;  %v1486_v63 = vrot.slane %v5580_v28, 6 }
 0x4d0   :  { %4679 = vtanh.f32 %v1472_v2  ;;  %v1476_v60 = vmul.f32 0.5, %v1469_v53  ;;  %v1481_v51 = vmul.f32 0.5, %v1471_v58 }
 0x4d2   :  { %4681 = vtanh.f32 %v1476_v60 }
 0x4d3   :  { %4683 = vtanh.f32 %v1470_v56 }
 0x4d4   :  { %4685 = vtanh.f32 %v1481_v51 }
 0x4dd   :  { %v4680_v4 = vpop.eup %4679 }
 0x4de   :  { %v1474_v45 = vmul.f32 0.5, %v4680_v4 }
 0x4df   :  { %v4682_v9 = vpop.eup %4681 }
 0x4e0   :  { %v1475_v52 = vadd.f32 0.5, %v1474_v45  ;;  %v1478_v15 = vmul.f32 0.5, %v4682_v9  ;;  %v4684_v13 = vpop.eup %4683 }
 0x4e1   :  { %v4686_v56 = vpop.eup %4685 }
 0x4e2   :  { %v1479_v57 = vadd.f32 0.5, %v1478_v15  ;;  %v1489_v53 = vmul.f32 %v4684_v13, %v1475_v52  ;;  %v1483_v6 = vmul.f32 0.5, %v4686_v56  ;;  %v2058_v13 = vld [vmem:[#allocation5 + $0x1e8] sm:$0xff] }
 0x4e3   :  { %v2054_v56 = vld [vmem:[#allocation5 + $0x1c8] sm:$0xff] }
 0x4e4   :  { %v1488_v61 = vmul.f32 %v1486_v63, %v1479_v57  ;;  %v1484_v59 = vadd.f32 0.5, %v1483_v6  ;;  %v2056_v6 = vld [vmem:[#allocation5 + $0x1d8] sm:$0xff] }
 0x4e6   :  { %v5650_v2 = vadd.f32 %v1489_v53, %v1488_v61  ;;  %v2060_v61 = vld [vmem:[#allocation5 + $0x1f8] sm:$0xff]  ;;  %v2057_v53 = vld [vmem:[#allocation5 + $0x1e0] sm:$0xff] }
 0x4e8   :  { %4687 = vtanh.f32 %v5650_v2 }
 0x4f5   :  { %v4688_v58 = vpop.eup %4687 }
 0x4f6   :  { %v1492_v60 = vmul.f32 %v4688_v58, %v1484_v59  ;;  %v2053_v59 = vld [vmem:[#allocation5 + $0x1c0] sm:$0xff]  ;;  %v2055_v58 = vld [vmem:[#allocation5 + $0x1d0] sm:$0xff] }
 0x4f8   :  { %1493 = vst [vmem:[#allocation3 + $0x8] sm:$0x3] %v1492_v60  ;;  %1627 = vmatmul.mubr.f32.vlgmr.msra.gmra.mxu0 %v1492_v60  ;;  %1698 = vmatmul.mubr.f32.vlgmr.msra.gmra.mxu1 %v1492_v60  ;;  %v2050_v60 = vld [vmem:[#allocation5 + $0x1a8] sm:$0xff] }
 0x4f9   :  { %1814 = vmatpush1.msra.mxu0 %v5321_v49  ;;  %1885 = vmatpush1.msra.mxu1 %v5323_v3  ;;  %v6861_v49 = vld [vmem:[#allocation23_spill] sm:$0xff]  ;;  %v6862_v3 = vld [vmem:[#allocation14_spill] sm:$0xff] }
 0x4fa   :  { %1815 = vmatprep.subr.mxu0 %v5327_v7  ;;  %1886 = vmatprep.subr.mxu1 %v5329_v1  ;;  %v6863_v7 = vld [vmem:[#allocation24_spill] sm:$0xff]  ;;  %v6864_v1 = vld [vmem:[#allocation15_spill] sm:$0xff] }
 0x4fb   :  { %1816 = vmatpush1.msra.mxu0 %v5333_v0  ;;  %1887 = vmatpush1.msra.mxu1 %v5335_v5  ;;  %v6865_v0 = vld [vmem:[#allocation25_spill] sm:$0xff]  ;;  %v6866_v5 = vld [vmem:[#allocation16_spill] sm:$0xff] }
 0x4fc   :  { %1817 = vmatprep.subr.mxu0 %v5339_v8  ;;  %1888 = vmatprep.subr.mxu1 %v5341_v10  ;;  %v6867_v8 = vld [vmem:[#allocation26_spill] sm:$0xff]  ;;  %v6868_v10 = vld [vmem:[#allocation17_spill] sm:$0xff] }
 0x4fd   :  { %1818 = vmatpush1.msra.mxu0 %v5345_v11  ;;  %1889 = vmatpush1.msra.mxu1 %v5347_v12  ;;  %v6869_v11 = vld [vmem:[#allocation27_spill] sm:$0xff]  ;;  %v6870_v12 = vld [vmem:[#allocation18_spill] sm:$0xff] }
 0x4fe   :  { %1819 = vmatprep.subr.mxu0 %v5351_v14  ;;  %1890 = vmatprep.subr.mxu1 %v5353_v16  ;;  %v6871_v14 = vld [vmem:[#allocation28_spill] sm:$0xff]  ;;  %v6872_v16 = vld [vmem:[#allocation19_spill] sm:$0xff] }
 0x4ff   :  { %1820 = vmatpush1.msra.mxu0 %v5357_v17  ;;  %1891 = vmatpush1.msra.mxu1 %v5359_v18  ;;  %v6873_v17 = vld [vmem:[#allocation29_spill] sm:$0xff]  ;;  %v6874_v18 = vld [vmem:[#allocation20_spill] sm:$0xff] }
 0x500   :  { %1821 = vmatprep.subr.mxu0 %v5363_v19  ;;  %1892 = vmatprep.subr.mxu1 %v5365_v20  ;;  %v6875_v19 = vld [vmem:[#allocation30_spill] sm:$0xff]  ;;  %v6876_v20 = vld [vmem:[#allocation32_spill] sm:$0xff] }
 0x501   :  { %1822 = vmatpush1.msra.mxu0 %v5369_v21  ;;  %1893 = vmatpush1.msra.mxu1 %v5371_v22  ;;  %v6877_v21 = vld [vmem:[#allocation33_spill] sm:$0xff]  ;;  %v6878_v22 = vmov 0.0  }
 0x502   :  { %1823 = vmatprep.subr.mxu0 %v5375_v23  ;;  %1894 = vmatprep.subr.mxu1 %v5377_v24  ;;  %v6879_v23 = vld [vmem:[#allocation34_spill] sm:$0xff] }
 0x503   :  { %1824 = vmatpush1.msra.mxu0 %v5381_v25  ;;  %1895 = vmatpush1.msra.mxu1 %v5383_v26  ;;  %v1494_v26 = vld [vmem:[#allocation2 + $0x8] sm:$0xc] }
 0x504   :  { %1825 = vmatprep.subr.mxu0 %v5387_v27  ;;  %1896 = vmatprep.subr.mxu1 %v5389_v29 }
 0x505   :  { %1826 = vmatpush1.msra.mxu0 %v5393_v30  ;;  %1897 = vmatpush1.msra.mxu1 %v5395_v31 }
 0x506   :  { %1827 = vmatprep.subr.mxu0 %v5399_v32  ;;  %1898 = vmatprep.subr.mxu1 %v5401_v33  ;;  %v1495_v32 = vld [vmem:[#allocation2 + $0x20] sm:$0xc] }
 0x507   :  { %1828 = vmatpush1.msra.mxu0 %v5403_v34  ;;  %1899 = vmatpush1.msra.mxu1 %v5407_v35 }
 0x508   :  { %1829 = vmatprep.subr.mxu0 %v5409_v36  ;;  %1900 = vmatprep.subr.mxu1 %v5411_v37  ;;  %v1496_v37 = vld [vmem:[#allocation2 + $0x28] sm:$0xc] }
 0x509   :  { %1830 = vmatpush1.msra.mxu0 %v5415_v38  ;;  %1901 = vmatpush1.msra.mxu1 %v5417_v39 }
 0x50a   :  { %1831 = vmatprep.subr.mxu0 %v5419_v40  ;;  %1902 = vmatprep.subr.mxu1 %v5423_v41  ;;  %v1497_v41 = vld [vmem:[#allocation2 + $0x38] sm:$0xc] }
 0x50b   :  { %1832 = vmatpush1.msra.mxu0 %v5425_v42  ;;  %1903 = vmatpush1.msra.mxu1 %v5427_v43 }
 0x50c   :  { %1833 = vmatprep.subr.mxu0 %v5431_v44  ;;  %1904 = vmatprep.subr.mxu1 %v5433_v46 }
 0x50d   :  { %1834 = vmatpush1.msra.mxu0 %v5437_v48  ;;  %1905 = vmatpush1.msra.mxu1 %v5439_v50 }
 0x50e   :  { %1835 = vmatprep.subr.mxu0 %v6838_v62  ;;  %1906 = vmatprep.subr.mxu1 %v6839_v55  ;;  %v1734_v55 = vrot.slane %v5650_v2, 6  ;;  %v2059_v2 = vld [vmem:[#allocation5 + $0x1f0] sm:$0xff] }
 0x50f   :  { %1836 = vmatpush1.msra.mxu0 %v6861_v49  ;;  %1907 = vmatpush1.msra.mxu1 %v6862_v3  ;;  %v2052_v49 = vld [vmem:[#allocation5 + $0x1b8] sm:$0xff]  ;;  %v2049_v3 = vld [vmem:[#allocation5 + $0x1a0] sm:$0xff] }
 0x510   :  { %1837 = vmatprep.subr.mxu0 %v6863_v7  ;;  %1908 = vmatprep.subr.mxu1 %v6864_v1  ;;  %v2051_v7 = vld [vmem:[#allocation5 + $0x1b0] sm:$0xff]  ;;  %v2046_v1 = vld [vmem:[#allocation5 + $0x188] sm:$0xff] }
 0x511   :  { %1838 = vmatpush1.msra.mxu0 %v6865_v0  ;;  %1909 = vmatpush1.msra.mxu1 %v6866_v5  ;;  %v2048_v0 = vld [vmem:[#allocation5 + $0x198] sm:$0xff]  ;;  %v2045_v5 = vld [vmem:[#allocation5 + $0x180] sm:$0xff] }
 0x512   :  { %1839 = vmatprep.subr.mxu0 %v6867_v8  ;;  %1910 = vmatprep.subr.mxu1 %v6868_v10  ;;  %v2047_v8 = vld [vmem:[#allocation5 + $0x190] sm:$0xff]  ;;  %v2042_v10 = vld [vmem:[#allocation5 + $0x168] sm:$0xff] }
 0x513   :  { %1840 = vmatpush1.msra.mxu0 %v6869_v11  ;;  %1911 = vmatpush1.msra.mxu1 %v6870_v12  ;;  %v2044_v11 = vld [vmem:[#allocation5 + $0x178] sm:$0xff]  ;;  %v2041_v12 = vld [vmem:[#allocation5 + $0x160] sm:$0xff] }
 0x514   :  { %1841 = vmatprep.subr.mxu0 %v6871_v14  ;;  %1912 = vmatprep.subr.mxu1 %v6872_v16  ;;  %v2043_v14 = vld [vmem:[#allocation5 + $0x170] sm:$0xff]  ;;  %v2038_v16 = vld [vmem:[#allocation5 + $0x148] sm:$0xff] }
 0x515   :  { %1842 = vmatpush1.msra.mxu0 %v6873_v17  ;;  %1913 = vmatpush1.msra.mxu1 %v6874_v18  ;;  %v2040_v17 = vld [vmem:[#allocation5 + $0x158] sm:$0xff]  ;;  %v2037_v18 = vld [vmem:[#allocation5 + $0x140] sm:$0xff] }
 0x516   :  { %1843 = vmatprep.subr.mxu0 %v6875_v19  ;;  %1914 = vmatprep.subr.mxu1 %v6876_v20  ;;  %v2039_v19 = vld [vmem:[#allocation5 + $0x150] sm:$0xff]  ;;  %v2034_v20 = vld [vmem:[#allocation5 + $0x128] sm:$0xff] }
 0x517   :  { %1844 = vmatpush1.msra.mxu0 %v6877_v21  ;;  %1877 = vmatprep.mubr.f32.mxu0 %v6878_v22  ;;  %v2036_v21 = vld [vmem:[#allocation5 + $0x138] sm:$0xff] }
 0x518   :  { %1915 = vmatpush1.msra.mxu1 %v6879_v23  ;;  %1948 = vmatprep.mubr.f32.mxu1 %v6878_v22  ;;  %v2033_v23 = vld [vmem:[#allocation5 + $0x120] sm:$0xff] }
 0x519   :  { %2064 = vmatprep.subr.mxu0 %v2058_v13  ;;  %2135 = vmatprep.subr.mxu1 %v2060_v61  ;;  %v1997_v13 = vld [vmem:[#allocation5] sm:$0xff]  ;;  %v1999_v61 = vld [vmem:[#allocation5 + $0x10] sm:$0xff] }
 0x5b8   :  { %v1628_v24 = vpop.f32.mrf.mxu0  ;;  %v1699_v27 = vpop.f32.mrf.mxu1 }
 0x5b9   :  { %v1708_v25 = vrot.slane %v1628_v24, 6  ;;  %v1710_v34 = vrot.slane %v1699_v27, 6  ;;  %v2035_v24 = vld [vmem:[#allocation5 + $0x130] sm:$0xff]  ;;  %v2029_v27 = vld [vmem:[#allocation5 + $0x100] sm:$0xff] }
 0x5ba   :  { %v1630_v29 = vpop.f32.mrf.mxu0  ;;  %v1701_v38 = vpop.f32.mrf.mxu1 }
 0x5bb   :  { %v1716_v30 = vadd.f32 %v1708_v25, %v1494_v26  ;;  %v1709_v31 = vrot.slane %v1630_v29, 6  ;;  %v1718_v39 = vadd.f32 %v1710_v34, %v1496_v37  ;;  %v1711_v40 = vrot.slane %v1701_v38, 6  ;;  %v2030_v25 = vld [vmem:[#allocation5 + $0x108] sm:$0xff]  ;;  %v2032_v26 = vld [vmem:[#allocation5 + $0x118] sm:$0xff]  ;;  %v2031_v29 = vld [vmem:[#allocation5 + $0x110] sm:$0xff] }
 0x5bc   :  { %v2022_v34 = vld [vmem:[#allocation5 + $0xc8] sm:$0xff]  ;;  %v2023_v37 = vld [vmem:[#allocation5 + $0xd0] sm:$0xff] }
 0x5bd   :  { %v1720_v33 = vmul.f32 0.5, %v1716_v30  ;;  %v1717_v35 = vadd.f32 %v1709_v31, %v1495_v32  ;;  %v1719_v42 = vadd.f32 %v1711_v40, %v1497_v41  ;;  %v2026_v30 = vld [vmem:[#allocation5 + $0xe8] sm:$0xff]  ;;  %v2028_v31 = vld [vmem:[#allocation5 + $0xf8] sm:$0xff]  ;;  %v2025_v32 = vld [vmem:[#allocation5 + $0xe0] sm:$0xff] }
 0x5be   :  { %v2018_v38 = vld [vmem:[#allocation5 + $0xa8] sm:$0xff]  ;;  %v2017_v40 = vld [vmem:[#allocation5 + $0xa0] sm:$0xff]  ;;  %v2019_v41 = vld [vmem:[#allocation5 + $0xb0] sm:$0xff] }
 0x5bf   :  { %4689 = vtanh.f32 %v1720_v33  ;;  %v1724_v36 = vmul.f32 0.5, %v1717_v35  ;;  %v1729_v43 = vmul.f32 0.5, %v1719_v42  ;;  %v2027_v33 = vld [vmem:[#allocation5 + $0xf0] sm:$0xff]  ;;  %v2024_v35 = vld [vmem:[#allocation5 + $0xd8] sm:$0xff]  ;;  %v2014_v42 = vld [vmem:[#allocation5 + $0x88] sm:$0xff] }
 0x5c1   :  { %4691 = vtanh.f32 %v1724_v36  ;;  %v2021_v36 = vld [vmem:[#allocation5 + $0xc0] sm:$0xff] }
 0x5c2   :  { %4693 = vtanh.f32 %v1718_v39  ;;  %v2020_v39 = vld [vmem:[#allocation5 + $0xb8] sm:$0xff] }
 0x5c3   :  { %4695 = vtanh.f32 %v1729_v43  ;;  %v2016_v43 = vld [vmem:[#allocation5 + $0x98] sm:$0xff] }
 0x5cc   :  { %v4690_v44 = vpop.eup %4689 }
 0x5cd   :  { %v1722_v46 = vmul.f32 0.5, %v4690_v44  ;;  %v2013_v44 = vld [vmem:[#allocation5 + $0x80] sm:$0xff] }
 0x5ce   :  { %v4692_v48 = vpop.eup %4691 }
 0x5cf   :  { %v1723_v50 = vadd.f32 0.5, %v1722_v46  ;;  %v1726_v28 = vmul.f32 0.5, %v4692_v48  ;;  %v4694_v52 = vpop.eup %4693  ;;  %v2015_v46 = vld [vmem:[#allocation5 + $0x90] sm:$0xff]  ;;  %v2010_v48 = vld [vmem:[#allocation5 + $0x68] sm:$0xff] }
 0x5d0   :  { %v4696_v54 = vpop.eup %4695 }
 0x5d1   :  { %v1727_v62 = vadd.f32 0.5, %v1726_v28  ;;  %v1737_v4 = vmul.f32 %v4694_v52, %v1723_v50  ;;  %v1731_v51 = vmul.f32 0.5, %v4696_v54  ;;  %v2012_v50 = vld [vmem:[#allocation5 + $0x78] sm:$0xff]  ;;  %v2009_v28 = vld [vmem:[#allocation5 + $0x60] sm:$0xff]  ;;  %v2002_v54 = vld [vmem:[#allocation5 + $0x28] sm:$0xff] }
 0x5d2   :  { %v2008_v52 = vld [vmem:[#allocation5 + $0x58] sm:$0xff] }
 0x5d3   :  { %v1736_v9 = vmul.f32 %v1734_v55, %v1727_v62  ;;  %v1732_v45 = vadd.f32 0.5, %v1731_v51  ;;  %v2011_v62 = vld [vmem:[#allocation5 + $0x70] sm:$0xff]  ;;  %v2006_v55 = vld [vmem:[#allocation5 + $0x48] sm:$0xff]  ;;  %v2004_v51 = vld [vmem:[#allocation5 + $0x38] sm:$0xff] }
 0x5d5   :  { %v5718_v47 = vadd.f32 %v1737_v4, %v1736_v9  ;;  %v2005_v9 = vld [vmem:[#allocation5 + $0x40] sm:$0xff]  ;;  %v2007_v4 = vld [vmem:[#allocation5 + $0x50] sm:$0xff] }
 0x5d7   :  { %4697 = vtanh.f32 %v5718_v47 }
 0x5e4   :  { %v4698_v15 = vpop.eup %4697 }
 0x5e5   :  { %v1740_v57 = vmul.f32 %v4698_v15, %v1732_v45  ;;  %v2001_v45 = vld [vmem:[#allocation5 + $0x20] sm:$0xff]  ;;  %v2003_v15 = vld [vmem:[#allocation5 + $0x30] sm:$0xff] }
 0x5e7   :  { %1741 = vst [vmem:[#allocation3 + $0x8] sm:$0xc] %v1740_v57  ;;  %v1811_v63 = vrot.slane %v1740_v57, 2  ;;  %v1998_v57 = vld [vmem:[#allocation5 + $0x8] sm:$0xff] }
 0x5e9   :  { %1878 = vmatmul.mubr.f32.vlgmr.msra.gmra.mxu0 %v1811_v63  ;;  %1949 = vmatmul.mubr.f32.vlgmr.msra.gmra.mxu1 %v1811_v63  ;;  %v2000_v63 = vld [vmem:[#allocation5 + $0x18] sm:$0xff] }
 0x5ea   :  { %2128 = vmatprep.mubr.f32.mxu0 %v6878_v22  ;;  %2199 = vmatprep.mubr.f32.mxu1 %v6878_v22 }
 0x5eb   :  { %2065 = vmatpush1.msra.mxu0 %v2057_v53  ;;  %2136 = vmatpush1.msra.mxu1 %v2059_v2  ;;  %v2307_v53 = vld [vmem:[#allocation7 + $0x1e8] sm:$0xff]  ;;  %v2309_v2 = vld [vmem:[#allocation7 + $0x1f8] sm:$0xff] }
 0x5ec   :  { %2066 = vmatprep.subr.mxu0 %v2054_v56  ;;  %2137 = vmatprep.subr.mxu1 %v2056_v6 }
 0x5ed   :  { %2067 = vmatpush1.msra.mxu0 %v2053_v59  ;;  %2138 = vmatpush1.msra.mxu1 %v2055_v58  ;;  %v1742_v59 = vld [vmem:[#allocation2 + $0x8] sm:$0x30] }
 0x5ee   :  { %2068 = vmatprep.subr.mxu0 %v2050_v60  ;;  %2139 = vmatprep.subr.mxu1 %v2052_v49 }
 0x5ef   :  { %2069 = vmatpush1.msra.mxu0 %v2049_v3  ;;  %2140 = vmatpush1.msra.mxu1 %v2051_v7  ;;  %v1743_v7 = vld [vmem:[#allocation2 + $0x20] sm:$0x30] }
 0x5f0   :  { %2070 = vmatprep.subr.mxu0 %v2046_v1  ;;  %2141 = vmatprep.subr.mxu1 %v2048_v0 }
 0x5f1   :  { %2071 = vmatpush1.msra.mxu0 %v2045_v5  ;;  %2142 = vmatpush1.msra.mxu1 %v2047_v8 }
 0x5f2   :  { %2072 = vmatprep.subr.mxu0 %v2042_v10  ;;  %2143 = vmatprep.subr.mxu1 %v2044_v11  ;;  %v1744_v10 = vld [vmem:[#allocation2 + $0x28] sm:$0x30] }
 0x5f3   :  { %2073 = vmatpush1.msra.mxu0 %v2041_v12  ;;  %2144 = vmatpush1.msra.mxu1 %v2043_v14 }
 0x5f4   :  { %2074 = vmatprep.subr.mxu0 %v2038_v16  ;;  %2145 = vmatprep.subr.mxu1 %v2040_v17  ;;  %v1745_v16 = vld [vmem:[#allocation2 + $0x38] sm:$0x30] }
 0x5f5   :  { %2075 = vmatpush1.msra.mxu0 %v2037_v18  ;;  %2146 = vmatpush1.msra.mxu1 %v2039_v19 }
 0x5f6   :  { %2076 = vmatprep.subr.mxu0 %v2034_v20  ;;  %2147 = vmatprep.subr.mxu1 %v2036_v21 }
 0x5f7   :  { %2077 = vmatpush1.msra.mxu0 %v2033_v23  ;;  %2148 = vmatpush1.msra.mxu1 %v2035_v24 }
 0x5f8   :  { %2078 = vmatprep.subr.mxu0 %v2030_v25  ;;  %2149 = vmatprep.subr.mxu1 %v2032_v26  ;;  %v1985_v26 = vrot.slane %v5718_v47, 6  ;;  %v2302_v47 = vld [vmem:[#allocation7 + $0x1c0] sm:$0xff] }
 0x5f9   :  { %2079 = vmatpush1.msra.mxu0 %v2029_v27  ;;  %2150 = vmatpush1.msra.mxu1 %v2031_v29 }
 0x5fa   :  { %2080 = vmatprep.subr.mxu0 %v2026_v30  ;;  %2151 = vmatprep.subr.mxu1 %v2028_v31 }
 0x5fb   :  { %2081 = vmatpush1.msra.mxu0 %v2025_v32  ;;  %2152 = vmatpush1.msra.mxu1 %v2027_v33 }
 0x5fc   :  { %2082 = vmatprep.subr.mxu0 %v2022_v34  ;;  %2153 = vmatprep.subr.mxu1 %v2024_v35 }
 0x5fd   :  { %2083 = vmatpush1.msra.mxu0 %v2021_v36  ;;  %2154 = vmatpush1.msra.mxu1 %v2023_v37 }
 0x5fe   :  { %2084 = vmatprep.subr.mxu0 %v2018_v38  ;;  %2155 = vmatprep.subr.mxu1 %v2020_v39  ;;  %v2306_v38 = vld [vmem:[#allocation7 + $0x1e0] sm:$0xff]  ;;  %v2308_v39 = vld [vmem:[#allocation7 + $0x1f0] sm:$0xff] }
 0x5ff   :  { %2085 = vmatpush1.msra.mxu0 %v2017_v40  ;;  %2156 = vmatpush1.msra.mxu1 %v2019_v41  ;;  %v2303_v40 = vld [vmem:[#allocation7 + $0x1c8] sm:$0xff]  ;;  %v2305_v41 = vld [vmem:[#allocation7 + $0x1d8] sm:$0xff] }
 0x600   :  { %2086 = vmatprep.subr.mxu0 %v2014_v42  ;;  %2157 = vmatprep.subr.mxu1 %v2016_v43  ;;  %v2304_v42 = vld [vmem:[#allocation7 + $0x1d0] sm:$0xff]  ;;  %v2299_v43 = vld [vmem:[#allocation7 + $0x1a8] sm:$0xff] }
 0x601   :  { %2087 = vmatpush1.msra.mxu0 %v2013_v44  ;;  %2158 = vmatpush1.msra.mxu1 %v2015_v46  ;;  %v2301_v44 = vld [vmem:[#allocation7 + $0x1b8] sm:$0xff]  ;;  %v2298_v46 = vld [vmem:[#allocation7 + $0x1a0] sm:$0xff] }
 0x602   :  { %2088 = vmatprep.subr.mxu0 %v2010_v48  ;;  %2159 = vmatprep.subr.mxu1 %v2012_v50  ;;  %v2300_v48 = vld [vmem:[#allocation7 + $0x1b0] sm:$0xff]  ;;  %v2295_v50 = vld [vmem:[#allocation7 + $0x188] sm:$0xff] }
 0x603   :  { %2089 = vmatpush1.msra.mxu0 %v2009_v28  ;;  %2160 = vmatpush1.msra.mxu1 %v2011_v62  ;;  %v2297_v28 = vld [vmem:[#allocation7 + $0x198] sm:$0xff]  ;;  %v2294_v62 = vld [vmem:[#allocation7 + $0x180] sm:$0xff] }
 0x604   :  { %2090 = vmatprep.subr.mxu0 %v2006_v55  ;;  %2161 = vmatprep.subr.mxu1 %v2008_v52  ;;  %v2296_v55 = vld [vmem:[#allocation7 + $0x190] sm:$0xff]  ;;  %v2291_v52 = vld [vmem:[#allocation7 + $0x168] sm:$0xff] }
 0x605   :  { %2091 = vmatpush1.msra.mxu0 %v2005_v9  ;;  %2162 = vmatpush1.msra.mxu1 %v2007_v4  ;;  %v2293_v9 = vld [vmem:[#allocation7 + $0x178] sm:$0xff]  ;;  %v2290_v4 = vld [vmem:[#allocation7 + $0x160] sm:$0xff] }
 0x606   :  { %2092 = vmatprep.subr.mxu0 %v2002_v54  ;;  %2163 = vmatprep.subr.mxu1 %v2004_v51  ;;  %v2292_v54 = vld [vmem:[#allocation7 + $0x170] sm:$0xff]  ;;  %v2287_v51 = vld [vmem:[#allocation7 + $0x148] sm:$0xff] }
 0x607   :  { %2093 = vmatpush1.msra.mxu0 %v2001_v45  ;;  %2164 = vmatpush1.msra.mxu1 %v2003_v15  ;;  %v2289_v45 = vld [vmem:[#allocation7 + $0x158] sm:$0xff]  ;;  %v2286_v15 = vld [vmem:[#allocation7 + $0x140] sm:$0xff] }
 0x608   :  { %2094 = vmatprep.subr.mxu0 %v1998_v57  ;;  %2165 = vmatprep.subr.mxu1 %v2000_v63  ;;  %v2288_v57 = vld [vmem:[#allocation7 + $0x150] sm:$0xff]  ;;  %v2283_v63 = vld [vmem:[#allocation7 + $0x128] sm:$0xff] }
 0x609   :  { %2095 = vmatpush1.msra.mxu0 %v1997_v13  ;;  %2166 = vmatpush1.msra.mxu1 %v1999_v61  ;;  %v2285_v13 = vld [vmem:[#allocation7 + $0x138] sm:$0xff]  ;;  %v2282_v61 = vld [vmem:[#allocation7 + $0x120] sm:$0xff] }
 0x60a   :  { %2332 = vmatprep.subr.mxu0 %v2307_v53  ;;  %2409 = vmatprep.subr.mxu1 %v2309_v2  ;;  %v2284_v53 = vld [vmem:[#allocation7 + $0x130] sm:$0xff]  ;;  %v2279_v2 = vld [vmem:[#allocation7 + $0x108] sm:$0xff] }
 0x6a9   :  { %v1879_v56 = vpop.f32.mrf.mxu0  ;;  %v1950_v58 = vpop.f32.mrf.mxu1 }
 0x6aa   :  { %v1959_v6 = vrot.slane %v1879_v56, 4  ;;  %v1961_v0 = vrot.slane %v1950_v58, 4  ;;  %v2281_v56 = vld [vmem:[#allocation7 + $0x118] sm:$0xff]  ;;  %v2275_v58 = vld [vmem:[#allocation7 + $0xe8] sm:$0xff] }
 0x6ab   :  { %v1881_v60 = vpop.f32.mrf.mxu0  ;;  %v1952_v11 = vpop.f32.mrf.mxu1 }
 0x6ac   :  { %v1967_v49 = vadd.f32 %v1959_v6, %v1742_v59  ;;  %v1960_v3 = vrot.slane %v1881_v60, 4  ;;  %v1969_v12 = vadd.f32 %v1961_v0, %v1744_v10  ;;  %v1962_v14 = vrot.slane %v1952_v11, 4  ;;  %v2278_v6 = vld [vmem:[#allocation7 + $0x100] sm:$0xff]  ;;  %v2280_v59 = vld [vmem:[#allocation7 + $0x110] sm:$0xff]  ;;  %v2277_v60 = vld [vmem:[#allocation7 + $0xf8] sm:$0xff] }
 0x6ad   :  { %v2270_v0 = vld [vmem:[#allocation7 + $0xc0] sm:$0xff]  ;;  %v2269_v10 = vld [vmem:[#allocation7 + $0xb8] sm:$0xff] }
 0x6ae   :  { %v1971_v1 = vmul.f32 0.5, %v1967_v49  ;;  %v1968_v5 = vadd.f32 %v1960_v3, %v1743_v7  ;;  %v1970_v17 = vadd.f32 %v1962_v14, %v1745_v16  ;;  %v2274_v49 = vld [vmem:[#allocation7 + $0xe0] sm:$0xff]  ;;  %v2276_v3 = vld [vmem:[#allocation7 + $0xf0] sm:$0xff]  ;;  %v2271_v7 = vld [vmem:[#allocation7 + $0xc8] sm:$0xff] }
 0x6af   :  { %v2266_v11 = vld [vmem:[#allocation7 + $0xa0] sm:$0xff]  ;;  %v2263_v14 = vld [vmem:[#allocation7 + $0x88] sm:$0xff]  ;;  %v2265_v16 = vld [vmem:[#allocation7 + $0x98] sm:$0xff] }
 0x6b0   :  { %4699 = vtanh.f32 %v1971_v1  ;;  %v1975_v8 = vmul.f32 0.5, %v1968_v5  ;;  %v1980_v18 = vmul.f32 0.5, %v1970_v17  ;;  %v2273_v1 = vld [vmem:[#allocation7 + $0xd8] sm:$0xff]  ;;  %v2272_v5 = vld [vmem:[#allocation7 + $0xd0] sm:$0xff]  ;;  %v2262_v17 = vld [vmem:[#allocation7 + $0x80] sm:$0xff] }
 0x6b2   :  { %4701 = vtanh.f32 %v1975_v8  ;;  %v2267_v8 = vld [vmem:[#allocation7 + $0xa8] sm:$0xff] }
 0x6b3   :  { %4703 = vtanh.f32 %v1969_v12  ;;  %v2268_v12 = vld [vmem:[#allocation7 + $0xb0] sm:$0xff] }
 0x6b4   :  { %4705 = vtanh.f32 %v1980_v18  ;;  %v2264_v18 = vld [vmem:[#allocation7 + $0x90] sm:$0xff] }
 0x6bd   :  { %v4700_v19 = vpop.eup %4699 }
 0x6be   :  { %v1973_v20 = vmul.f32 0.5, %v4700_v19  ;;  %v2259_v19 = vld [vmem:[#allocation7 + $0x68] sm:$0xff] }
 0x6bf   :  { %v4702_v21 = vpop.eup %4701 }
 0x6c0   :  { %v1974_v23 = vadd.f32 0.5, %v1973_v20  ;;  %v1977_v24 = vmul.f32 0.5, %v4702_v21  ;;  %v4704_v27 = vpop.eup %4703  ;;  %v2261_v20 = vld [vmem:[#allocation7 + $0x78] sm:$0xff]  ;;  %v2258_v21 = vld [vmem:[#allocation7 + $0x60] sm:$0xff] }
 0x6c1   :  { %v4706_v32 = vpop.eup %4705 }
 0x6c2   :  { %v1978_v25 = vadd.f32 0.5, %v1977_v24  ;;  %v1988_v30 = vmul.f32 %v4704_v27, %v1974_v23  ;;  %v1982_v33 = vmul.f32 0.5, %v4706_v32  ;;  %v2260_v23 = vld [vmem:[#allocation7 + $0x70] sm:$0xff]  ;;  %v2255_v24 = vld [vmem:[#allocation7 + $0x48] sm:$0xff]  ;;  %v2250_v32 = vld [vmem:[#allocation7 + $0x20] sm:$0xff] }
 0x6c3   :  { %v2256_v27 = vld [vmem:[#allocation7 + $0x50] sm:$0xff] }
 0x6c4   :  { %v1987_v29 = vmul.f32 %v1985_v26, %v1978_v25  ;;  %v1983_v34 = vadd.f32 0.5, %v1982_v33  ;;  %v2257_v25 = vld [vmem:[#allocation7 + $0x58] sm:$0xff]  ;;  %v2254_v26 = vld [vmem:[#allocation7 + $0x40] sm:$0xff]  ;;  %v2252_v33 = vld [vmem:[#allocation7 + $0x30] sm:$0xff] }
 0x6c6   :  { %v5724_v31 = vadd.f32 %v1988_v30, %v1987_v29  ;;  %v2251_v29 = vld [vmem:[#allocation7 + $0x28] sm:$0xff]  ;;  %v2253_v30 = vld [vmem:[#allocation7 + $0x38] sm:$0xff] }
 0x6c8   :  { %4707 = vtanh.f32 %v5724_v31 }
 0x6d5   :  { %v4708_v35 = vpop.eup %4707 }
 0x6d6   :  { %v1991_v36 = vmul.f32 %v4708_v35, %v1983_v34  ;;  %v2247_v34 = vld [vmem:[#allocation7 + $0x8] sm:$0xff]  ;;  %v2249_v35 = vld [vmem:[#allocation7 + $0x18] sm:$0xff] }
 0x6d8   :  { %1992 = vst [vmem:[#allocation3 + $0x8] sm:$0x30] %v1991_v36  ;;  %v2062_v37 = vrot.slane %v1991_v36, 4  ;;  %v2246_v36 = vld [vmem:[#allocation7] sm:$0xff] }
 0x6da   :  { %2129 = vmatmul.mubr.f32.vlgmr.msra.gmra.mxu0 %v2062_v37  ;;  %2200 = vmatmul.mubr.f32.vlgmr.msra.gmra.mxu1 %v2062_v37  ;;  %v2248_v37 = vld [vmem:[#allocation7 + $0x10] sm:$0xff] }
 0x6db   :  { %2333 = vmatpush1.msra.mxu0 %v2306_v38  ;;  %2410 = vmatpush1.msra.mxu1 %v2308_v39  ;;  %v2244_v38 = vld [vmem:[#allocation3] sm:$0xff] }
 0x6dc   :  { %2334 = vmatprep.subr.mxu0 %v2303_v40  ;;  %2411 = vmatprep.subr.mxu1 %v2305_v41  ;;  %v5731_v39 = vld [vmem:[#allocation9 + $0x1e8] sm:$0xff]  ;;  %v5733_v40 = vld [vmem:[#allocation9 + $0x1f8] sm:$0xff]  ;;  %v5737_v41 = vld [vmem:[#allocation9 + $0x1e0] sm:$0xff] }
 0x6dd   :  { %2335 = vmatpush1.msra.mxu0 %v2302_v47  ;;  %2412 = vmatpush1.msra.mxu1 %v2304_v42  ;;  %6880 = vst [vmem:[#allocation22_spill] sm:$0xff] %v5731_v39  ;;  %6881 = vst [vmem:[#allocation13_spill] sm:$0xff] %v5733_v40  ;;  %v5739_v47 = vld [vmem:[#allocation9 + $0x1f0] sm:$0xff]  ;;  %v5743_v42 = vld [vmem:[#allocation9 + $0x1c8] sm:$0xff] }
 0x6de   :  { %2336 = vmatprep.subr.mxu0 %v2299_v43  ;;  %2413 = vmatprep.subr.mxu1 %v2301_v44  ;;  %v5745_v43 = vld [vmem:[#allocation9 + $0x1d8] sm:$0xff]  ;;  %v5749_v44 = vld [vmem:[#allocation9 + $0x1c0] sm:$0xff] }
 0x6df   :  { %2337 = vmatpush1.msra.mxu0 %v2298_v46  ;;  %2414 = vmatpush1.msra.mxu1 %v2300_v48  ;;  %v5751_v46 = vld [vmem:[#allocation9 + $0x1d0] sm:$0xff]  ;;  %v5755_v48 = vld [vmem:[#allocation9 + $0x1a8] sm:$0xff] }
 0x6e0   :  { %2338 = vmatprep.subr.mxu0 %v2295_v50  ;;  %2415 = vmatprep.subr.mxu1 %v2297_v28  ;;  %v5757_v50 = vld [vmem:[#allocation9 + $0x1b8] sm:$0xff]  ;;  %v5761_v28 = vld [vmem:[#allocation9 + $0x1a0] sm:$0xff] }
 0x6e1   :  { %2339 = vmatpush1.msra.mxu0 %v2294_v62  ;;  %2416 = vmatpush1.msra.mxu1 %v2296_v55  ;;  %v5763_v62 = vld [vmem:[#allocation9 + $0x1b0] sm:$0xff]  ;;  %v5767_v55 = vld [vmem:[#allocation9 + $0x188] sm:$0xff] }
 0x6e2   :  { %2340 = vmatprep.subr.mxu0 %v2291_v52  ;;  %2417 = vmatprep.subr.mxu1 %v2293_v9  ;;  %v5769_v52 = vld [vmem:[#allocation9 + $0x198] sm:$0xff]  ;;  %v5773_v9 = vld [vmem:[#allocation9 + $0x180] sm:$0xff] }
 0x6e3   :  { %2341 = vmatpush1.msra.mxu0 %v2290_v4  ;;  %2418 = vmatpush1.msra.mxu1 %v2292_v54  ;;  %v5775_v4 = vld [vmem:[#allocation9 + $0x190] sm:$0xff]  ;;  %v5779_v54 = vld [vmem:[#allocation9 + $0x168] sm:$0xff] }
 0x6e4   :  { %2342 = vmatprep.subr.mxu0 %v2287_v51  ;;  %2419 = vmatprep.subr.mxu1 %v2289_v45  ;;  %v5781_v51 = vld [vmem:[#allocation9 + $0x178] sm:$0xff]  ;;  %v5785_v45 = vld [vmem:[#allocation9 + $0x160] sm:$0xff] }
 0x6e5   :  { %2343 = vmatpush1.msra.mxu0 %v2286_v15  ;;  %2420 = vmatpush1.msra.mxu1 %v2288_v57  ;;  %v5787_v15 = vld [vmem:[#allocation9 + $0x170] sm:$0xff]  ;;  %v5791_v57 = vld [vmem:[#allocation9 + $0x148] sm:$0xff] }
 0x6e6   :  { %2344 = vmatprep.subr.mxu0 %v2283_v63  ;;  %2421 = vmatprep.subr.mxu1 %v2285_v13  ;;  %v5793_v63 = vld [vmem:[#allocation9 + $0x158] sm:$0xff]  ;;  %v5797_v13 = vld [vmem:[#allocation9 + $0x140] sm:$0xff] }
 0x6e7   :  { %2345 = vmatpush1.msra.mxu0 %v2282_v61  ;;  %2422 = vmatpush1.msra.mxu1 %v2284_v53  ;;  %v5799_v61 = vld [vmem:[#allocation9 + $0x150] sm:$0xff]  ;;  %v5803_v53 = vld [vmem:[#allocation9 + $0x128] sm:$0xff] }
 0x6e8   :  { %2346 = vmatprep.subr.mxu0 %v2279_v2  ;;  %2423 = vmatprep.subr.mxu1 %v2281_v56  ;;  %v5805_v2 = vld [vmem:[#allocation9 + $0x138] sm:$0xff]  ;;  %v5809_v56 = vld [vmem:[#allocation9 + $0x120] sm:$0xff] }
 0x6e9   :  { %2347 = vmatpush1.msra.mxu0 %v2278_v6  ;;  %2424 = vmatpush1.msra.mxu1 %v2280_v59  ;;  %v5811_v6 = vld [vmem:[#allocation9 + $0x130] sm:$0xff]  ;;  %v5815_v59 = vld [vmem:[#allocation9 + $0x108] sm:$0xff] }
 0x6ea   :  { %2348 = vmatprep.subr.mxu0 %v2275_v58  ;;  %2425 = vmatprep.subr.mxu1 %v2277_v60  ;;  %v5817_v58 = vld [vmem:[#allocation9 + $0x118] sm:$0xff]  ;;  %v5821_v60 = vld [vmem:[#allocation9 + $0x100] sm:$0xff] }
 0x6eb   :  { %2349 = vmatpush1.msra.mxu0 %v2274_v49  ;;  %2426 = vmatpush1.msra.mxu1 %v2276_v3  ;;  %v5823_v49 = vld [vmem:[#allocation9 + $0x110] sm:$0xff]  ;;  %v5827_v3 = vld [vmem:[#allocation9 + $0xe8] sm:$0xff] }
 0x6ec   :  { %2350 = vmatprep.subr.mxu0 %v2271_v7  ;;  %2427 = vmatprep.subr.mxu1 %v2273_v1  ;;  %v5829_v7 = vld [vmem:[#allocation9 + $0xf8] sm:$0xff]  ;;  %v5833_v1 = vld [vmem:[#allocation9 + $0xe0] sm:$0xff] }
 0x6ed   :  { %2351 = vmatpush1.msra.mxu0 %v2270_v0  ;;  %2428 = vmatpush1.msra.mxu1 %v2272_v5  ;;  %v5835_v0 = vld [vmem:[#allocation9 + $0xf0] sm:$0xff]  ;;  %v5839_v5 = vld [vmem:[#allocation9 + $0xc8] sm:$0xff] }
 0x6ee   :  { %2352 = vmatprep.subr.mxu0 %v2267_v8  ;;  %2429 = vmatprep.subr.mxu1 %v2269_v10  ;;  %v5841_v8 = vld [vmem:[#allocation9 + $0xd8] sm:$0xff]  ;;  %v5845_v10 = vld [vmem:[#allocation9 + $0xc0] sm:$0xff] }
 0x6ef   :  { %2353 = vmatpush1.msra.mxu0 %v2266_v11  ;;  %2430 = vmatpush1.msra.mxu1 %v2268_v12  ;;  %v5847_v11 = vld [vmem:[#allocation9 + $0xd0] sm:$0xff]  ;;  %v5849_v12 = vld [vmem:[#allocation9 + $0xa8] sm:$0xff] }
 0x6f0   :  { %2354 = vmatprep.subr.mxu0 %v2263_v14  ;;  %2431 = vmatprep.subr.mxu1 %v2265_v16  ;;  %v5853_v14 = vld [vmem:[#allocation9 + $0xb8] sm:$0xff]  ;;  %v5855_v16 = vld [vmem:[#allocation9 + $0xa0] sm:$0xff] }
 0x6f1   :  { %2355 = vmatpush1.msra.mxu0 %v2262_v17  ;;  %2432 = vmatpush1.msra.mxu1 %v2264_v18  ;;  %v5857_v17 = vld [vmem:[#allocation9 + $0xb0] sm:$0xff]  ;;  %v5861_v18 = vld [vmem:[#allocation9 + $0x88] sm:$0xff] }
 0x6f2   :  { %2356 = vmatprep.subr.mxu0 %v2259_v19  ;;  %2433 = vmatprep.subr.mxu1 %v2261_v20  ;;  %6882 = vst [vmem:[#allocation21_spill] sm:$0xff] %v5857_v17  ;;  %6883 = vst [vmem:[#allocation12_spill] sm:$0xff] %v5861_v18  ;;  %v5863_v19 = vld [vmem:[#allocation9 + $0x98] sm:$0xff]  ;;  %v5865_v20 = vld [vmem:[#allocation9 + $0x80] sm:$0xff] }
 0x6f3   :  { %2357 = vmatpush1.msra.mxu0 %v2258_v21  ;;  %2434 = vmatpush1.msra.mxu1 %v2260_v23  ;;  %6884 = vst [vmem:[#allocation23_spill] sm:$0xff] %v5863_v19  ;;  %6885 = vst [vmem:[#allocation14_spill] sm:$0xff] %v5865_v20  ;;  %v5869_v21 = vld [vmem:[#allocation9 + $0x90] sm:$0xff]  ;;  %v5871_v23 = vld [vmem:[#allocation9 + $0x68] sm:$0xff] }
 0x6f4   :  { %2358 = vmatprep.subr.mxu0 %v2255_v24  ;;  %2435 = vmatprep.subr.mxu1 %v2257_v25  ;;  %6886 = vst [vmem:[#allocation24_spill] sm:$0xff] %v5869_v21  ;;  %6887 = vst [vmem:[#allocation15_spill] sm:$0xff] %v5871_v23  ;;  %v5873_v24 = vld [vmem:[#allocation9 + $0x78] sm:$0xff]  ;;  %v5877_v25 = vld [vmem:[#allocation9 + $0x60] sm:$0xff] }
 0x6f5   :  { %2359 = vmatpush1.msra.mxu0 %v2254_v26  ;;  %2436 = vmatpush1.msra.mxu1 %v2256_v27  ;;  %6888 = vst [vmem:[#allocation25_spill] sm:$0xff] %v5873_v24  ;;  %6889 = vst [vmem:[#allocation16_spill] sm:$0xff] %v5877_v25  ;;  %v5879_v26 = vld [vmem:[#allocation9 + $0x70] sm:$0xff]  ;;  %v5883_v27 = vld [vmem:[#allocation9 + $0x48] sm:$0xff] }
 0x6f6   :  { %2360 = vmatprep.subr.mxu0 %v2251_v29  ;;  %2437 = vmatprep.subr.mxu1 %v2253_v30  ;;  %6890 = vst [vmem:[#allocation26_spill] sm:$0xff] %v5879_v26  ;;  %6891 = vst [vmem:[#allocation17_spill] sm:$0xff] %v5883_v27  ;;  %v5885_v29 = vld [vmem:[#allocation9 + $0x58] sm:$0xff]  ;;  %v5889_v30 = vld [vmem:[#allocation9 + $0x40] sm:$0xff] }
 0x6f7   :  { %2361 = vmatpush1.msra.mxu0 %v2250_v32  ;;  %2438 = vmatpush1.msra.mxu1 %v2252_v33  ;;  %6892 = vst [vmem:[#allocation27_spill] sm:$0xff] %v5885_v29  ;;  %6893 = vst [vmem:[#allocation18_spill] sm:$0xff] %v5889_v30  ;;  %v5891_v32 = vld [vmem:[#allocation9 + $0x50] sm:$0xff]  ;;  %v5897_v33 = vld [vmem:[#allocation9 + $0x28] sm:$0xff] }
 0x6f8   :  { %2362 = vmatprep.subr.mxu0 %v2247_v34  ;;  %2439 = vmatprep.subr.mxu1 %v2249_v35  ;;  %6894 = vst [vmem:[#allocation28_spill] sm:$0xff] %v5891_v32  ;;  %6895 = vst [vmem:[#allocation19_spill] sm:$0xff] %v5897_v33  ;;  %v5899_v34 = vld [vmem:[#allocation9 + $0x38] sm:$0xff]  ;;  %v5901_v35 = vld [vmem:[#allocation9 + $0x20] sm:$0xff] }
 0x6f9   :  { %2363 = vmatpush1.msra.mxu0 %v2246_v36  ;;  %2396 = vmatprep.mubr.f32.mxu0 %v6878_v22  ;;  %6896 = vst [vmem:[#allocation29_spill] sm:$0xff] %v5899_v34  ;;  %6897 = vst [vmem:[#allocation20_spill] sm:$0xff] %v5901_v35  ;;  %v5905_v36 = vld [vmem:[#allocation9 + $0x30] sm:$0xff] }
 0x6fa   :  { %2440 = vmatpush1.msra.mxu1 %v2248_v37  ;;  %2473 = vmatprep.mubr.f32.mxu1 %v6878_v22  ;;  %6898 = vst [vmem:[#allocation30_spill] sm:$0xff] %v5905_v36  ;;  %v5907_v37 = vld [vmem:[#allocation9 + $0x8] sm:$0xff] }
 0x6fb   :  { %2397 = vmatmul.mubr.f32.vlgmr.msra.gmra.mxu0 %v2244_v38  ;;  %2474 = vmatmul.mubr.f32.vlgmr.msra.gmra.mxu1 %v2244_v38  ;;  %6899 = vst [vmem:[#allocation32_spill] sm:$0xff] %v5907_v37  ;;  %v5909_v38 = vld [vmem:[#allocation9 + $0x18] sm:$0xff] }
 0x6fc   :  { %2402 = vmatprep.mubr.f32.mxu0 %v6878_v22  ;;  %2479 = vmatprep.mubr.f32.mxu1 %v6878_v22  ;;  %6900 = vst [vmem:[#allocation33_spill] sm:$0xff] %v5909_v38 }
 0x6fd   :  { %2562 = vmatprep.subr.mxu0 %v5731_v39  ;;  %2633 = vmatprep.subr.mxu1 %v5733_v40 }
 0x6fe   :  { %2563 = vmatpush1.msra.mxu0 %v5737_v41  ;;  %2634 = vmatpush1.msra.mxu1 %v5739_v47 }
 0x6ff   :  { %2564 = vmatprep.subr.mxu0 %v5743_v42  ;;  %2635 = vmatprep.subr.mxu1 %v5745_v43 }
 0x700   :  { %2565 = vmatpush1.msra.mxu0 %v5749_v44  ;;  %2636 = vmatpush1.msra.mxu1 %v5751_v46 }
 0x701   :  { %2566 = vmatprep.subr.mxu0 %v5755_v48  ;;  %2637 = vmatprep.subr.mxu1 %v5757_v50 }
 0x702   :  { %2567 = vmatpush1.msra.mxu0 %v5761_v28  ;;  %2638 = vmatpush1.msra.mxu1 %v5763_v62 }
 0x703   :  { %2568 = vmatprep.subr.mxu0 %v5767_v55  ;;  %2639 = vmatprep.subr.mxu1 %v5769_v52 }
 0x704   :  { %2569 = vmatpush1.msra.mxu0 %v5773_v9  ;;  %2640 = vmatpush1.msra.mxu1 %v5775_v4 }
 0x705   :  { %2570 = vmatprep.subr.mxu0 %v5779_v54  ;;  %2641 = vmatprep.subr.mxu1 %v5781_v51 }
 0x706   :  { %2571 = vmatpush1.msra.mxu0 %v5785_v45  ;;  %2642 = vmatpush1.msra.mxu1 %v5787_v15 }
 0x707   :  { %2572 = vmatprep.subr.mxu0 %v5791_v57  ;;  %2643 = vmatprep.subr.mxu1 %v5793_v63 }
 0x708   :  { %2573 = vmatpush1.msra.mxu0 %v5797_v13  ;;  %2644 = vmatpush1.msra.mxu1 %v5799_v61 }
 0x709   :  { %2574 = vmatprep.subr.mxu0 %v5803_v53  ;;  %2645 = vmatprep.subr.mxu1 %v5805_v2 }
 0x70a   :  { %2575 = vmatpush1.msra.mxu0 %v5809_v56  ;;  %2646 = vmatpush1.msra.mxu1 %v5811_v6 }
 0x70b   :  { %2576 = vmatprep.subr.mxu0 %v5815_v59  ;;  %2647 = vmatprep.subr.mxu1 %v5817_v58 }
 0x70c   :  { %2577 = vmatpush1.msra.mxu0 %v5821_v60  ;;  %2648 = vmatpush1.msra.mxu1 %v5823_v49 }
 0x70d   :  { %2578 = vmatprep.subr.mxu0 %v5827_v3  ;;  %2649 = vmatprep.subr.mxu1 %v5829_v7 }
 0x70e   :  { %2579 = vmatpush1.msra.mxu0 %v5833_v1  ;;  %2650 = vmatpush1.msra.mxu1 %v5835_v0 }
 0x70f   :  { %2580 = vmatprep.subr.mxu0 %v5839_v5  ;;  %2651 = vmatprep.subr.mxu1 %v5841_v8 }
 0x710   :  { %2581 = vmatpush1.msra.mxu0 %v5845_v10  ;;  %2652 = vmatpush1.msra.mxu1 %v5847_v11 }
 0x711   :  { %2582 = vmatprep.subr.mxu0 %v5849_v12  ;;  %2653 = vmatprep.subr.mxu1 %v5853_v14 }
 0x712   :  { %2583 = vmatpush1.msra.mxu0 %v5855_v16  ;;  %2654 = vmatpush1.msra.mxu1 %v5857_v17 }
 0x713   :  { %2584 = vmatprep.subr.mxu0 %v5861_v18  ;;  %2655 = vmatprep.subr.mxu1 %v5863_v19 }
 0x714   :  { %2585 = vmatpush1.msra.mxu0 %v5865_v20  ;;  %2656 = vmatpush1.msra.mxu1 %v5869_v21 }
 0x715   :  { %2586 = vmatprep.subr.mxu0 %v5871_v23  ;;  %2657 = vmatprep.subr.mxu1 %v5873_v24 }
 0x716   :  { %2587 = vmatpush1.msra.mxu0 %v5877_v25  ;;  %2658 = vmatpush1.msra.mxu1 %v5879_v26 }
 0x717   :  { %2588 = vmatprep.subr.mxu0 %v5883_v27  ;;  %2659 = vmatprep.subr.mxu1 %v5885_v29  ;;  %v5913_v29 = vld [vmem:[#allocation9] sm:$0xff]  ;;  %v5915_v27 = vld [vmem:[#allocation9 + $0x10] sm:$0xff] }
 0x718   :  { %2589 = vmatpush1.msra.mxu0 %v5889_v30  ;;  %2660 = vmatpush1.msra.mxu1 %v5891_v32  ;;  %6901 = vst [vmem:[#allocation34_spill] sm:$0xff] %v5913_v29  ;;  %6902 = vst [vmem:[#allocation35_spill] sm:$0xff] %v5915_v27  ;;  %v1993_v32 = vld [vmem:[#allocation2 + $0x8] sm:$0xc0] }
 0x719   :  { %2590 = vmatprep.subr.mxu0 %v5897_v33  ;;  %2661 = vmatprep.subr.mxu1 %v5899_v34 }
 0x71a   :  { %2591 = vmatpush1.msra.mxu0 %v5901_v35  ;;  %2662 = vmatpush1.msra.mxu1 %v5905_v36  ;;  %v1994_v36 = vld [vmem:[#allocation2 + $0x20] sm:$0xc0] }
 0x71b   :  { %2592 = vmatprep.subr.mxu0 %v5907_v37  ;;  %2663 = vmatprep.subr.mxu1 %v5909_v38 }
 0x71c   :  { %2593 = vmatpush1.msra.mxu0 %v5913_v29  ;;  %2664 = vmatpush1.msra.mxu1 %v5915_v27  ;;  %v1995_v29 = vld [vmem:[#allocation2 + $0x28] sm:$0xc0] }
 0x71d   :  { %2795 = vmatprep.subr.mxu0 %v5731_v39  ;;  %2866 = vmatprep.subr.mxu1 %v5733_v40  ;;  %v1996_v40 = vld [vmem:[#allocation2 + $0x38] sm:$0xc0] }
 0x79a   :  { %v2130_v34 = vpop.f32.mrf.mxu0  ;;  %v2201_v30 = vpop.f32.mrf.mxu1 }
 0x79b   :  { %v2210_v33 = vrot.slane %v2130_v34, 2  ;;  %v2212_v37 = vrot.slane %v2201_v30, 2 }
 0x79c   :  { %v2132_v26 = vpop.f32.mrf.mxu0  ;;  %v2203_v21 = vpop.f32.mrf.mxu1 }
 0x79d   :  { %v2218_v35 = vadd.f32 %v2210_v33, %v1993_v32  ;;  %v2211_v25 = vrot.slane %v2132_v26, 2  ;;  %v2220_v27 = vadd.f32 %v2212_v37, %v1995_v29  ;;  %v2213_v39 = vrot.slane %v2203_v21, 2  ;;  %v2310_v21 = vld [vmem:[%s6577_s6] sm:$0xf]  ;;  %v6903_v29 = vld [vmem:[#allocation31_spill] sm:$0xff] }
 0x79f   :  { %v2222_v24 = vmul.f32 0.5, %v2218_v35  ;;  %v2219_v23 = vadd.f32 %v2211_v25, %v1994_v36  ;;  %v2221_v20 = vadd.f32 %v2213_v39, %v1996_v40  ;;  %v2236_v25 = vrot.slane %v5724_v31, 6 }
 0x7a0   :  { %v6904_v39 = vsub.s32 0, %v6903_v29 }
 0x7a1   :  { %4709 = vtanh.f32 %v2222_v24  ;;  %v2226_v38 = vmul.f32 0.5, %v2219_v23  ;;  %v2231_v34 = vmul.f32 0.5, %v2221_v20  ;;  %v6907_v20 = vsub.s32 3, %v6903_v29 }
 0x7a2   :  { %v5931_v40 = vrot.slane %v2310_v21, %v6904_v39  ;;  %v6908_v39 = vld [vmem:[#allocation21_spill] sm:$0xff] }
 0x7a3   :  { %4711 = vtanh.f32 %v2226_v38  ;;  %v5943_v35 = vrot.slane %v2310_v21, %v6907_v20  ;;  %v6911_v20 = vld [vmem:[#allocation14_spill] sm:$0xff] }
 0x7a4   :  { %4713 = vtanh.f32 %v2220_v27 }
 0x7a5   :  { %4715 = vtanh.f32 %v2231_v34 }
 0x7ae   :  { %v4710_v19 = vpop.eup %4709 }
 0x7af   :  { %v2224_v18 = vmul.f32 0.5, %v4710_v19  ;;  %v6905_v19 = vsub.s32 2, %v6903_v29 }
 0x7b0   :  { %v4712_v17 = vpop.eup %4711 }
 0x7b1   :  { %v2225_v32 = vadd.f32 0.5, %v2224_v18  ;;  %v2228_v26 = vmul.f32 0.5, %v4712_v17  ;;  %v4714_v24 = vpop.eup %4713  ;;  %v5935_v18 = vrot.slane %v2310_v21, %v6905_v19  ;;  %v6906_v17 = vsub.s32 1, %v6903_v29  ;;  %v6909_v19 = vld [vmem:[#allocation12_spill] sm:$0xff] }
 0x7b3   :  { %v2229_v33 = vadd.f32 0.5, %v2228_v26  ;;  %v2239_v30 = vmul.f32 %v4714_v24, %v2225_v32  ;;  %v5939_v31 = vrot.slane %v2310_v21, %v6906_v17  ;;  %v6910_v17 = vld [vmem:[#allocation23_spill] sm:$0xff] }
 0x7b5   :  { %v2238_v23 = vmul.f32 %v2236_v25, %v2229_v33  ;;  %v4716_v33 = vpop.eup %4715 }
 0x7b7   :  { %v2240_v27 = vadd.f32 %v2239_v30, %v2238_v23  ;;  %v2233_v23 = vmul.f32 0.5, %v4716_v33  ;;  %v6918_v33 = vld [vmem:[#allocation27_spill] sm:$0xff] }
 0x7b9   :  { %4717 = vtanh.f32 %v2240_v27  ;;  %v2234_v30 = vadd.f32 0.5, %v2233_v23  ;;  %v6921_v23 = vld [vmem:[#allocation19_spill] sm:$0xff] }
 0x7bb   :  { %v2398_v36 = vpop.f32.mrf.mxu0  ;;  %v2475_v37 = vpop.f32.mrf.mxu1 }
 0x7bc   :  { %v2399_v38 = vadd.f32 %v2398_v36, %v5931_v40  ;;  %v2476_v34 = vadd.f32 %v2475_v37, %v5935_v18  ;;  %v6912_v36 = vld [vmem:[#allocation24_spill] sm:$0xff]  ;;  %v6913_v37 = vld [vmem:[#allocation15_spill] sm:$0xff] }
 0x7bd   :  { %v2400_v32 = vpop.f32.mrf.mxu0  ;;  %v2477_v26 = vpop.f32.mrf.mxu1 }
 0x7be   :  { %2486 = vst [vmem:[#allocation2 + $0x30] sm:$0xff] %v2399_v38  ;;  %2488 = vst [vmem:[#allocation2 + $0x18] sm:$0xff] %v2476_v34  ;;  %v2401_v25 = vadd.f32 %v2400_v32, %v5939_v31  ;;  %v2478_v24 = vadd.f32 %v2477_v26, %v5943_v35  ;;  %v6914_v38 = vld [vmem:[#allocation25_spill] sm:$0xff]  ;;  %v6915_v34 = vld [vmem:[#allocation16_spill] sm:$0xff] }
 0x7bf   :  { %v6916_v32 = vld [vmem:[#allocation26_spill] sm:$0xff]  ;;  %v6917_v26 = vld [vmem:[#allocation17_spill] sm:$0xff] }
 0x7c0   :  { %2487 = vst [vmem:[#allocation2] sm:$0xff] %v2401_v25  ;;  %2489 = vst [vmem:[#allocation2 + $0x10] sm:$0xff] %v2478_v24  ;;  %v6919_v25 = vld [vmem:[#allocation18_spill] sm:$0xff]  ;;  %v6920_v24 = vld [vmem:[#allocation28_spill] sm:$0xff] }
 0x7c6   :  { %v4718_v21 = vpop.eup %4717 }
 0x7c7   :  { %v2242_v27 = vmul.f32 %v4718_v21, %v2234_v30  ;;  %v6922_v30 = vld [vmem:[#allocation29_spill] sm:$0xff]  ;;  %v6923_v21 = vld [vmem:[#allocation20_spill] sm:$0xff] }
 0x7c9   :  { %2243 = vst [vmem:[#allocation3 + $0x8] sm:$0xc0] %v2242_v27  ;;  %v6924_v27 = vld [vmem:[#allocation30_spill] sm:$0xff] }
 0x7d0   :  { %v2245_v29 = vld [vmem:[#allocation3 + $0x8] sm:$0xff] }
 0x7d1   :  { %2403 = vmatmul.mubr.f32.gmra.mxu0 %v2245_v29  ;;  %2480 = vmatmul.mubr.f32.gmra.mxu1 %v2245_v29  ;;  %v6925_v29 = vld [vmem:[#allocation32_spill] sm:$0xff] }
 0x7d2   :  { %2626 = vmatprep.mubr.f32.mxu0 %v6878_v22  ;;  %2697 = vmatprep.mubr.f32.mxu1 %v6878_v22 }
 0x7d5   :  { %2627 = vmatmul.mubr.f32.vlgmr.msra.gmra.mxu0 %v6878_v22  ;;  %2698 = vmatmul.mubr.f32.vlgmr.msra.gmra.mxu1 %v6878_v22 }
 0x7d6   :  { %2796 = vmatpush1.msra.mxu0 %v5737_v41  ;;  %2867 = vmatpush1.msra.mxu1 %v5739_v47 }
 0x7d7   :  { %2797 = vmatprep.subr.mxu0 %v5743_v42  ;;  %2868 = vmatprep.subr.mxu1 %v5745_v43 }
 0x7d8   :  { %2798 = vmatpush1.msra.mxu0 %v5749_v44  ;;  %2869 = vmatpush1.msra.mxu1 %v5751_v46 }
 0x7d9   :  { %2799 = vmatprep.subr.mxu0 %v5755_v48  ;;  %2870 = vmatprep.subr.mxu1 %v5757_v50 }
 0x7da   :  { %2800 = vmatpush1.msra.mxu0 %v5761_v28  ;;  %2871 = vmatpush1.msra.mxu1 %v5763_v62 }
 0x7db   :  { %2801 = vmatprep.subr.mxu0 %v5767_v55  ;;  %2872 = vmatprep.subr.mxu1 %v5769_v52 }
 0x7dc   :  { %2802 = vmatpush1.msra.mxu0 %v5773_v9  ;;  %2873 = vmatpush1.msra.mxu1 %v5775_v4 }
 0x7dd   :  { %2803 = vmatprep.subr.mxu0 %v5779_v54  ;;  %2874 = vmatprep.subr.mxu1 %v5781_v51 }
 0x7de   :  { %2804 = vmatpush1.msra.mxu0 %v5785_v45  ;;  %2875 = vmatpush1.msra.mxu1 %v5787_v15 }
 0x7df   :  { %2805 = vmatprep.subr.mxu0 %v5791_v57  ;;  %2876 = vmatprep.subr.mxu1 %v5793_v63 }
 0x7e0   :  { %2806 = vmatpush1.msra.mxu0 %v5797_v13  ;;  %2877 = vmatpush1.msra.mxu1 %v5799_v61 }
 0x7e1   :  { %2807 = vmatprep.subr.mxu0 %v5803_v53  ;;  %2878 = vmatprep.subr.mxu1 %v5805_v2 }
 0x7e2   :  { %2808 = vmatpush1.msra.mxu0 %v5809_v56  ;;  %2879 = vmatpush1.msra.mxu1 %v5811_v6 }
 0x7e3   :  { %2809 = vmatprep.subr.mxu0 %v5815_v59  ;;  %2880 = vmatprep.subr.mxu1 %v5817_v58 }
 0x7e4   :  { %2810 = vmatpush1.msra.mxu0 %v5821_v60  ;;  %2881 = vmatpush1.msra.mxu1 %v5823_v49 }
 0x7e5   :  { %2811 = vmatprep.subr.mxu0 %v5827_v3  ;;  %2882 = vmatprep.subr.mxu1 %v5829_v7 }
 0x7e6   :  { %2812 = vmatpush1.msra.mxu0 %v5833_v1  ;;  %2883 = vmatpush1.msra.mxu1 %v5835_v0 }
 0x7e7   :  { %2813 = vmatprep.subr.mxu0 %v5839_v5  ;;  %2884 = vmatprep.subr.mxu1 %v5841_v8 }
 0x7e8   :  { %2814 = vmatpush1.msra.mxu0 %v5845_v10  ;;  %2885 = vmatpush1.msra.mxu1 %v5847_v11 }
 0x7e9   :  { %2815 = vmatprep.subr.mxu0 %v5849_v12  ;;  %2886 = vmatprep.subr.mxu1 %v5853_v14 }
 0x7ea   :  { %2816 = vmatpush1.msra.mxu0 %v5855_v16  ;;  %2887 = vmatpush1.msra.mxu1 %v6908_v39 }
 0x7eb   :  { %2817 = vmatprep.subr.mxu0 %v6909_v19  ;;  %2888 = vmatprep.subr.mxu1 %v6910_v17 }
 0x7ec   :  { %2818 = vmatpush1.msra.mxu0 %v6911_v20  ;;  %2889 = vmatpush1.msra.mxu1 %v6912_v36 }
 0x7ed   :  { %2819 = vmatprep.subr.mxu0 %v6913_v37  ;;  %2890 = vmatprep.subr.mxu1 %v6914_v38 }
 0x7ee   :  { %2820 = vmatpush1.msra.mxu0 %v6915_v34  ;;  %2891 = vmatpush1.msra.mxu1 %v6916_v32  ;;  %v6926_v34 = vld [vmem:[#allocation33_spill] sm:$0xff]  ;;  %v6927_v32 = vld [vmem:[#allocation34_spill] sm:$0xff] }
 0x7ef   :  { %2821 = vmatprep.subr.mxu0 %v6917_v26  ;;  %2892 = vmatprep.subr.mxu1 %v6918_v33  ;;  %v6928_v33 = vld [vmem:[#allocation35_spill] sm:$0xff] }
 0x7f0   :  { %2822 = vmatpush1.msra.mxu0 %v6919_v25  ;;  %2893 = vmatpush1.msra.mxu1 %v6920_v24  ;;  %v6929_v24 = vld [vmem:[#allocation22_spill] sm:$0xff]  ;;  %v2494_v26 = vld [vmem:[#allocation2 + $0x30] sm:$0x3] }
 0x7f1   :  { %2823 = vmatprep.subr.mxu0 %v6921_v23  ;;  %2894 = vmatprep.subr.mxu1 %v6922_v30  ;;  %v6930_v23 = vld [vmem:[#allocation13_spill] sm:$0xff] }
 0x7f2   :  { %2824 = vmatpush1.msra.mxu0 %v6923_v21  ;;  %2895 = vmatpush1.msra.mxu1 %v6924_v27 }
 0x7f3   :  { %2825 = vmatprep.subr.mxu0 %v6925_v29  ;;  %2896 = vmatprep.subr.mxu1 %v6926_v34 }
 0x7f4   :  { %2826 = vmatpush1.msra.mxu0 %v6927_v32  ;;  %2859 = vmatprep.mubr.f32.mxu0 %v6878_v22 }
 0x7f5   :  { %2897 = vmatpush1.msra.mxu1 %v6928_v33  ;;  %2930 = vmatprep.mubr.f32.mxu1 %v6878_v22 }
 0x7f6   :  { %3046 = vmatprep.subr.mxu0 %v6929_v24  ;;  %3117 = vmatprep.subr.mxu1 %v6930_v23  ;;  %v2495_v23 = vld [vmem:[#allocation2] sm:$0x3] }
 0x891   :  { %v2404_v30 = vpop.f32.mrf.mxu0  ;;  %v2481_v21 = vpop.f32.mrf.mxu1 }
 0x892   :  { %v2405_v27 = vadd.f32 %v2404_v30, %v5931_v40  ;;  %v2482_v29 = vadd.f32 %v2481_v21, %v5935_v18  ;;  %v2496_v30 = vld [vmem:[#allocation2 + $0x18] sm:$0x3] }
 0x893   :  { %v2406_v25 = vpop.f32.mrf.mxu0  ;;  %v2483_v34 = vpop.f32.mrf.mxu1 }
 0x894   :  { %2490 = vst [vmem:[#allocation2 + $0x8] sm:$0xff] %v2405_v27  ;;  %2492 = vst [vmem:[#allocation2 + $0x28] sm:$0xff] %v2482_v29  ;;  %v2407_v32 = vadd.f32 %v2406_v25, %v5939_v31  ;;  %v2484_v33 = vadd.f32 %v2483_v34, %v5943_v35  ;;  %v2497_v31 = vld [vmem:[#allocation2 + $0x10] sm:$0x3] }
 0x895   :  { %v2628_v22 = vpop.f32.mrf.mxu0  ;;  %v2699_v40 = vpop.f32.mrf.mxu1 }
 0x896   :  { %2491 = vst [vmem:[#allocation2 + $0x20] sm:$0xff] %v2407_v32  ;;  %2493 = vst [vmem:[#allocation2 + $0x38] sm:$0xff] %v2484_v33  ;;  %v2704_v24 = vadd.f32 %v2628_v22, %v2494_v26  ;;  %v2706_v21 = vadd.f32 %v2699_v40, %v2496_v30 }
 0x897   :  { %v2630_v38 = vpop.f32.mrf.mxu0  ;;  %v2701_v27 = vpop.f32.mrf.mxu1 }
 0x898   :  { %v2708_v37 = vmul.f32 0.5, %v2704_v24  ;;  %v2705_v36 = vadd.f32 %v2630_v38, %v2495_v23  ;;  %v2707_v25 = vadd.f32 %v2701_v27, %v2497_v31 }
 0x89a   :  { %4719 = vtanh.f32 %v2708_v37  ;;  %v2712_v18 = vmul.f32 0.5, %v2705_v36  ;;  %v2717_v35 = vmul.f32 0.5, %v2707_v25 }
 0x89c   :  { %4721 = vtanh.f32 %v2712_v18 }
 0x89d   :  { %4723 = vtanh.f32 %v2706_v21 }
 0x89e   :  { %4725 = vtanh.f32 %v2717_v35 }
 0x8a7   :  { %v4720_v34 = vpop.eup %4719 }
 0x8a8   :  { %v2710_v29 = vmul.f32 0.5, %v4720_v34 }
 0x8a9   :  { %v4722_v32 = vpop.eup %4721 }
 0x8aa   :  { %v2711_v33 = vadd.f32 0.5, %v2710_v29  ;;  %v2714_v22 = vmul.f32 0.5, %v4722_v32  ;;  %v4724_v24 = vpop.eup %4723 }
 0x8ab   :  { %v4726_v36 = vpop.eup %4725 }
 0x8ac   :  { %v2715_v26 = vadd.f32 0.5, %v2714_v22  ;;  %v2722_v23 = vmul.f32 %v4724_v24, %v2711_v33  ;;  %v2719_v40 = vmul.f32 0.5, %v4726_v36  ;;  %v6098_v24 = vld [vmem:[#allocation9 + $0x1f8] sm:$0xff] }
 0x8ad   :  { %6950 = vst [vmem:[#allocation21_spill] sm:$0xff] %v6098_v24  ;;  %v6110_v36 = vld [vmem:[#allocation9 + $0x1d8] sm:$0xff] }
 0x8ae   :  { %v2721_v38 = vmul.f32 0.0, %v2715_v26  ;;  %v2720_v18 = vadd.f32 0.5, %v2719_v40  ;;  %v6096_v26 = vld [vmem:[#allocation9 + $0x1e8] sm:$0xff]  ;;  %v6114_v40 = vld [vmem:[#allocation9 + $0x1c0] sm:$0xff] }
 0x8af   :  { %6949 = vst [vmem:[#allocation31_spill] sm:$0xff] %v6096_v26 }
 0x8b0   :  { %v6023_v37 = vadd.f32 %v2722_v23, %v2721_v38  ;;  %v6102_v38 = vld [vmem:[#allocation9 + $0x1e0] sm:$0xff]  ;;  %v6104_v23 = vld [vmem:[#allocation9 + $0x1f0] sm:$0xff] }
 0x8b2   :  { %4727 = vtanh.f32 %v6023_v37 }
 0x8bf   :  { %v4728_v30 = vpop.eup %4727 }
 0x8c0   :  { %v2725_v21 = vmul.f32 %v4728_v30, %v2720_v18  ;;  %v6116_v18 = vld [vmem:[#allocation9 + $0x1d0] sm:$0xff]  ;;  %v6120_v30 = vld [vmem:[#allocation9 + $0x1a8] sm:$0xff] }
 0x8c2   :  { %2726 = vst [vmem:[#allocation3] sm:$0x3] %v2725_v21  ;;  %2860 = vmatmul.mubr.f32.vlgmr.msra.gmra.mxu0 %v2725_v21  ;;  %2931 = vmatmul.mubr.f32.vlgmr.msra.gmra.mxu1 %v2725_v21  ;;  %v6122_v21 = vld [vmem:[#allocation9 + $0x1b8] sm:$0xff] }
 0x8c3   :  { %3047 = vmatpush1.msra.mxu0 %v5737_v41  ;;  %3118 = vmatpush1.msra.mxu1 %v5739_v47  ;;  %v6931_v41 = vld [vmem:[#allocation24_spill] sm:$0xff]  ;;  %v6932_v47 = vld [vmem:[#allocation15_spill] sm:$0xff] }
 0x8c4   :  { %3048 = vmatprep.subr.mxu0 %v5743_v42  ;;  %3119 = vmatprep.subr.mxu1 %v5745_v43  ;;  %v6933_v42 = vld [vmem:[#allocation25_spill] sm:$0xff]  ;;  %v6934_v43 = vld [vmem:[#allocation16_spill] sm:$0xff] }
 0x8c5   :  { %3049 = vmatpush1.msra.mxu0 %v5749_v44  ;;  %3120 = vmatpush1.msra.mxu1 %v5751_v46  ;;  %v6935_v44 = vld [vmem:[#allocation26_spill] sm:$0xff]  ;;  %v6936_v46 = vld [vmem:[#allocation17_spill] sm:$0xff] }
 0x8c6   :  { %3050 = vmatprep.subr.mxu0 %v5755_v48  ;;  %3121 = vmatprep.subr.mxu1 %v5757_v50  ;;  %v6937_v48 = vld [vmem:[#allocation27_spill] sm:$0xff]  ;;  %v6938_v50 = vld [vmem:[#allocation18_spill] sm:$0xff] }
 0x8c7   :  { %3051 = vmatpush1.msra.mxu0 %v5761_v28  ;;  %3122 = vmatpush1.msra.mxu1 %v5763_v62  ;;  %v6939_v28 = vld [vmem:[#allocation28_spill] sm:$0xff]  ;;  %v6940_v62 = vld [vmem:[#allocation19_spill] sm:$0xff] }
 0x8c8   :  { %3052 = vmatprep.subr.mxu0 %v5767_v55  ;;  %3123 = vmatprep.subr.mxu1 %v5769_v52  ;;  %v6941_v55 = vld [vmem:[#allocation29_spill] sm:$0xff]  ;;  %v6942_v52 = vld [vmem:[#allocation20_spill] sm:$0xff] }
 0x8c9   :  { %3053 = vmatpush1.msra.mxu0 %v5773_v9  ;;  %3124 = vmatpush1.msra.mxu1 %v5775_v4  ;;  %v6943_v9 = vld [vmem:[#allocation30_spill] sm:$0xff]  ;;  %v6944_v4 = vld [vmem:[#allocation32_spill] sm:$0xff] }
 0x8ca   :  { %3054 = vmatprep.subr.mxu0 %v5779_v54  ;;  %3125 = vmatprep.subr.mxu1 %v5781_v51  ;;  %v6945_v54 = vld [vmem:[#allocation33_spill] sm:$0xff]  ;;  %v6946_v51 = vld [vmem:[#allocation34_spill] sm:$0xff] }
 0x8cb   :  { %3055 = vmatpush1.msra.mxu0 %v5785_v45  ;;  %3126 = vmatpush1.msra.mxu1 %v5787_v15  ;;  %v6947_v45 = vmov 0.0   ;;  %v6948_v15 = vld [vmem:[#allocation35_spill] sm:$0xff] }
 0x8cc   :  { %3056 = vmatprep.subr.mxu0 %v5791_v57  ;;  %3127 = vmatprep.subr.mxu1 %v5793_v63 }
 0x8cd   :  { %3057 = vmatpush1.msra.mxu0 %v5797_v13  ;;  %3128 = vmatpush1.msra.mxu1 %v5799_v61  ;;  %v2727_v13 = vld [vmem:[#allocation2 + $0x30] sm:$0xc] }
 0x8ce   :  { %3058 = vmatprep.subr.mxu0 %v5803_v53  ;;  %3129 = vmatprep.subr.mxu1 %v5805_v2 }
 0x8cf   :  { %3059 = vmatpush1.msra.mxu0 %v5809_v56  ;;  %3130 = vmatpush1.msra.mxu1 %v5811_v6  ;;  %v2728_v6 = vld [vmem:[#allocation2] sm:$0xc] }
 0x8d0   :  { %3060 = vmatprep.subr.mxu0 %v5815_v59  ;;  %3131 = vmatprep.subr.mxu1 %v5817_v58 }
 0x8d1   :  { %3061 = vmatpush1.msra.mxu0 %v5821_v60  ;;  %3132 = vmatpush1.msra.mxu1 %v5823_v49 }
 0x8d2   :  { %3062 = vmatprep.subr.mxu0 %v5827_v3  ;;  %3133 = vmatprep.subr.mxu1 %v5829_v7  ;;  %v2729_v3 = vld [vmem:[#allocation2 + $0x18] sm:$0xc] }
 0x8d3   :  { %3063 = vmatpush1.msra.mxu0 %v5833_v1  ;;  %3134 = vmatpush1.msra.mxu1 %v5835_v0 }
 0x8d4   :  { %3064 = vmatprep.subr.mxu0 %v5839_v5  ;;  %3135 = vmatprep.subr.mxu1 %v5841_v8  ;;  %v2730_v5 = vld [vmem:[#allocation2 + $0x10] sm:$0xc] }
 0x8d5   :  { %3065 = vmatpush1.msra.mxu0 %v5845_v10  ;;  %3136 = vmatpush1.msra.mxu1 %v5847_v11 }
 0x8d6   :  { %3066 = vmatprep.subr.mxu0 %v5849_v12  ;;  %3137 = vmatprep.subr.mxu1 %v5853_v14 }
 0x8d7   :  { %3067 = vmatpush1.msra.mxu0 %v5855_v16  ;;  %3138 = vmatpush1.msra.mxu1 %v6908_v39 }
 0x8d8   :  { %3068 = vmatprep.subr.mxu0 %v6909_v19  ;;  %3139 = vmatprep.subr.mxu1 %v6910_v17  ;;  %v2967_v19 = vrot.slane %v6023_v37, 6  ;;  %v6108_v37 = vld [vmem:[#allocation9 + $0x1c8] sm:$0xff] }
 0x8d9   :  { %3069 = vmatpush1.msra.mxu0 %v6911_v20  ;;  %3140 = vmatpush1.msra.mxu1 %v6931_v41  ;;  %v6126_v41 = vld [vmem:[#allocation9 + $0x1a0] sm:$0xff] }
 0x8da   :  { %3070 = vmatprep.subr.mxu0 %v6932_v47  ;;  %3141 = vmatprep.subr.mxu1 %v6933_v42  ;;  %v6128_v47 = vld [vmem:[#allocation9 + $0x1b0] sm:$0xff]  ;;  %v6132_v42 = vld [vmem:[#allocation9 + $0x188] sm:$0xff] }
 0x8db   :  { %3071 = vmatpush1.msra.mxu0 %v6934_v43  ;;  %3142 = vmatpush1.msra.mxu1 %v6935_v44  ;;  %v6134_v43 = vld [vmem:[#allocation9 + $0x198] sm:$0xff]  ;;  %v6138_v44 = vld [vmem:[#allocation9 + $0x180] sm:$0xff] }
 0x8dc   :  { %3072 = vmatprep.subr.mxu0 %v6936_v46  ;;  %3143 = vmatprep.subr.mxu1 %v6937_v48  ;;  %v6140_v46 = vld [vmem:[#allocation9 + $0x190] sm:$0xff]  ;;  %v6144_v48 = vld [vmem:[#allocation9 + $0x168] sm:$0xff] }
 0x8dd   :  { %3073 = vmatpush1.msra.mxu0 %v6938_v50  ;;  %3144 = vmatpush1.msra.mxu1 %v6939_v28  ;;  %v6146_v50 = vld [vmem:[#allocation9 + $0x178] sm:$0xff]  ;;  %v6150_v28 = vld [vmem:[#allocation9 + $0x160] sm:$0xff] }
 0x8de   :  { %3074 = vmatprep.subr.mxu0 %v6940_v62  ;;  %3145 = vmatprep.subr.mxu1 %v6941_v55 }
 0x8df   :  { %3075 = vmatpush1.msra.mxu0 %v6942_v52  ;;  %3146 = vmatpush1.msra.mxu1 %v6943_v9 }
 0x8e0   :  { %3076 = vmatprep.subr.mxu0 %v6944_v4  ;;  %3147 = vmatprep.subr.mxu1 %v6945_v54 }
 0x8e1   :  { %3077 = vmatpush1.msra.mxu0 %v6946_v51  ;;  %3110 = vmatprep.mubr.f32.mxu0 %v6947_v45 }
 0x8e2   :  { %3148 = vmatpush1.msra.mxu1 %v6948_v15  ;;  %3181 = vmatprep.mubr.f32.mxu1 %v6947_v45 }
 0x8e3   :  { %3297 = vmatprep.subr.mxu0 %v6096_v26  ;;  %3368 = vmatprep.subr.mxu1 %v6098_v24 }
 0x982   :  { %v2861_v57 = vpop.f32.mrf.mxu0  ;;  %v2932_v61 = vpop.f32.mrf.mxu1 }
 0x983   :  { %v2941_v63 = vrot.slane %v2861_v57, 6  ;;  %v2943_v58 = vrot.slane %v2932_v61, 6  ;;  %v6152_v57 = vld [vmem:[#allocation9 + $0x170] sm:$0xff]  ;;  %v6162_v61 = vld [vmem:[#allocation9 + $0x140] sm:$0xff] }
 0x984   :  { %v2863_v53 = vpop.f32.mrf.mxu0  ;;  %v2934_v7 = vpop.f32.mrf.mxu1 }
 0x985   :  { %v2949_v2 = vadd.f32 %v2941_v63, %v2727_v13  ;;  %v2942_v56 = vrot.slane %v2863_v53, 6  ;;  %v2951_v1 = vadd.f32 %v2943_v58, %v2729_v3  ;;  %v2944_v0 = vrot.slane %v2934_v7, 6  ;;  %v6156_v63 = vld [vmem:[#allocation9 + $0x148] sm:$0xff]  ;;  %v6158_v13 = vld [vmem:[#allocation9 + $0x158] sm:$0xff]  ;;  %v6164_v53 = vld [vmem:[#allocation9 + $0x150] sm:$0xff] }
 0x986   :  { %v6178_v58 = vld [vmem:[#allocation9 + $0x108] sm:$0xff]  ;;  %v6186_v3 = vld [vmem:[#allocation9 + $0x110] sm:$0xff] }
 0x987   :  { %v2953_v59 = vmul.f32 0.5, %v2949_v2  ;;  %v2950_v60 = vadd.f32 %v2942_v56, %v2728_v6  ;;  %v2952_v8 = vadd.f32 %v2944_v0, %v2730_v5  ;;  %v6168_v2 = vld [vmem:[#allocation9 + $0x128] sm:$0xff]  ;;  %v6170_v56 = vld [vmem:[#allocation9 + $0x138] sm:$0xff]  ;;  %v6172_v6 = vld [vmem:[#allocation9 + $0x120] sm:$0xff] }
 0x988   :  { %v6188_v7 = vld [vmem:[#allocation9 + $0xe8] sm:$0xff]  ;;  %v6194_v0 = vld [vmem:[#allocation9 + $0xe0] sm:$0xff]  ;;  %v6196_v5 = vld [vmem:[#allocation9 + $0xf0] sm:$0xff] }
 0x989   :  { %4729 = vtanh.f32 %v2953_v59  ;;  %v2957_v49 = vmul.f32 0.5, %v2950_v60  ;;  %v2962_v10 = vmul.f32 0.5, %v2952_v8  ;;  %v6176_v59 = vld [vmem:[#allocation9 + $0x130] sm:$0xff]  ;;  %v6180_v60 = vld [vmem:[#allocation9 + $0x118] sm:$0xff]  ;;  %v6200_v8 = vld [vmem:[#allocation9 + $0xc8] sm:$0xff] }
 0x98b   :  { %4731 = vtanh.f32 %v2957_v49  ;;  %v6184_v49 = vld [vmem:[#allocation9 + $0x100] sm:$0xff] }
 0x98c   :  { %4733 = vtanh.f32 %v2951_v1  ;;  %v6192_v1 = vld [vmem:[#allocation9 + $0xf8] sm:$0xff] }
 0x98d   :  { %4735 = vtanh.f32 %v2962_v10  ;;  %v6202_v10 = vld [vmem:[#allocation9 + $0xd8] sm:$0xff] }
 0x996   :  { %v4730_v11 = vpop.eup %4729 }
 0x997   :  { %v2955_v12 = vmul.f32 0.5, %v4730_v11  ;;  %v6206_v11 = vld [vmem:[#allocation9 + $0xc0] sm:$0xff] }
 0x998   :  { %v4732_v14 = vpop.eup %4731 }
 0x999   :  { %v2956_v16 = vadd.f32 0.5, %v2955_v12  ;;  %v2959_v39 = vmul.f32 0.5, %v4732_v14  ;;  %v4734_v20 = vpop.eup %4733  ;;  %v6208_v12 = vld [vmem:[#allocation9 + $0xd0] sm:$0xff]  ;;  %v6212_v14 = vld [vmem:[#allocation9 + $0xa8] sm:$0xff] }
 0x99a   :  { %v4736_v35 = vpop.eup %4735 }
 0x99b   :  { %v2960_v17 = vadd.f32 0.5, %v2959_v39  ;;  %v2970_v31 = vmul.f32 %v4734_v20, %v2956_v16  ;;  %v2964_v34 = vmul.f32 0.5, %v4736_v35  ;;  %v6214_v16 = vld [vmem:[#allocation9 + $0xb8] sm:$0xff]  ;;  %v6218_v39 = vld [vmem:[#allocation9 + $0xa0] sm:$0xff]  ;;  %v6236_v35 = vld [vmem:[#allocation9 + $0x68] sm:$0xff] }
 0x99c   :  { %v6226_v20 = vld [vmem:[#allocation9 + $0x98] sm:$0xff]  ;;  %6955 = vst [vmem:[#allocation13_spill] sm:$0xff] %v6236_v35 }
 0x99d   :  { %v2969_v27 = vmul.f32 %v2967_v19, %v2960_v17  ;;  %v2965_v29 = vadd.f32 0.5, %v2964_v34  ;;  %v6220_v19 = vld [vmem:[#allocation9 + $0xb0] sm:$0xff]  ;;  %v6224_v17 = vld [vmem:[#allocation9 + $0x88] sm:$0xff]  ;;  %6952 = vst [vmem:[#allocation23_spill] sm:$0xff] %v6226_v20  ;;  %v6238_v34 = vld [vmem:[#allocation9 + $0x78] sm:$0xff] }
 0x99e   :  { %6951 = vst [vmem:[#allocation12_spill] sm:$0xff] %v6224_v17  ;;  %6956 = vst [vmem:[#allocation24_spill] sm:$0xff] %v6238_v34 }
 0x99f   :  { %v6091_v25 = vadd.f32 %v2970_v31, %v2969_v27  ;;  %v6230_v27 = vld [vmem:[#allocation9 + $0x80] sm:$0xff]  ;;  %v6232_v31 = vld [vmem:[#allocation9 + $0x90] sm:$0xff] }
 0x9a0   :  { %6953 = vst [vmem:[#allocation14_spill] sm:$0xff] %v6230_v27  ;;  %6954 = vst [vmem:[#allocation22_spill] sm:$0xff] %v6232_v31 }
 0x9a1   :  { %4737 = vtanh.f32 %v6091_v25 }
 0x9ae   :  { %v4738_v32 = vpop.eup %4737 }
 0x9af   :  { %v2973_v33 = vmul.f32 %v4738_v32, %v2965_v29  ;;  %v6242_v29 = vld [vmem:[#allocation9 + $0x60] sm:$0xff]  ;;  %v6244_v32 = vld [vmem:[#allocation9 + $0x70] sm:$0xff] }
 0x9b0   :  { %6957 = vst [vmem:[#allocation15_spill] sm:$0xff] %v6242_v29  ;;  %6958 = vst [vmem:[#allocation25_spill] sm:$0xff] %v6244_v32 }
 0x9b1   :  { %2974 = vst [vmem:[#allocation3] sm:$0xc] %v2973_v33  ;;  %v3044_v22 = vrot.slane %v2973_v33, 2  ;;  %v6248_v33 = vld [vmem:[#allocation9 + $0x48] sm:$0xff] }
 0x9b2   :  { %6959 = vst [vmem:[#allocation16_spill] sm:$0xff] %v6248_v33 }
 0x9b3   :  { %3111 = vmatmul.mubr.f32.vlgmr.msra.gmra.mxu0 %v3044_v22  ;;  %3182 = vmatmul.mubr.f32.vlgmr.msra.gmra.mxu1 %v3044_v22  ;;  %v6250_v22 = vld [vmem:[#allocation9 + $0x58] sm:$0xff] }
 0x9b4   :  { %3361 = vmatprep.mubr.f32.mxu0 %v6947_v45  ;;  %3432 = vmatprep.mubr.f32.mxu1 %v6947_v45  ;;  %6960 = vst [vmem:[#allocation26_spill] sm:$0xff] %v6250_v22  ;;  %v6254_v45 = vld [vmem:[#allocation9 + $0x40] sm:$0xff] }
 0x9b5   :  { %3298 = vmatpush1.msra.mxu0 %v6102_v38  ;;  %3369 = vmatpush1.msra.mxu1 %v6104_v23  ;;  %6961 = vst [vmem:[#allocation17_spill] sm:$0xff] %v6254_v45 }
 0x9b6   :  { %3299 = vmatprep.subr.mxu0 %v6108_v37  ;;  %3370 = vmatprep.subr.mxu1 %v6110_v36 }
 0x9b7   :  { %3300 = vmatpush1.msra.mxu0 %v6114_v40  ;;  %3371 = vmatpush1.msra.mxu1 %v6116_v18 }
 0x9b8   :  { %3301 = vmatprep.subr.mxu0 %v6120_v30  ;;  %3372 = vmatprep.subr.mxu1 %v6122_v21 }
 0x9b9   :  { %3302 = vmatpush1.msra.mxu0 %v6126_v41  ;;  %3373 = vmatpush1.msra.mxu1 %v6128_v47 }
 0x9ba   :  { %3303 = vmatprep.subr.mxu0 %v6132_v42  ;;  %3374 = vmatprep.subr.mxu1 %v6134_v43 }
 0x9bb   :  { %3304 = vmatpush1.msra.mxu0 %v6138_v44  ;;  %3375 = vmatpush1.msra.mxu1 %v6140_v46 }
 0x9bc   :  { %3305 = vmatprep.subr.mxu0 %v6144_v48  ;;  %3376 = vmatprep.subr.mxu1 %v6146_v50 }
 0x9bd   :  { %3306 = vmatpush1.msra.mxu0 %v6150_v28  ;;  %3377 = vmatpush1.msra.mxu1 %v6152_v57 }
 0x9be   :  { %3307 = vmatprep.subr.mxu0 %v6156_v63  ;;  %3378 = vmatprep.subr.mxu1 %v6158_v13 }
 0x9bf   :  { %3308 = vmatpush1.msra.mxu0 %v6162_v61  ;;  %3379 = vmatpush1.msra.mxu1 %v6164_v53 }
 0x9c0   :  { %3309 = vmatprep.subr.mxu0 %v6168_v2  ;;  %3380 = vmatprep.subr.mxu1 %v6170_v56 }
 0x9c1   :  { %3310 = vmatpush1.msra.mxu0 %v6172_v6  ;;  %3381 = vmatpush1.msra.mxu1 %v6176_v59 }
 0x9c2   :  { %3311 = vmatprep.subr.mxu0 %v6178_v58  ;;  %3382 = vmatprep.subr.mxu1 %v6180_v60 }
 0x9c3   :  { %3312 = vmatpush1.msra.mxu0 %v6184_v49  ;;  %3383 = vmatpush1.msra.mxu1 %v6186_v3 }
 0x9c4   :  { %3313 = vmatprep.subr.mxu0 %v6188_v7  ;;  %3384 = vmatprep.subr.mxu1 %v6192_v1 }
 0x9c5   :  { %3314 = vmatpush1.msra.mxu0 %v6194_v0  ;;  %3385 = vmatpush1.msra.mxu1 %v6196_v5 }
 0x9c6   :  { %3315 = vmatprep.subr.mxu0 %v6200_v8  ;;  %3386 = vmatprep.subr.mxu1 %v6202_v10 }
 0x9c7   :  { %3316 = vmatpush1.msra.mxu0 %v6206_v11  ;;  %3387 = vmatpush1.msra.mxu1 %v6208_v12 }
 0x9c8   :  { %3317 = vmatprep.subr.mxu0 %v6212_v14  ;;  %3388 = vmatprep.subr.mxu1 %v6214_v16 }
 0x9c9   :  { %3318 = vmatpush1.msra.mxu0 %v6218_v39  ;;  %3389 = vmatpush1.msra.mxu1 %v6220_v19 }
 0x9ca   :  { %3319 = vmatprep.subr.mxu0 %v6224_v17  ;;  %3390 = vmatprep.subr.mxu1 %v6226_v20  ;;  %v6256_v17 = vld [vmem:[#allocation9 + $0x50] sm:$0xff] }
 0x9cb   :  { %3320 = vmatpush1.msra.mxu0 %v6230_v27  ;;  %3391 = vmatpush1.msra.mxu1 %v6232_v31  ;;  %6962 = vst [vmem:[#allocation27_spill] sm:$0xff] %v6256_v17 }
 0x9cc   :  { %3321 = vmatprep.subr.mxu0 %v6236_v35  ;;  %3392 = vmatprep.subr.mxu1 %v6238_v34 }
 0x9cd   :  { %3322 = vmatpush1.msra.mxu0 %v6242_v29  ;;  %3393 = vmatpush1.msra.mxu1 %v6244_v32 }
 0x9ce   :  { %3323 = vmatprep.subr.mxu0 %v6248_v33  ;;  %3394 = vmatprep.subr.mxu1 %v6250_v22 }
 0x9cf   :  { %3324 = vmatpush1.msra.mxu0 %v6254_v45  ;;  %3395 = vmatpush1.msra.mxu1 %v6256_v17  ;;  %v2975_v45 = vld [vmem:[#allocation2 + $0x30] sm:$0x30] }
 0x9d0   :  { %3325 = vmatprep.subr.mxu0 %v6940_v62  ;;  %3396 = vmatprep.subr.mxu1 %v6941_v55 }
 0x9d1   :  { %3326 = vmatpush1.msra.mxu0 %v6942_v52  ;;  %3397 = vmatpush1.msra.mxu1 %v6943_v9  ;;  %v2976_v9 = vld [vmem:[#allocation2] sm:$0x30] }
 0x9d2   :  { %3327 = vmatprep.subr.mxu0 %v6944_v4  ;;  %3398 = vmatprep.subr.mxu1 %v6945_v54 }
 0x9d3   :  { %3328 = vmatpush1.msra.mxu0 %v6946_v51  ;;  %3399 = vmatpush1.msra.mxu1 %v6948_v15  ;;  %v2977_v51 = vld [vmem:[#allocation2 + $0x18] sm:$0x30] }
 0x9d4   :  { %3548 = vmatprep.subr.mxu0 %v6096_v26  ;;  %3619 = vmatprep.subr.mxu1 %v6098_v24  ;;  %v2978_v24 = vld [vmem:[#allocation2 + $0x10] sm:$0x30] }
 0xa73   :  { %v3112_v17 = vpop.f32.mrf.mxu0  ;;  %v3183_v55 = vpop.f32.mrf.mxu1 }
 0xa74   :  { %v3192_v62 = vrot.slane %v3112_v17, 4  ;;  %v3194_v4 = vrot.slane %v3183_v55, 4 }
 0xa75   :  { %v3114_v22 = vpop.f32.mrf.mxu0  ;;  %v3185_v34 = vpop.f32.mrf.mxu1 }
 0xa76   :  { %v3200_v52 = vadd.f32 %v3192_v62, %v2975_v45  ;;  %v3193_v33 = vrot.slane %v3114_v22, 4  ;;  %v3202_v15 = vadd.f32 %v3194_v4, %v2977_v51  ;;  %v3195_v26 = vrot.slane %v3185_v34, 4  ;;  %v6966_v4 = vld [vmem:[#allocation22_spill] sm:$0xff]  ;;  %v6968_v51 = vld [vmem:[#allocation24_spill] sm:$0xff] }
 0xa78   :  { %v3204_v32 = vmul.f32 0.5, %v3200_v52  ;;  %v3201_v29 = vadd.f32 %v3193_v33, %v2976_v9  ;;  %v3203_v35 = vadd.f32 %v3195_v26, %v2978_v24  ;;  %v3218_v33 = vrot.slane %v6091_v25, 6  ;;  %v6963_v25 = vld [vmem:[#allocation12_spill] sm:$0xff] }
 0xa7a   :  { %4739 = vtanh.f32 %v3204_v32  ;;  %v3208_v54 = vmul.f32 0.5, %v3201_v29  ;;  %v3213_v17 = vmul.f32 0.5, %v3203_v35 }
 0xa7c   :  { %4741 = vtanh.f32 %v3208_v54  ;;  %v6967_v54 = vld [vmem:[#allocation13_spill] sm:$0xff] }
 0xa7d   :  { %4743 = vtanh.f32 %v3202_v15  ;;  %v6969_v15 = vld [vmem:[#allocation15_spill] sm:$0xff] }
 0xa7e   :  { %4745 = vtanh.f32 %v3213_v17  ;;  %v6970_v17 = vld [vmem:[#allocation25_spill] sm:$0xff] }
 0xa87   :  { %v4740_v31 = vpop.eup %4739 }
 0xa88   :  { %v3206_v27 = vmul.f32 0.5, %v4740_v31 }
 0xa89   :  { %v4742_v20 = vpop.eup %4741 }
 0xa8a   :  { %v3207_v45 = vadd.f32 0.5, %v3206_v27  ;;  %v3210_v22 = vmul.f32 0.5, %v4742_v20  ;;  %v4744_v32 = vpop.eup %4743  ;;  %v6964_v20 = vld [vmem:[#allocation23_spill] sm:$0xff]  ;;  %v6965_v27 = vld [vmem:[#allocation14_spill] sm:$0xff] }
 0xa8b   :  { %v4746_v34 = vpop.eup %4745 }
 0xa8c   :  { %v3211_v62 = vadd.f32 0.5, %v3210_v22  ;;  %v3221_v55 = vmul.f32 %v4744_v32, %v3207_v45  ;;  %v3215_v9 = vmul.f32 0.5, %v4746_v34  ;;  %v6971_v45 = vld [vmem:[#allocation16_spill] sm:$0xff]  ;;  %v6972_v22 = vld [vmem:[#allocation26_spill] sm:$0xff]  ;;  %v6975_v32 = vmov 0.0  }
 0xa8d   :  { %v6338_v34 = vld [vmem:[#allocation9 + $0x20] sm:$0xff] }
 0xa8e   :  { %v3220_v29 = vmul.f32 %v3218_v33, %v3211_v62  ;;  %v3216_v26 = vadd.f32 0.5, %v3215_v9  ;;  %v6973_v62 = vld [vmem:[#allocation17_spill] sm:$0xff]  ;;  %v6974_v33 = vld [vmem:[#allocation27_spill] sm:$0xff]  ;;  %6978 = vst [vmem:[#allocation19_spill] sm:$0xff] %v6338_v34  ;;  %v6342_v9 = vld [vmem:[#allocation9 + $0x30] sm:$0xff] }
 0xa8f   :  { %6979 = vst [vmem:[#allocation29_spill] sm:$0xff] %v6342_v9 }
 0xa90   :  { %v6275_v52 = vadd.f32 %v3221_v55, %v3220_v29  ;;  %v6334_v29 = vld [vmem:[#allocation9 + $0x28] sm:$0xff]  ;;  %v6336_v55 = vld [vmem:[#allocation9 + $0x38] sm:$0xff] }
 0xa91   :  { %6976 = vst [vmem:[#allocation18_spill] sm:$0xff] %v6334_v29  ;;  %6977 = vst [vmem:[#allocation28_spill] sm:$0xff] %v6336_v55 }
 0xa92   :  { %4747 = vtanh.f32 %v6275_v52 }
 0xa9f   :  { %v4748_v24 = vpop.eup %4747 }
 0xaa0   :  { %v3224_v35 = vmul.f32 %v4748_v24, %v3216_v26  ;;  %v6344_v26 = vld [vmem:[#allocation9 + $0x8] sm:$0xff]  ;;  %v6346_v24 = vld [vmem:[#allocation9 + $0x18] sm:$0xff] }
 0xaa1   :  { %6980 = vst [vmem:[#allocation20_spill] sm:$0xff] %v6344_v26  ;;  %6981 = vst [vmem:[#allocation30_spill] sm:$0xff] %v6346_v24 }
 0xaa2   :  { %3225 = vst [vmem:[#allocation3] sm:$0x30] %v3224_v35  ;;  %v3295_v31 = vrot.slane %v3224_v35, 4  ;;  %v6350_v35 = vld [vmem:[#allocation9] sm:$0xff] }
 0xaa3   :  { %6982 = vst [vmem:[#allocation32_spill] sm:$0xff] %v6350_v35 }
 0xaa4   :  { %3362 = vmatmul.mubr.f32.vlgmr.msra.gmra.mxu0 %v3295_v31  ;;  %3433 = vmatmul.mubr.f32.vlgmr.msra.gmra.mxu1 %v3295_v31  ;;  %v6352_v31 = vld [vmem:[#allocation9 + $0x10] sm:$0xff] }
 0xaa5   :  { %3549 = vmatpush1.msra.mxu0 %v6102_v38  ;;  %3620 = vmatpush1.msra.mxu1 %v6104_v23  ;;  %6983 = vst [vmem:[#allocation33_spill] sm:$0xff] %v6352_v31 }
 0xaa6   :  { %3550 = vmatprep.subr.mxu0 %v6108_v37  ;;  %3621 = vmatprep.subr.mxu1 %v6110_v36 }
 0xaa7   :  { %3551 = vmatpush1.msra.mxu0 %v6114_v40  ;;  %3622 = vmatpush1.msra.mxu1 %v6116_v18 }
 0xaa8   :  { %3552 = vmatprep.subr.mxu0 %v6120_v30  ;;  %3623 = vmatprep.subr.mxu1 %v6122_v21 }
 0xaa9   :  { %3553 = vmatpush1.msra.mxu0 %v6126_v41  ;;  %3624 = vmatpush1.msra.mxu1 %v6128_v47 }
 0xaaa   :  { %3554 = vmatprep.subr.mxu0 %v6132_v42  ;;  %3625 = vmatprep.subr.mxu1 %v6134_v43 }
 0xaab   :  { %3555 = vmatpush1.msra.mxu0 %v6138_v44  ;;  %3626 = vmatpush1.msra.mxu1 %v6140_v46 }
 0xaac   :  { %3556 = vmatprep.subr.mxu0 %v6144_v48  ;;  %3627 = vmatprep.subr.mxu1 %v6146_v50 }
 0xaad   :  { %3557 = vmatpush1.msra.mxu0 %v6150_v28  ;;  %3628 = vmatpush1.msra.mxu1 %v6152_v57 }
 0xaae   :  { %3558 = vmatprep.subr.mxu0 %v6156_v63  ;;  %3629 = vmatprep.subr.mxu1 %v6158_v13 }
 0xaaf   :  { %3559 = vmatpush1.msra.mxu0 %v6162_v61  ;;  %3630 = vmatpush1.msra.mxu1 %v6164_v53 }
 0xab0   :  { %3560 = vmatprep.subr.mxu0 %v6168_v2  ;;  %3631 = vmatprep.subr.mxu1 %v6170_v56 }
 0xab1   :  { %3561 = vmatpush1.msra.mxu0 %v6172_v6  ;;  %3632 = vmatpush1.msra.mxu1 %v6176_v59 }
 0xab2   :  { %3562 = vmatprep.subr.mxu0 %v6178_v58  ;;  %3633 = vmatprep.subr.mxu1 %v6180_v60 }
 0xab3   :  { %3563 = vmatpush1.msra.mxu0 %v6184_v49  ;;  %3634 = vmatpush1.msra.mxu1 %v6186_v3 }
 0xab4   :  { %3564 = vmatprep.subr.mxu0 %v6188_v7  ;;  %3635 = vmatprep.subr.mxu1 %v6192_v1 }
 0xab5   :  { %3565 = vmatpush1.msra.mxu0 %v6194_v0  ;;  %3636 = vmatpush1.msra.mxu1 %v6196_v5 }
 0xab6   :  { %3566 = vmatprep.subr.mxu0 %v6200_v8  ;;  %3637 = vmatprep.subr.mxu1 %v6202_v10 }
 0xab7   :  { %3567 = vmatpush1.msra.mxu0 %v6206_v11  ;;  %3638 = vmatpush1.msra.mxu1 %v6208_v12 }
 0xab8   :  { %3568 = vmatprep.subr.mxu0 %v6212_v14  ;;  %3639 = vmatprep.subr.mxu1 %v6214_v16 }
 0xab9   :  { %3569 = vmatpush1.msra.mxu0 %v6218_v39  ;;  %3640 = vmatpush1.msra.mxu1 %v6220_v19 }
 0xaba   :  { %3570 = vmatprep.subr.mxu0 %v6963_v25  ;;  %3641 = vmatprep.subr.mxu1 %v6964_v20 }
 0xabb   :  { %3571 = vmatpush1.msra.mxu0 %v6965_v27  ;;  %3642 = vmatpush1.msra.mxu1 %v6966_v4 }
 0xabc   :  { %3572 = vmatprep.subr.mxu0 %v6967_v54  ;;  %3643 = vmatprep.subr.mxu1 %v6968_v51 }
 0xabd   :  { %3573 = vmatpush1.msra.mxu0 %v6969_v15  ;;  %3644 = vmatpush1.msra.mxu1 %v6970_v17  ;;  %v3227_v17 = vld [vmem:[#allocation2] sm:$0xc0] }
 0xabe   :  { %3574 = vmatprep.subr.mxu0 %v6971_v45  ;;  %3645 = vmatprep.subr.mxu1 %v6972_v22 }
 0xabf   :  { %3575 = vmatpush1.msra.mxu0 %v6973_v62  ;;  %3646 = vmatpush1.msra.mxu1 %v6974_v33  ;;  %v3226_v33 = vld [vmem:[#allocation2 + $0x30] sm:$0xc0] }
 0xac0   :  { %3612 = vmatprep.mubr.f32.mxu0 %v6975_v32  ;;  %3683 = vmatprep.mubr.f32.mxu1 %v6975_v32  ;;  %v6984_v32 = vld [vmem:[#allocation31_spill] sm:$0xff] }
 0xac1   :  { %3576 = vmatprep.subr.mxu0 %v6334_v29  ;;  %3647 = vmatprep.subr.mxu1 %v6336_v55  ;;  %v6985_v55 = vld [vmem:[#allocation21_spill] sm:$0xff] }
 0xac2   :  { %3577 = vmatpush1.msra.mxu0 %v6338_v34  ;;  %3648 = vmatpush1.msra.mxu1 %v6342_v9 }
 0xac3   :  { %3578 = vmatprep.subr.mxu0 %v6344_v26  ;;  %3649 = vmatprep.subr.mxu1 %v6346_v24 }
 0xac4   :  { %3579 = vmatpush1.msra.mxu0 %v6350_v35  ;;  %3650 = vmatpush1.msra.mxu1 %v6352_v31  ;;  %v3228_v35 = vld [vmem:[#allocation2 + $0x18] sm:$0xc0] }
 0xac5   :  { %3784 = vmatprep.subr.mxu0 %v6984_v32  ;;  %3855 = vmatprep.subr.mxu1 %v6985_v55  ;;  %v3229_v55 = vld [vmem:[#allocation2 + $0x10] sm:$0xc0] }
 0xb64   :  { %v3363_v29 = vpop.f32.mrf.mxu0  ;;  %v3434_v9 = vpop.f32.mrf.mxu1 }
 0xb65   :  { %v3443_v34 = vrot.slane %v3363_v29, 2  ;;  %v3445_v26 = vrot.slane %v3434_v9, 2 }
 0xb66   :  { %v3365_v62 = vpop.f32.mrf.mxu0  ;;  %v3436_v54 = vpop.f32.mrf.mxu1 }
 0xb67   :  { %v3451_v22 = vadd.f32 %v3443_v34, %v3226_v33  ;;  %v3444_v45 = vrot.slane %v3365_v62, 2  ;;  %v3453_v31 = vadd.f32 %v3445_v26, %v3228_v35  ;;  %v3446_v32 = vrot.slane %v3436_v54, 2  ;;  %v6989_v26 = vld [vmem:[#allocation22_spill] sm:$0xff]  ;;  %v6991_v35 = vld [vmem:[#allocation24_spill] sm:$0xff] }
 0xb69   :  { %v3455_v15 = vmul.f32 0.5, %v3451_v22  ;;  %v3452_v51 = vadd.f32 %v3444_v45, %v3227_v17  ;;  %v3454_v4 = vadd.f32 %v3446_v32, %v3229_v55  ;;  %v3469_v17 = vrot.slane %v6275_v52, 6  ;;  %v6986_v52 = vld [vmem:[#allocation12_spill] sm:$0xff] }
 0xb6b   :  { %4749 = vtanh.f32 %v3455_v15  ;;  %v3459_v24 = vmul.f32 0.5, %v3452_v51  ;;  %v3464_v29 = vmul.f32 0.5, %v3454_v4 }
 0xb6d   :  { %4751 = vtanh.f32 %v3459_v24  ;;  %v6990_v24 = vld [vmem:[#allocation13_spill] sm:$0xff] }
 0xb6e   :  { %4753 = vtanh.f32 %v3453_v31  ;;  %v6992_v31 = vld [vmem:[#allocation15_spill] sm:$0xff] }
 0xb6f   :  { %4755 = vtanh.f32 %v3464_v29  ;;  %v6993_v29 = vld [vmem:[#allocation25_spill] sm:$0xff] }
 0xb78   :  { %v4750_v27 = vpop.eup %4749 }
 0xb79   :  { %v3457_v20 = vmul.f32 0.5, %v4750_v27 }
 0xb7a   :  { %v4752_v25 = vpop.eup %4751 }
 0xb7b   :  { %v3458_v33 = vadd.f32 0.5, %v3457_v20  ;;  %v3461_v62 = vmul.f32 0.5, %v4752_v25  ;;  %v4754_v15 = vpop.eup %4753  ;;  %v6987_v25 = vld [vmem:[#allocation23_spill] sm:$0xff]  ;;  %v6988_v20 = vld [vmem:[#allocation14_spill] sm:$0xff] }
 0xb7c   :  { %v4756_v54 = vpop.eup %4755 }
 0xb7d   :  { %v3462_v22 = vadd.f32 0.5, %v3461_v62  ;;  %v3472_v45 = vmul.f32 %v4754_v15, %v3458_v33  ;;  %v3466_v9 = vmul.f32 0.5, %v4756_v54  ;;  %v6994_v33 = vld [vmem:[#allocation16_spill] sm:$0xff]  ;;  %v6995_v62 = vld [vmem:[#allocation26_spill] sm:$0xff]  ;;  %v7001_v54 = vld [vmem:[#allocation29_spill] sm:$0xff] }
 0xb7e   :  { %v6998_v15 = vld [vmem:[#allocation18_spill] sm:$0xff] }
 0xb7f   :  { %v3471_v51 = vmul.f32 %v3469_v17, %v3462_v22  ;;  %v3467_v32 = vadd.f32 0.5, %v3466_v9  ;;  %v6996_v22 = vld [vmem:[#allocation17_spill] sm:$0xff]  ;;  %v6997_v17 = vld [vmem:[#allocation27_spill] sm:$0xff]  ;;  %v7002_v9 = vld [vmem:[#allocation20_spill] sm:$0xff] }
 0xb81   :  { %v6361_v34 = vadd.f32 %v3472_v45, %v3471_v51  ;;  %v6999_v51 = vld [vmem:[#allocation28_spill] sm:$0xff]  ;;  %v7000_v45 = vld [vmem:[#allocation19_spill] sm:$0xff] }
 0xb83   :  { %4757 = vtanh.f32 %v6361_v34 }
 0xb90   :  { %v4758_v4 = vpop.eup %4757 }
 0xb91   :  { %v3475_v55 = vmul.f32 %v4758_v4, %v3467_v32  ;;  %v7003_v32 = vld [vmem:[#allocation30_spill] sm:$0xff]  ;;  %v7004_v4 = vld [vmem:[#allocation32_spill] sm:$0xff] }
 0xb93   :  { %3476 = vst [vmem:[#allocation3] sm:$0xc0] %v3475_v55  ;;  %v3546_v27 = vrot.slane %v3475_v55, 6  ;;  %v7005_v55 = vmov 0.0  }
 0xb95   :  { %3613 = vmatmul.mubr.f32.vlgmr.msra.gmra.mxu0 %v3546_v27  ;;  %3684 = vmatmul.mubr.f32.vlgmr.msra.gmra.mxu1 %v3546_v27  ;;  %v7006_v27 = vld [vmem:[#allocation33_spill] sm:$0xff] }
 0xb96   :  { %3785 = vmatpush1.msra.mxu0 %v6102_v38  ;;  %3856 = vmatpush1.msra.mxu1 %v6104_v23 }
 0xb97   :  { %3786 = vmatprep.subr.mxu0 %v6108_v37  ;;  %3857 = vmatprep.subr.mxu1 %v6110_v36 }
 0xb98   :  { %3787 = vmatpush1.msra.mxu0 %v6114_v40  ;;  %3858 = vmatpush1.msra.mxu1 %v6116_v18 }
 0xb99   :  { %3788 = vmatprep.subr.mxu0 %v6120_v30  ;;  %3859 = vmatprep.subr.mxu1 %v6122_v21 }
 0xb9a   :  { %3789 = vmatpush1.msra.mxu0 %v6126_v41  ;;  %3860 = vmatpush1.msra.mxu1 %v6128_v47 }
 0xb9b   :  { %3790 = vmatprep.subr.mxu0 %v6132_v42  ;;  %3861 = vmatprep.subr.mxu1 %v6134_v43 }
 0xb9c   :  { %3791 = vmatpush1.msra.mxu0 %v6138_v44  ;;  %3862 = vmatpush1.msra.mxu1 %v6140_v46 }
 0xb9d   :  { %3792 = vmatprep.subr.mxu0 %v6144_v48  ;;  %3863 = vmatprep.subr.mxu1 %v6146_v50 }
 0xb9e   :  { %3793 = vmatpush1.msra.mxu0 %v6150_v28  ;;  %3864 = vmatpush1.msra.mxu1 %v6152_v57 }
 0xb9f   :  { %3794 = vmatprep.subr.mxu0 %v6156_v63  ;;  %3865 = vmatprep.subr.mxu1 %v6158_v13 }
 0xba0   :  { %3795 = vmatpush1.msra.mxu0 %v6162_v61  ;;  %3866 = vmatpush1.msra.mxu1 %v6164_v53 }
 0xba1   :  { %3796 = vmatprep.subr.mxu0 %v6168_v2  ;;  %3867 = vmatprep.subr.mxu1 %v6170_v56 }
 0xba2   :  { %3797 = vmatpush1.msra.mxu0 %v6172_v6  ;;  %3868 = vmatpush1.msra.mxu1 %v6176_v59 }
 0xba3   :  { %3798 = vmatprep.subr.mxu0 %v6178_v58  ;;  %3869 = vmatprep.subr.mxu1 %v6180_v60 }
 0xba4   :  { %3799 = vmatpush1.msra.mxu0 %v6184_v49  ;;  %3870 = vmatpush1.msra.mxu1 %v6186_v3 }
 0xba5   :  { %3800 = vmatprep.subr.mxu0 %v6188_v7  ;;  %3871 = vmatprep.subr.mxu1 %v6192_v1 }
 0xba6   :  { %3801 = vmatpush1.msra.mxu0 %v6194_v0  ;;  %3872 = vmatpush1.msra.mxu1 %v6196_v5 }
 0xba7   :  { %3802 = vmatprep.subr.mxu0 %v6200_v8  ;;  %3873 = vmatprep.subr.mxu1 %v6202_v10 }
 0xba8   :  { %3803 = vmatpush1.msra.mxu0 %v6206_v11  ;;  %3874 = vmatpush1.msra.mxu1 %v6208_v12 }
 0xba9   :  { %3804 = vmatprep.subr.mxu0 %v6212_v14  ;;  %3875 = vmatprep.subr.mxu1 %v6214_v16 }
 0xbaa   :  { %3805 = vmatpush1.msra.mxu0 %v6218_v39  ;;  %3876 = vmatpush1.msra.mxu1 %v6220_v19 }
 0xbab   :  { %3806 = vmatprep.subr.mxu0 %v6986_v52  ;;  %3877 = vmatprep.subr.mxu1 %v6987_v25 }
 0xbac   :  { %3807 = vmatpush1.msra.mxu0 %v6988_v20  ;;  %3878 = vmatpush1.msra.mxu1 %v6989_v26 }
 0xbad   :  { %3808 = vmatprep.subr.mxu0 %v6990_v24  ;;  %3879 = vmatprep.subr.mxu1 %v6991_v35 }
 0xbae   :  { %3809 = vmatpush1.msra.mxu0 %v6992_v31  ;;  %3880 = vmatpush1.msra.mxu1 %v6993_v29  ;;  %v3479_v29 = vld [vmem:[#allocation2 + $0x28] sm:$0x3] }
 0xbaf   :  { %3810 = vmatprep.subr.mxu0 %v6994_v33  ;;  %3881 = vmatprep.subr.mxu1 %v6995_v62 }
 0xbb0   :  { %3811 = vmatpush1.msra.mxu0 %v6996_v22  ;;  %3882 = vmatpush1.msra.mxu1 %v6997_v17  ;;  %v7007_v17 = vld [vmem:[#allocation31_spill] sm:$0xff] }
 0xbb1   :  { %3812 = vmatprep.subr.mxu0 %v6998_v15  ;;  %3883 = vmatprep.subr.mxu1 %v6999_v51  ;;  %v7008_v15 = vld [vmem:[#allocation21_spill] sm:$0xff]  ;;  %v3477_v51 = vld [vmem:[#allocation2 + $0x8] sm:$0x3] }
 0xbb2   :  { %3813 = vmatpush1.msra.mxu0 %v7000_v45  ;;  %3884 = vmatpush1.msra.mxu1 %v7001_v54  ;;  %v3478_v54 = vld [vmem:[#allocation2 + $0x20] sm:$0x3] }
 0xbb3   :  { %3814 = vmatprep.subr.mxu0 %v7002_v9  ;;  %3885 = vmatprep.subr.mxu1 %v7003_v32 }
 0xbb4   :  { %3815 = vmatpush1.msra.mxu0 %v7004_v4  ;;  %3848 = vmatprep.mubr.f32.mxu0 %v7005_v55 }
 0xbb5   :  { %3886 = vmatpush1.msra.mxu1 %v7006_v27  ;;  %3919 = vmatprep.mubr.f32.mxu1 %v7005_v55  ;;  %v3480_v55 = vld [vmem:[#allocation2 + $0x38] sm:$0x3] }
 0xbb6   :  { %4035 = vmatprep.subr.mxu0 %v7007_v17  ;;  %4106 = vmatprep.subr.mxu1 %v7008_v15 }
 0xc55   :  { %v3614_v45 = vpop.f32.mrf.mxu0  ;;  %v3685_v32 = vpop.f32.mrf.mxu1 }
 0xc56   :  { %v3690_v22 = vadd.f32 %v3614_v45, %v3477_v51  ;;  %v3692_v31 = vadd.f32 %v3685_v32, %v3479_v29 }
 0xc57   :  { %v3616_v62 = vpop.f32.mrf.mxu0  ;;  %v3687_v27 = vpop.f32.mrf.mxu1 }
 0xc58   :  { %v3694_v9 = vmul.f32 0.5, %v3690_v22  ;;  %v3691_v33 = vadd.f32 %v3616_v62, %v3478_v54  ;;  %v3693_v35 = vadd.f32 %v3687_v27, %v3480_v55  ;;  %v3708_v62 = vrot.slane %v6361_v34, 6 }
 0xc5a   :  { %4759 = vtanh.f32 %v3694_v9  ;;  %v3698_v4 = vmul.f32 0.5, %v3691_v33  ;;  %v3703_v17 = vmul.f32 0.5, %v3693_v35 }
 0xc5c   :  { %4761 = vtanh.f32 %v3698_v4 }
 0xc5d   :  { %4763 = vtanh.f32 %v3692_v31 }
 0xc5e   :  { %4765 = vtanh.f32 %v3703_v17 }
 0xc67   :  { %v4760_v24 = vpop.eup %4759 }
 0xc68   :  { %v3696_v15 = vmul.f32 0.5, %v4760_v24 }
 0xc69   :  { %v4762_v26 = vpop.eup %4761 }
 0xc6a   :  { %v3697_v20 = vadd.f32 0.5, %v3696_v15  ;;  %v3700_v51 = vmul.f32 0.5, %v4762_v26  ;;  %v4764_v22 = vpop.eup %4763 }
 0xc6b   :  { %v4766_v31 = vpop.eup %4765 }
 0xc6c   :  { %v3701_v45 = vadd.f32 0.5, %v3700_v51  ;;  %v3711_v33 = vmul.f32 %v4764_v22, %v3697_v20  ;;  %v3705_v29 = vmul.f32 0.5, %v4766_v31  ;;  %v4280_v22 = vld [vmem:[#allocation9 + $0x1e8] sm:$0xff] }
 0xc6d   :  { %v4276_v31 = vld [vmem:[#allocation9 + $0x1c8] sm:$0xff] }
 0xc6e   :  { %v3710_v54 = vmul.f32 %v3708_v62, %v3701_v45  ;;  %v3706_v32 = vadd.f32 0.5, %v3705_v29  ;;  %v4278_v29 = vld [vmem:[#allocation9 + $0x1d8] sm:$0xff] }
 0xc70   :  { %v6431_v9 = vadd.f32 %v3711_v33, %v3710_v54  ;;  %v4282_v54 = vld [vmem:[#allocation9 + $0x1f8] sm:$0xff]  ;;  %v4279_v33 = vld [vmem:[#allocation9 + $0x1e0] sm:$0xff] }
 0xc72   :  { %4767 = vtanh.f32 %v6431_v9 }
 0xc7f   :  { %v4768_v35 = vpop.eup %4767 }
 0xc80   :  { %v3714_v4 = vmul.f32 %v4768_v35, %v3706_v32  ;;  %v4275_v32 = vld [vmem:[#allocation9 + $0x1c0] sm:$0xff]  ;;  %v4277_v35 = vld [vmem:[#allocation9 + $0x1d0] sm:$0xff] }
 0xc82   :  { %3715 = vst [vmem:[#allocation3 + $0x8] sm:$0x3] %v3714_v4  ;;  %3849 = vmatmul.mubr.f32.vlgmr.msra.gmra.mxu0 %v3714_v4  ;;  %3920 = vmatmul.mubr.f32.vlgmr.msra.gmra.mxu1 %v3714_v4  ;;  %v4272_v4 = vld [vmem:[#allocation9 + $0x1a8] sm:$0xff] }
 0xc83   :  { %4036 = vmatpush1.msra.mxu0 %v6102_v38  ;;  %4107 = vmatpush1.msra.mxu1 %v6104_v23  ;;  %v7009_v38 = vld [vmem:[#allocation14_spill] sm:$0xff] }
 0xc84   :  { %4037 = vmatprep.subr.mxu0 %v6108_v37  ;;  %4108 = vmatprep.subr.mxu1 %v6110_v36  ;;  %v7010_v23 = vld [vmem:[#allocation22_spill] sm:$0xff]  ;;  %v7011_v37 = vld [vmem:[#allocation13_spill] sm:$0xff]  ;;  %v7012_v36 = vld [vmem:[#allocation24_spill] sm:$0xff] }
 0xc85   :  { %4038 = vmatpush1.msra.mxu0 %v6114_v40  ;;  %4109 = vmatpush1.msra.mxu1 %v6116_v18  ;;  %v7013_v40 = vld [vmem:[#allocation15_spill] sm:$0xff]  ;;  %v7014_v18 = vld [vmem:[#allocation25_spill] sm:$0xff] }
 0xc86   :  { %4039 = vmatprep.subr.mxu0 %v6120_v30  ;;  %4110 = vmatprep.subr.mxu1 %v6122_v21  ;;  %v7015_v30 = vld [vmem:[#allocation16_spill] sm:$0xff]  ;;  %v7016_v21 = vld [vmem:[#allocation26_spill] sm:$0xff] }
 0xc87   :  { %4040 = vmatpush1.msra.mxu0 %v6126_v41  ;;  %4111 = vmatpush1.msra.mxu1 %v6128_v47  ;;  %v7017_v41 = vld [vmem:[#allocation17_spill] sm:$0xff]  ;;  %v7018_v47 = vld [vmem:[#allocation27_spill] sm:$0xff] }
 0xc88   :  { %4041 = vmatprep.subr.mxu0 %v6132_v42  ;;  %4112 = vmatprep.subr.mxu1 %v6134_v43  ;;  %v7019_v42 = vld [vmem:[#allocation18_spill] sm:$0xff]  ;;  %v7020_v43 = vld [vmem:[#allocation28_spill] sm:$0xff] }
 0xc89   :  { %4042 = vmatpush1.msra.mxu0 %v6138_v44  ;;  %4113 = vmatpush1.msra.mxu1 %v6140_v46  ;;  %v7021_v44 = vld [vmem:[#allocation19_spill] sm:$0xff]  ;;  %v7022_v46 = vld [vmem:[#allocation29_spill] sm:$0xff] }
 0xc8a   :  { %4043 = vmatprep.subr.mxu0 %v6144_v48  ;;  %4114 = vmatprep.subr.mxu1 %v6146_v50  ;;  %v7023_v48 = vld [vmem:[#allocation20_spill] sm:$0xff]  ;;  %v7024_v50 = vld [vmem:[#allocation30_spill] sm:$0xff] }
 0xc8b   :  { %4044 = vmatpush1.msra.mxu0 %v6150_v28  ;;  %4115 = vmatpush1.msra.mxu1 %v6152_v57  ;;  %v7025_v28 = vld [vmem:[#allocation32_spill] sm:$0xff]  ;;  %v7026_v57 = vmov 0.0  }
 0xc8c   :  { %4045 = vmatprep.subr.mxu0 %v6156_v63  ;;  %4116 = vmatprep.subr.mxu1 %v6158_v13  ;;  %v7027_v63 = vld [vmem:[#allocation33_spill] sm:$0xff] }
 0xc8d   :  { %4046 = vmatpush1.msra.mxu0 %v6162_v61  ;;  %4117 = vmatpush1.msra.mxu1 %v6164_v53  ;;  %v3716_v53 = vld [vmem:[#allocation2 + $0x8] sm:$0xc] }
 0xc8e   :  { %4047 = vmatprep.subr.mxu0 %v6168_v2  ;;  %4118 = vmatprep.subr.mxu1 %v6170_v56 }
 0xc8f   :  { %4048 = vmatpush1.msra.mxu0 %v6172_v6  ;;  %4119 = vmatpush1.msra.mxu1 %v6176_v59 }
 0xc90   :  { %4049 = vmatprep.subr.mxu0 %v6178_v58  ;;  %4120 = vmatprep.subr.mxu1 %v6180_v60  ;;  %v3717_v58 = vld [vmem:[#allocation2 + $0x20] sm:$0xc] }
 0xc91   :  { %4050 = vmatpush1.msra.mxu0 %v6184_v49  ;;  %4121 = vmatpush1.msra.mxu1 %v6186_v3 }
 0xc92   :  { %4051 = vmatprep.subr.mxu0 %v6188_v7  ;;  %4122 = vmatprep.subr.mxu1 %v6192_v1  ;;  %v3718_v1 = vld [vmem:[#allocation2 + $0x28] sm:$0xc] }
 0xc93   :  { %4052 = vmatpush1.msra.mxu0 %v6194_v0  ;;  %4123 = vmatpush1.msra.mxu1 %v6196_v5 }
 0xc94   :  { %4053 = vmatprep.subr.mxu0 %v6200_v8  ;;  %4124 = vmatprep.subr.mxu1 %v6202_v10  ;;  %v3719_v10 = vld [vmem:[#allocation2 + $0x38] sm:$0xc] }
 0xc95   :  { %4054 = vmatpush1.msra.mxu0 %v6206_v11  ;;  %4125 = vmatpush1.msra.mxu1 %v6208_v12 }
 0xc96   :  { %4055 = vmatprep.subr.mxu0 %v6212_v14  ;;  %4126 = vmatprep.subr.mxu1 %v6214_v16 }
 0xc97   :  { %4056 = vmatpush1.msra.mxu0 %v6218_v39  ;;  %4127 = vmatpush1.msra.mxu1 %v6220_v19 }
 0xc98   :  { %4057 = vmatprep.subr.mxu0 %v6986_v52  ;;  %4128 = vmatprep.subr.mxu1 %v6987_v25  ;;  %v3956_v25 = vrot.slane %v6431_v9, 6  ;;  %v4281_v9 = vld [vmem:[#allocation9 + $0x1f0] sm:$0xff] }
 0xc99   :  { %4058 = vmatpush1.msra.mxu0 %v7009_v38  ;;  %4129 = vmatpush1.msra.mxu1 %v7010_v23  ;;  %v4274_v38 = vld [vmem:[#allocation9 + $0x1b8] sm:$0xff]  ;;  %v4271_v23 = vld [vmem:[#allocation9 + $0x1a0] sm:$0xff] }
 0xc9a   :  { %4059 = vmatprep.subr.mxu0 %v7011_v37  ;;  %4130 = vmatprep.subr.mxu1 %v7012_v36  ;;  %v4273_v37 = vld [vmem:[#allocation9 + $0x1b0] sm:$0xff]  ;;  %v4268_v36 = vld [vmem:[#allocation9 + $0x188] sm:$0xff] }
 0xc9b   :  { %4060 = vmatpush1.msra.mxu0 %v7013_v40  ;;  %4131 = vmatpush1.msra.mxu1 %v7014_v18  ;;  %v4270_v40 = vld [vmem:[#allocation9 + $0x198] sm:$0xff]  ;;  %v4267_v18 = vld [vmem:[#allocation9 + $0x180] sm:$0xff] }
 0xc9c   :  { %4061 = vmatprep.subr.mxu0 %v7015_v30  ;;  %4132 = vmatprep.subr.mxu1 %v7016_v21  ;;  %v4269_v30 = vld [vmem:[#allocation9 + $0x190] sm:$0xff]  ;;  %v4264_v21 = vld [vmem:[#allocation9 + $0x168] sm:$0xff] }
 0xc9d   :  { %4062 = vmatpush1.msra.mxu0 %v7017_v41  ;;  %4133 = vmatpush1.msra.mxu1 %v7018_v47  ;;  %v4266_v41 = vld [vmem:[#allocation9 + $0x178] sm:$0xff]  ;;  %v4263_v47 = vld [vmem:[#allocation9 + $0x160] sm:$0xff] }
 0xc9e   :  { %4063 = vmatprep.subr.mxu0 %v7019_v42  ;;  %4134 = vmatprep.subr.mxu1 %v7020_v43 }
 0xc9f   :  { %4064 = vmatpush1.msra.mxu0 %v7021_v44  ;;  %4135 = vmatpush1.msra.mxu1 %v7022_v46 }
 0xca0   :  { %4065 = vmatprep.subr.mxu0 %v7023_v48  ;;  %4136 = vmatprep.subr.mxu1 %v7024_v50 }
 0xca1   :  { %4066 = vmatpush1.msra.mxu0 %v7025_v28  ;;  %4099 = vmatprep.mubr.f32.mxu0 %v7026_v57 }
 0xca2   :  { %4137 = vmatpush1.msra.mxu1 %v7027_v63  ;;  %4170 = vmatprep.mubr.f32.mxu1 %v7026_v57 }
 0xca3   :  { %4286 = vmatprep.subr.mxu0 %v4280_v22  ;;  %4357 = vmatprep.subr.mxu1 %v4282_v54  ;;  %v4229_v22 = vld [vmem:[#allocation9 + $0x50] sm:$0xff] }
 0xd42   :  { %v3850_v13 = vpop.f32.mrf.mxu0  ;;  %v3921_v2 = vpop.f32.mrf.mxu1 }
 0xd43   :  { %v3930_v61 = vrot.slane %v3850_v13, 6  ;;  %v3932_v49 = vrot.slane %v3921_v2, 6  ;;  %v4260_v13 = vld [vmem:[#allocation9 + $0x148] sm:$0xff]  ;;  %v4261_v2 = vld [vmem:[#allocation9 + $0x150] sm:$0xff] }
 0xd44   :  { %v3852_v56 = vpop.f32.mrf.mxu0  ;;  %v3923_v0 = vpop.f32.mrf.mxu1 }
 0xd45   :  { %v3938_v6 = vadd.f32 %v3930_v61, %v3716_v53  ;;  %v3931_v59 = vrot.slane %v3852_v56, 6  ;;  %v3940_v5 = vadd.f32 %v3932_v49, %v3718_v1  ;;  %v3933_v8 = vrot.slane %v3923_v0, 6  ;;  %v4262_v61 = vld [vmem:[#allocation9 + $0x158] sm:$0xff]  ;;  %v4259_v53 = vld [vmem:[#allocation9 + $0x140] sm:$0xff]  ;;  %v4256_v56 = vld [vmem:[#allocation9 + $0x128] sm:$0xff] }
 0xd46   :  { %v4254_v49 = vld [vmem:[#allocation9 + $0x118] sm:$0xff]  ;;  %v4248_v1 = vld [vmem:[#allocation9 + $0xe8] sm:$0xff] }
 0xd47   :  { %v3942_v60 = vmul.f32 0.5, %v3938_v6  ;;  %v3939_v3 = vadd.f32 %v3931_v59, %v3717_v58  ;;  %v3941_v11 = vadd.f32 %v3933_v8, %v3719_v10  ;;  %v4258_v6 = vld [vmem:[#allocation9 + $0x138] sm:$0xff]  ;;  %v4255_v59 = vld [vmem:[#allocation9 + $0x120] sm:$0xff]  ;;  %v4257_v58 = vld [vmem:[#allocation9 + $0x130] sm:$0xff] }
 0xd48   :  { %v4250_v0 = vld [vmem:[#allocation9 + $0xf8] sm:$0xff]  ;;  %v4249_v8 = vld [vmem:[#allocation9 + $0xf0] sm:$0xff]  ;;  %v4244_v10 = vld [vmem:[#allocation9 + $0xc8] sm:$0xff] }
 0xd49   :  { %4769 = vtanh.f32 %v3942_v60  ;;  %v3946_v7 = vmul.f32 0.5, %v3939_v3  ;;  %v3951_v12 = vmul.f32 0.5, %v3941_v11  ;;  %v4252_v60 = vld [vmem:[#allocation9 + $0x108] sm:$0xff]  ;;  %v4251_v3 = vld [vmem:[#allocation9 + $0x100] sm:$0xff]  ;;  %v4246_v11 = vld [vmem:[#allocation9 + $0xd8] sm:$0xff] }
 0xd4b   :  { %4771 = vtanh.f32 %v3946_v7  ;;  %v4253_v7 = vld [vmem:[#allocation9 + $0x110] sm:$0xff] }
 0xd4c   :  { %4773 = vtanh.f32 %v3940_v5  ;;  %v4247_v5 = vld [vmem:[#allocation9 + $0xe0] sm:$0xff] }
 0xd4d   :  { %4775 = vtanh.f32 %v3951_v12  ;;  %v4243_v12 = vld [vmem:[#allocation9 + $0xc0] sm:$0xff] }
 0xd56   :  { %v4770_v14 = vpop.eup %4769 }
 0xd57   :  { %v3944_v16 = vmul.f32 0.5, %v4770_v14  ;;  %v4245_v14 = vld [vmem:[#allocation9 + $0xd0] sm:$0xff] }
 0xd58   :  { %v4772_v39 = vpop.eup %4771 }
 0xd59   :  { %v3945_v19 = vadd.f32 0.5, %v3944_v16  ;;  %v3948_v34 = vmul.f32 0.5, %v4772_v39  ;;  %v4774_v20 = vpop.eup %4773  ;;  %v4240_v16 = vld [vmem:[#allocation9 + $0xa8] sm:$0xff]  ;;  %v4242_v39 = vld [vmem:[#allocation9 + $0xb8] sm:$0xff] }
 0xd5a   :  { %v4776_v27 = vpop.eup %4775 }
 0xd5b   :  { %v3949_v52 = vadd.f32 0.5, %v3948_v34  ;;  %v3959_v24 = vmul.f32 %v4774_v20, %v3945_v19  ;;  %v3953_v17 = vmul.f32 0.5, %v4776_v27  ;;  %v4239_v19 = vld [vmem:[#allocation9 + $0xa0] sm:$0xff]  ;;  %v4241_v34 = vld [vmem:[#allocation9 + $0xb0] sm:$0xff]  ;;  %v4234_v27 = vld [vmem:[#allocation9 + $0x78] sm:$0xff] }
 0xd5c   :  { %v4235_v20 = vld [vmem:[#allocation9 + $0x80] sm:$0xff] }
 0xd5d   :  { %v3958_v26 = vmul.f32 %v3956_v25, %v3949_v52  ;;  %v3954_v15 = vadd.f32 0.5, %v3953_v17  ;;  %v4236_v52 = vld [vmem:[#allocation9 + $0x88] sm:$0xff]  ;;  %v4238_v25 = vld [vmem:[#allocation9 + $0x98] sm:$0xff]  ;;  %v4231_v17 = vld [vmem:[#allocation9 + $0x60] sm:$0xff] }
 0xd5f   :  { %v6499_v55 = vadd.f32 %v3959_v24, %v3958_v26  ;;  %v4237_v26 = vld [vmem:[#allocation9 + $0x90] sm:$0xff]  ;;  %v4232_v24 = vld [vmem:[#allocation9 + $0x68] sm:$0xff] }
 0xd61   :  { %4777 = vtanh.f32 %v6499_v55 }
 0xd6e   :  { %v4778_v51 = vpop.eup %4777 }
 0xd6f   :  { %v3962_v45 = vmul.f32 %v4778_v51, %v3954_v15  ;;  %v4233_v15 = vld [vmem:[#allocation9 + $0x70] sm:$0xff]  ;;  %v4228_v51 = vld [vmem:[#allocation9 + $0x48] sm:$0xff] }
 0xd71   :  { %3963 = vst [vmem:[#allocation3 + $0x8] sm:$0xc] %v3962_v45  ;;  %v4033_v62 = vrot.slane %v3962_v45, 2  ;;  %v4230_v45 = vld [vmem:[#allocation9 + $0x58] sm:$0xff] }
 0xd73   :  { %4100 = vmatmul.mubr.f32.vlgmr.msra.gmra.mxu0 %v4033_v62  ;;  %4171 = vmatmul.mubr.f32.vlgmr.msra.gmra.mxu1 %v4033_v62  ;;  %v4227_v62 = vld [vmem:[#allocation9 + $0x40] sm:$0xff] }
 0xd74   :  { %4350 = vmatprep.mubr.f32.mxu0 %v7026_v57  ;;  %4421 = vmatprep.mubr.f32.mxu1 %v7026_v57  ;;  %v4265_v57 = vld [vmem:[#allocation9 + $0x170] sm:$0xff] }
 0xd75   :  { %4287 = vmatpush1.msra.mxu0 %v4279_v33  ;;  %4358 = vmatpush1.msra.mxu1 %v4281_v9  ;;  %v3964_v9 = vld [vmem:[#allocation2 + $0x8] sm:$0x30] }
 0xd76   :  { %4288 = vmatprep.subr.mxu0 %v4276_v31  ;;  %4359 = vmatprep.subr.mxu1 %v4278_v29 }
 0xd77   :  { %4289 = vmatpush1.msra.mxu0 %v4275_v32  ;;  %4360 = vmatpush1.msra.mxu1 %v4277_v35 }
 0xd78   :  { %4290 = vmatprep.subr.mxu0 %v4272_v4  ;;  %4361 = vmatprep.subr.mxu1 %v4274_v38 }
 0xd79   :  { %4291 = vmatpush1.msra.mxu0 %v4271_v23  ;;  %4362 = vmatpush1.msra.mxu1 %v4273_v37 }
 0xd7a   :  { %4292 = vmatprep.subr.mxu0 %v4268_v36  ;;  %4363 = vmatprep.subr.mxu1 %v4270_v40 }
 0xd7b   :  { %4293 = vmatpush1.msra.mxu0 %v4267_v18  ;;  %4364 = vmatpush1.msra.mxu1 %v4269_v30 }
 0xd7c   :  { %4294 = vmatprep.subr.mxu0 %v4264_v21  ;;  %4365 = vmatprep.subr.mxu1 %v4266_v41 }
 0xd7d   :  { %4295 = vmatpush1.msra.mxu0 %v4263_v47  ;;  %4366 = vmatpush1.msra.mxu1 %v4265_v57  ;;  %v4207_v47 = vrot.slane %v6499_v55, 6  ;;  %v4483_v55 = vld [vmem:[%s6578_s7 + $0x78] sm:$0xff] }
 0xd7e   :  { %4296 = vmatprep.subr.mxu0 %v4260_v13  ;;  %4367 = vmatprep.subr.mxu1 %v4262_v61 }
 0xd7f   :  { %4297 = vmatpush1.msra.mxu0 %v4259_v53  ;;  %4368 = vmatpush1.msra.mxu1 %v4261_v2 }
 0xd80   :  { %4298 = vmatprep.subr.mxu0 %v4256_v56  ;;  %4369 = vmatprep.subr.mxu1 %v4258_v6 }
 0xd81   :  { %4299 = vmatpush1.msra.mxu0 %v4255_v59  ;;  %4370 = vmatpush1.msra.mxu1 %v4257_v58 }
 0xd82   :  { %4300 = vmatprep.subr.mxu0 %v4252_v60  ;;  %4371 = vmatprep.subr.mxu1 %v4254_v49  ;;  %v4466_v49 = vld [vmem:[#allocation3] sm:$0xff] }
 0xd83   :  { %4301 = vmatpush1.msra.mxu0 %v4251_v3  ;;  %4372 = vmatpush1.msra.mxu1 %v4253_v7  ;;  %v4482_v3 = vld [vmem:[%s6578_s7 + $0x70] sm:$0xff]  ;;  %v4481_v7 = vld [vmem:[%s6578_s7 + $0x68] sm:$0xff] }
 0xd84   :  { %4302 = vmatprep.subr.mxu0 %v4248_v1  ;;  %4373 = vmatprep.subr.mxu1 %v4250_v0  ;;  %v4480_v1 = vld [vmem:[%s6578_s7 + $0x60] sm:$0xff]  ;;  %v4479_v0 = vld [vmem:[%s6578_s7 + $0x58] sm:$0xff] }
 0xd85   :  { %4303 = vmatpush1.msra.mxu0 %v4247_v5  ;;  %4374 = vmatpush1.msra.mxu1 %v4249_v8  ;;  %v4478_v5 = vld [vmem:[%s6578_s7 + $0x50] sm:$0xff]  ;;  %v4477_v8 = vld [vmem:[%s6578_s7 + $0x48] sm:$0xff] }
 0xd86   :  { %4304 = vmatprep.subr.mxu0 %v4244_v10  ;;  %4375 = vmatprep.subr.mxu1 %v4246_v11  ;;  %v4476_v10 = vld [vmem:[%s6578_s7 + $0x40] sm:$0xff]  ;;  %v4475_v11 = vld [vmem:[%s6578_s7 + $0x38] sm:$0xff] }
 0xd87   :  { %4305 = vmatpush1.msra.mxu0 %v4243_v12  ;;  %4376 = vmatpush1.msra.mxu1 %v4245_v14  ;;  %v4474_v12 = vld [vmem:[%s6578_s7 + $0x30] sm:$0xff]  ;;  %v4473_v14 = vld [vmem:[%s6578_s7 + $0x28] sm:$0xff] }
 0xd88   :  { %4306 = vmatprep.subr.mxu0 %v4240_v16  ;;  %4377 = vmatprep.subr.mxu1 %v4242_v39  ;;  %v4472_v16 = vld [vmem:[%s6578_s7 + $0x20] sm:$0xff]  ;;  %v4471_v39 = vld [vmem:[%s6578_s7 + $0x18] sm:$0xff] }
 0xd89   :  { %4307 = vmatpush1.msra.mxu0 %v4239_v19  ;;  %4378 = vmatpush1.msra.mxu1 %v4241_v34  ;;  %v4470_v19 = vld [vmem:[%s6578_s7 + $0x10] sm:$0xff]  ;;  %v4469_v34 = vld [vmem:[%s6578_s7 + $0x8] sm:$0xff] }
 0xd8a   :  { %4308 = vmatprep.subr.mxu0 %v4236_v52  ;;  %4379 = vmatprep.subr.mxu1 %v4238_v25  ;;  %v4468_v52 = vld [vmem:[%s6578_s7] sm:$0xff] }
 0xd8b   :  { %4309 = vmatpush1.msra.mxu0 %v4235_v20  ;;  %4380 = vmatpush1.msra.mxu1 %v4237_v26  ;;  %v4215_v26 = vld [vmem:[#allocation2 + $0x8] sm:$0xc0] }
 0xd8c   :  { %4310 = vmatprep.subr.mxu0 %v4232_v24  ;;  %4381 = vmatprep.subr.mxu1 %v4234_v27 }
 0xd8d   :  { %4311 = vmatpush1.msra.mxu0 %v4231_v17  ;;  %4382 = vmatpush1.msra.mxu1 %v4233_v15 }
 0xd8e   :  { %4312 = vmatprep.subr.mxu0 %v4228_v51  ;;  %4383 = vmatprep.subr.mxu1 %v4230_v45  ;;  %v4216_v51 = vld [vmem:[#allocation2 + $0x20] sm:$0xc0] }
 0xd8f   :  { %4313 = vmatpush1.msra.mxu0 %v4227_v62  ;;  %4384 = vmatpush1.msra.mxu1 %v4229_v22 }
 0xd90   :  { %4314 = vmatprep.subr.mxu0 %v7019_v42  ;;  %4385 = vmatprep.subr.mxu1 %v7020_v43  ;;  %v3965_v43 = vld [vmem:[#allocation2 + $0x20] sm:$0x30] }
 0xd91   :  { %4315 = vmatpush1.msra.mxu0 %v7021_v44  ;;  %4386 = vmatpush1.msra.mxu1 %v7022_v46 }
 0xd92   :  { %4316 = vmatprep.subr.mxu0 %v7023_v48  ;;  %4387 = vmatprep.subr.mxu1 %v7024_v50  ;;  %v3966_v48 = vld [vmem:[#allocation2 + $0x28] sm:$0x30] }
 0xd93   :  { %4317 = vmatpush1.msra.mxu0 %v7025_v28  ;;  %4388 = vmatpush1.msra.mxu1 %v7027_v63  ;;  %v3967_v63 = vld [vmem:[#allocation2 + $0x38] sm:$0x30] }
 0xd94   :  { %4598 = vmatprep.subr.mxu0 %v4483_v55 }
 0xe33   :  { %v4101_v54 = vpop.f32.mrf.mxu0  ;;  %v4172_v31 = vpop.f32.mrf.mxu1 }
 0xe34   :  { %v4181_v33 = vrot.slane %v4101_v54, 4  ;;  %v4183_v44 = vrot.slane %v4172_v31, 4 }
 0xe35   :  { %v4103_v29 = vpop.f32.mrf.mxu0  ;;  %v4174_v38 = vpop.f32.mrf.mxu1 }
 0xe36   :  { %v4189_v42 = vadd.f32 %v4181_v33, %v3964_v9  ;;  %v4182_v32 = vrot.slane %v4103_v29, 4  ;;  %v4191_v50 = vadd.f32 %v4183_v44, %v3966_v48  ;;  %v4184_v28 = vrot.slane %v4174_v38, 4  ;;  %v4217_v33 = vld [vmem:[#allocation2 + $0x28] sm:$0xc0] }
 0xe38   :  { %v4193_v35 = vmul.f32 0.5, %v4189_v42  ;;  %v4190_v4 = vadd.f32 %v4182_v32, %v3965_v43  ;;  %v4192_v23 = vadd.f32 %v4184_v28, %v3967_v63  ;;  %v4218_v42 = vld [vmem:[#allocation2 + $0x38] sm:$0xc0] }
 0xe3a   :  { %4779 = vtanh.f32 %v4193_v35  ;;  %v4197_v46 = vmul.f32 0.5, %v4190_v4  ;;  %v4202_v37 = vmul.f32 0.5, %v4192_v23 }
 0xe3c   :  { %4781 = vtanh.f32 %v4197_v46 }
 0xe3d   :  { %4783 = vtanh.f32 %v4191_v50 }
 0xe3e   :  { %4785 = vtanh.f32 %v4202_v37 }
 0xe47   :  { %v4780_v36 = vpop.eup %4779 }
 0xe48   :  { %v4195_v40 = vmul.f32 0.5, %v4780_v36 }
 0xe49   :  { %v4782_v18 = vpop.eup %4781 }
 0xe4a   :  { %v4196_v30 = vadd.f32 0.5, %v4195_v40  ;;  %v4199_v21 = vmul.f32 0.5, %v4782_v18  ;;  %v4784_v57 = vpop.eup %4783 }
 0xe4b   :  { %v4786_v2 = vpop.eup %4785 }
 0xe4c   :  { %v4200_v41 = vadd.f32 0.5, %v4199_v21  ;;  %v4210_v61 = vmul.f32 %v4784_v57, %v4196_v30  ;;  %v4204_v56 = vmul.f32 0.5, %v4786_v2 }
 0xe4e   :  { %v4209_v13 = vmul.f32 %v4207_v47, %v4200_v41  ;;  %v4205_v6 = vadd.f32 0.5, %v4204_v56  ;;  %v4579_v47 = vld [vmem:[#allocation4] ss:$0 sm:$0xff] }
 0xe50   :  { %v6513_v53 = vadd.f32 %v4210_v61, %v4209_v13 }
 0xe52   :  { %4787 = vtanh.f32 %v6513_v53  ;;  %v4458_v50 = vrot.slane %v6513_v53, 6 }
 0xe5f   :  { %v4788_v59 = vpop.eup %4787 }
 0xe60   :  { %v4213_v58 = vmul.f32 %v4788_v59, %v4205_v6 }
 0xe62   :  { %4214 = vst [vmem:[#allocation3 + $0x8] sm:$0x30] %v4213_v58  ;;  %v4284_v60 = vrot.slane %v4213_v58, 4 }
 0xe64   :  { %4351 = vmatmul.mubr.f32.vlgmr.msra.gmra.mxu0 %v4284_v60  ;;  %4422 = vmatmul.mubr.f32.vlgmr.msra.gmra.mxu1 %v4284_v60 }
 0xe65   :  { %4630 = vmatprep.mubr.f32.mxu0 %v4466_v49  ;;  %4599 = vmatpush3.msra.mxu0 %v4483_v55 }
 0xe66   :  { %4600 = vmatprep.subr.mxu0 %v4482_v3 }
 0xe67   :  { %4601 = vmatpush3.msra.mxu0 %v4482_v3 }
 0xe68   :  { %4602 = vmatprep.subr.mxu0 %v4481_v7 }
 0xe69   :  { %4603 = vmatpush3.msra.mxu0 %v4481_v7 }
 0xe6a   :  { %4604 = vmatprep.subr.mxu0 %v4480_v1 }
 0xe6b   :  { %4605 = vmatpush3.msra.mxu0 %v4480_v1 }
 0xe6c   :  { %4606 = vmatprep.subr.mxu0 %v4479_v0 }
 0xe6d   :  { %4607 = vmatpush3.msra.mxu0 %v4479_v0 }
 0xe6e   :  { %4608 = vmatprep.subr.mxu0 %v4478_v5 }
 0xe6f   :  { %4609 = vmatpush3.msra.mxu0 %v4478_v5 }
 0xe70   :  { %4610 = vmatprep.subr.mxu0 %v4477_v8 }
 0xe71   :  { %4611 = vmatpush3.msra.mxu0 %v4477_v8 }
 0xe72   :  { %4612 = vmatprep.subr.mxu0 %v4476_v10 }
 0xe73   :  { %4613 = vmatpush3.msra.mxu0 %v4476_v10 }
 0xe74   :  { %4614 = vmatprep.subr.mxu0 %v4475_v11 }
 0xe75   :  { %4615 = vmatpush3.msra.mxu0 %v4475_v11 }
 0xe76   :  { %4616 = vmatprep.subr.mxu0 %v4474_v12 }
 0xe77   :  { %4617 = vmatpush3.msra.mxu0 %v4474_v12 }
 0xe78   :  { %4618 = vmatprep.subr.mxu0 %v4473_v14 }
 0xe79   :  { %4619 = vmatpush3.msra.mxu0 %v4473_v14 }
 0xe7a   :  { %4620 = vmatprep.subr.mxu0 %v4472_v16 }
 0xe7b   :  { %4621 = vmatpush3.msra.mxu0 %v4472_v16 }
 0xe7c   :  { %4622 = vmatprep.subr.mxu0 %v4471_v39 }
 0xe7d   :  { %4623 = vmatpush3.msra.mxu0 %v4471_v39 }
 0xe7e   :  { %4624 = vmatprep.subr.mxu0 %v4470_v19 }
 0xe7f   :  { %4625 = vmatpush3.msra.mxu0 %v4470_v19 }
 0xe80   :  { %4626 = vmatprep.subr.mxu0 %v4469_v34 }
 0xe81   :  { %4627 = vmatpush3.msra.mxu0 %v4469_v34 }
 0xe82   :  { %4628 = vmatprep.subr.mxu0 %v4468_v52 }
 0xe83   :  { %4629 = vmatpush3.msra.mxu0 %v4468_v52 }
 0xf24   :  { %v4352_v25 = vpop.f32.mrf.mxu0  ;;  %v4423_v24 = vpop.f32.mrf.mxu1 }
 0xf25   :  { %v4432_v20 = vrot.slane %v4352_v25, 2  ;;  %v4434_v62 = vrot.slane %v4423_v24, 2 }
 0xf26   :  { %v4354_v27 = vpop.f32.mrf.mxu0  ;;  %v4425_v9 = vpop.f32.mrf.mxu1 }
 0xf27   :  { %v4440_v17 = vadd.f32 %v4432_v20, %v4215_v26  ;;  %v4433_v15 = vrot.slane %v4354_v27, 2  ;;  %v4442_v31 = vadd.f32 %v4434_v62, %v4217_v33  ;;  %v4435_v29 = vrot.slane %v4425_v9, 2 }
 0xf29   :  { %v4444_v45 = vmul.f32 0.5, %v4440_v17  ;;  %v4441_v22 = vadd.f32 %v4433_v15, %v4216_v51  ;;  %v4443_v32 = vadd.f32 %v4435_v29, %v4218_v42 }
 0xf2b   :  { %4789 = vtanh.f32 %v4444_v45  ;;  %v4448_v54 = vmul.f32 0.5, %v4441_v22  ;;  %v4453_v43 = vmul.f32 0.5, %v4443_v32 }
 0xf2d   :  { %4791 = vtanh.f32 %v4448_v54 }
 0xf2e   :  { %4793 = vtanh.f32 %v4442_v31 }
 0xf2f   :  { %4795 = vtanh.f32 %v4453_v43 }
 0xf38   :  { %v4790_v35 = vpop.eup %4789 }
 0xf39   :  { %v4446_v44 = vmul.f32 0.5, %v4790_v35 }
 0xf3a   :  { %v4792_v4 = vpop.eup %4791 }
 0xf3b   :  { %v4447_v46 = vadd.f32 0.5, %v4446_v44  ;;  %v4450_v48 = vmul.f32 0.5, %v4792_v4  ;;  %v4794_v28 = vpop.eup %4793 }
 0xf3c   :  { %v4796_v36 = vpop.eup %4795 }
 0xf3d   :  { %v4451_v38 = vadd.f32 0.5, %v4450_v48  ;;  %v4461_v23 = vmul.f32 %v4794_v28, %v4447_v46  ;;  %v4455_v40 = vmul.f32 0.5, %v4796_v36 }
 0xf3f   :  { %v4460_v63 = vmul.f32 %v4458_v50, %v4451_v38  ;;  %v4456_v18 = vadd.f32 0.5, %v4455_v40 }
 0xf41   :  { %v4462_v37 = vadd.f32 %v4461_v23, %v4460_v63 }
 0xf43   :  { %4797 = vtanh.f32 %v4462_v37 }
 0xf50   :  { %v4798_v30 = vpop.eup %4797 }
 0xf51   :  { %v4464_v21 = vmul.f32 %v4798_v30, %v4456_v18 }
 0xf53   :  { %4465 = vst [vmem:[#allocation3 + $0x8] sm:$0xc0] %v4464_v21 }
 0xf5a   :  { %v4467_v41 = vld [vmem:[#allocation3 + $0x8] sm:$0xff] }
 0xf5b   :  { %4631 = vmatmul.mubr.f32.vlgmr.msra.gmra.mxu0 %v4467_v41 }
0x101b   :  { %v4632_v57 = vpop.f32.mrf.mxu0 }
0x101c   :  { %v4563_v13 = vadd.f32 %v4632_v57, %v4579_v47 }
0x101d   :  { %v4557_v61 = vpop.f32.mrf.mxu0 }
0x101e   :  { %4568 = vst.msk [vmem:[%s6580_s9 + $0x8] sm:$0xff] %vm4566_vm1, %v4563_v13  ;;  %v4558_v53 = vadd.f32 %v4579_v47, %v4557_v61 }
0x1020   :  { %4567 = vst.msk [vmem:[%s6580_s9] sm:$0xff] %vm4566_vm1, %v4558_v53 }
0x1021   :  { %4573 = vsyncpa [#allocation6], 1 }
0x1022   :  { %4574 = vsyncpa [#allocation8], 1 }

</bundles_post_ra>
